<compile_context>
chip_gen: v7x
topology: tpu7x:2x2x1
jax: 0.10.0
libtpu: 0.0.40
codegen_flags: <defaults>
</compile_context>

<pallas_src>
import numpy as np
import jax
import jax.numpy as jnp
from jax import lax
from jax.experimental import pallas as pl
from jax.experimental.pallas import tpu as pltpu

# ---------------------------------------------------------------------------
# Static network dimensions (Conv2d(1,10,5), Conv2d(10,20,5), Linear(320,50),
# Linear(50,10), MNIST 28x28 single-channel input).
# ---------------------------------------------------------------------------
B_TILE = 8                      # images per grid step
K = 5                           # conv kernel size
H1 = W1 = 28                    # conv1 input spatial
C1 = 10                         # conv1 output channels
HO1 = WO1 = H1 - K + 1          # 24
HP1 = WP1 = HO1 // 2            # 12
C2 = 20                         # conv2 output channels
H2 = W2 = HP1                   # conv2 input spatial (12)
HO2 = WO2 = H2 - K + 1          # 8
HP2 = WP2 = HO2 // 2            # 4
NFEAT = C2 * HP2 * WP2          # 320
NHID = 50
NCLS = 10


# ---------------------------------------------------------------------------
# Constant-matrix builders (wrapper side; weight/tile-size dependent only)
# ---------------------------------------------------------------------------
def _banded_conv_mat(w_hwio, w_in):
    """w_hwio: (KH, KW, Cin, Cout) -> (KH, Cin*W_in, Cout*Wo) banded matrices.

    Row index = ci*W_in + w ; column index = co*Wo + wo ;
    M[kh, ci*W_in + w, co*Wo + wo] = w[kh, w-wo, ci, co] when 0 <= w-wo < KW.
    Contracting an input row (lanes ordered (ci, w)) against M[kh] performs the
    width-direction part of the valid conv for height tap kh.
    """
    KH, KW, Cin, Cout = w_hwio.shape
    wo_n = w_in - KW + 1
    w_idx = jnp.arange(w_in)[:, None]
    wo_idx = jnp.arange(wo_n)[None, :]
    kw = w_idx - wo_idx                                   # (W_in, Wo)
    valid = (kw >= 0) & (kw < KW)
    kw_c = jnp.clip(kw, 0, KW - 1)
    g = w_hwio[:, kw_c, :, :]                             # (KH, W_in, Wo, Cin, Cout)
    g = jnp.where(valid[None, :, :, None, None], g, 0.0)
    g = g.transpose(0, 3, 1, 4, 2)                        # (KH, Cin, W_in, Cout, Wo)
    return g.reshape(KH, Cin * w_in, Cout * wo_n).astype(jnp.float32)


def _wpool_select(cout, wo):
    """(2, cout*wo, cout*wo//2): select even / odd width positions per channel."""
    wp = wo // 2
    sel = np.zeros((2, cout * wo, cout * wp), np.float32)
    for co in range(cout):
        for w in range(wp):
            sel[0, co * wo + 2 * w, co * wp + w] = 1.0
            sel[1, co * wo + 2 * w + 1, co * wp + w] = 1.0
    return jnp.asarray(sel)


def _hpool_select(b, ho):
    """(2, b*ho//2, b*ho): select even / odd output rows within each image."""
    hp = ho // 2
    sel = np.zeros((2, b * hp, b * ho), np.float32)
    for bb in range(b):
        for h in range(hp):
            sel[0, bb * hp + h, bb * ho + 2 * h] = 1.0
            sel[1, bb * hp + h, bb * ho + 2 * h + 1] = 1.0
    return jnp.asarray(sel)


def _rowshift_select(b, h_in, kh_n, ho):
    """(KH, b*ho, b*h_in): R[kh, b*ho + r, b*h_in + r + kh] = 1 (conv2 row taps)."""
    sel = np.zeros((kh_n, b * ho, b * h_in), np.float32)
    for kh in range(kh_n):
        for bb in range(b):
            for r in range(ho):
                sel[kh, bb * ho + r, bb * h_in + r + kh] = 1.0
    return jnp.asarray(sel)


def _flatten_select(b, hp):
    """(hp, b, b*hp): S[h, bb, bb*hp + h] = 1 (pick row h of every image)."""
    sel = np.zeros((hp, b, b * hp), np.float32)
    for h in range(hp):
        for bb in range(b):
            sel[h, bb, bb * hp + h] = 1.0
    return jnp.asarray(sel)


def prepare_net_params(params):
    """Repack the weights into the kernel's matmul-friendly constant operands."""
    m1 = _banded_conv_mat(params["w_conv1"], W1)                  # (5, 28, 240)
    bc1 = jnp.repeat(params["b_conv1"], WO1)[None, :]             # (1, 240)
    sw1 = _wpool_select(C1, WO1)                                  # (2, 240, 120)
    sh1 = _hpool_select(B_TILE, HO1)                              # (2, 96, 192)
    r2 = _rowshift_select(B_TILE, HP1, K, HO2)                    # (5, 64, 96)
    m2 = _banded_conv_mat(params["w_conv2"], W2)                  # (5, 120, 160)
    bc2 = jnp.repeat(params["b_conv2"], WO2)[None, :]             # (1, 160)
    sw2 = _wpool_select(C2, WO2)                                  # (2, 160, 80)
    sh2 = _hpool_select(B_TILE, HO2)                              # (2, 32, 64)
    fsel = _flatten_select(B_TILE, HP2)                           # (4, 8, 32)
    # fc1 rows are in PyTorch NCHW-flatten order (c*16 + h*4 + w); split by h and
    # reorder rows to the kernel's (c, w) lane order so the flatten is free.
    v1 = (params["w_fc1"].reshape(C2, HP2, WP2, NHID)
          .transpose(1, 0, 2, 3).reshape(HP2, C2 * WP2, NHID))    # (4, 80, 50)
    bf1 = params["b_fc1"][None, :]                                # (1, 50)
    wf2 = params["w_fc2"]                                         # (50, 10)
    bf2 = params["b_fc2"][None, :]                                # (1, 10)
    return (m1, bc1, sw1, sh1, r2, m2, bc2, sw2, sh2, fsel, v1, bf1, wf2, bf2)


# ---------------------------------------------------------------------------
# Fused kernel: whole forward pass for one batch tile, everything in VMEM.
# ---------------------------------------------------------------------------
def net_fused_kernel(x_ref, m1_ref, bc1_ref, sw1_ref, sh1_ref,
                     r2_ref, m2_ref, bc2_ref, sw2_ref, sh2_ref,
                     fsel_ref, v1_ref, bf1_ref, wf2_ref, bf2_ref,
                     o_ref):
    f32 = jnp.float32
    B = x_ref.shape[0]

    # ---- conv1: (B,28,28) -> rows=(b,ho), lanes=(c,wo) via banded matmuls ----
    x = x_ref[...]                                          # (B, 28, 28)
    z1 = jnp.zeros((B * HO1, C1 * WO1), f32)                # (192, 240)
    for kh in range(K):
        rows = x[:, kh:kh + HO1, :].reshape(B * HO1, W1)    # (192, 28) safe merge
        z1 = z1 + jnp.dot(rows, m1_ref[kh], preferred_element_type=f32)
    z1 = z1 + bc1_ref[...]

    # ---- maxpool 2x2 + relu (0/1 selection matmuls on MXU) ----
    zw = jnp.maximum(jnp.dot(z1, sw1_ref[0], preferred_element_type=f32),
                     jnp.dot(z1, sw1_ref[1], preferred_element_type=f32))
    p1 = jnp.maximum(
        jnp.maximum(jnp.dot(sh1_ref[0], zw, preferred_element_type=f32),
                    jnp.dot(sh1_ref[1], zw, preferred_element_type=f32)),
        0.0)                                                # (96, 120) rows=(b,h) lanes=(c,w)

    # ---- conv2: rows=(b,ho), lanes=(c,wo) ----
    z2 = jnp.zeros((B * HO2, C2 * WO2), f32)                # (64, 160)
    for kh in range(K):
        rows = jnp.dot(r2_ref[kh], p1, preferred_element_type=f32)   # (64, 120)
        z2 = z2 + jnp.dot(rows, m2_ref[kh], preferred_element_type=f32)
    z2 = z2 + bc2_ref[...]
    # conv2_drop (Dropout2d): identity in eval mode.

    # ---- maxpool 2x2 + relu ----
    zw2 = jnp.maximum(jnp.dot(z2, sw2_ref[0], preferred_element_type=f32),
                      jnp.dot(z2, sw2_ref[1], preferred_element_type=f32))
    p2 = jnp.maximum(
        jnp.maximum(jnp.dot(sh2_ref[0], zw2, preferred_element_type=f32),
                    jnp.dot(sh2_ref[1], zw2, preferred_element_type=f32)),
        0.0)                                                # (32, 80) rows=(b,h) lanes=(c,w)

    # ---- flatten (PyTorch NCHW order folded into fc1 weights) + fc1 ----
    h = jnp.zeros((B, NHID), f32)
    for hh in range(HP2):
        sel_rows = jnp.dot(fsel_ref[hh], p2, preferred_element_type=f32)  # (B, 80)
        h = h + jnp.dot(sel_rows, v1_ref[hh], preferred_element_type=f32)
    h = jnp.maximum(h + bf1_ref[...], 0.0)
    # F.dropout(x, training=self.training): identity in eval mode.

    # ---- fc2 + log_softmax ----
    logits = jnp.dot(h, wf2_ref[...], preferred_element_type=f32) + bf2_ref[...]
    m = jnp.max(logits, axis=-1, keepdims=True)
    s = jnp.sum(jnp.exp(logits - m), axis=-1, keepdims=True)
    o_ref[...] = logits - (m + jnp.log(s))


def _const_spec(shape):
    n = len(shape)
    return pl.BlockSpec(shape, lambda i, _n=n: (0,) * _n)


@jax.jit
def net_forward(x_nchw, packed):
    """x_nchw: (N, 1, 28, 28) -> (N, 10) log-probabilities."""
    N = x_nchw.shape[0]
    x = x_nchw[:, 0, :, :].astype(jnp.float32)              # (N, 28, 28)
    n_pad = -(-N // B_TILE) * B_TILE
    if n_pad != N:
        x = jnp.pad(x, ((0, n_pad - N), (0, 0), (0, 0)))

    out = pl.pallas_call(
        net_fused_kernel,
        out_shape=jax.ShapeDtypeStruct((n_pad, NCLS), jnp.float32),
        grid=(n_pad // B_TILE,),
        in_specs=[pl.BlockSpec((B_TILE, H1, W1), lambda i: (i, 0, 0))]
                 + [_const_spec(tuple(p.shape)) for p in packed],
        out_specs=pl.BlockSpec((B_TILE, NCLS), lambda i: (i, 0)),
        compiler_params=pltpu.CompilerParams(dimension_semantics=("parallel",)),
    )(x, *packed)
    return out[:N]


# ---------------------------------------------------------------------------
# Pure-JAX reference (eval mode) for correctness checking
# ---------------------------------------------------------------------------
def _maxpool2_nchw(y):
    n, c, h, w = y.shape
    return y.reshape(n, c, h // 2, 2, w // 2, 2).max(axis=(3, 5))


def net_reference(params, x_nchw):
    dn = ("NCHW", "HWIO", "NCHW")
    x = x_nchw.astype(jnp.float32)
    y = lax.conv_general_dilated(x, params["w_conv1"], (1, 1), "VALID",
                                 dimension_numbers=dn,
                                 precision=lax.Precision.HIGHEST)
    y = y + params["b_conv1"][None, :, None, None]
    y = jnp.maximum(_maxpool2_nchw(y), 0.0)
    y = lax.conv_general_dilated(y, params["w_conv2"], (1, 1), "VALID",
                                 dimension_numbers=dn,
                                 precision=lax.Precision.HIGHEST)
    y = y + params["b_conv2"][None, :, None, None]
    y = jnp.maximum(_maxpool2_nchw(y), 0.0)
    feat = y.reshape(y.shape[0], NFEAT)                     # NCHW flatten = PyTorch order
    h = jnp.maximum(feat @ params["w_fc1"] + params["b_fc1"], 0.0)
    logits = h @ params["w_fc2"] + params["b_fc2"]
    return jax.nn.log_softmax(logits, axis=-1)


# ---------------------------------------------------------------------------
# Deterministic parameter init (shapes from Net.__init__)
# ---------------------------------------------------------------------------
def init_params(key):
    ks = jax.random.split(key, 8)

    def unif(k, shape, fan_in):
        bound = 1.0 / (fan_in ** 0.5)
        return jax.random.uniform(k, shape, jnp.float32, -bound, bound)

    return dict(
        # conv1: Conv2d(1, 10, 5) stored HWIO (5, 5, 1, 10)
        w_conv1=unif(ks[0], (5, 5, 1, 10), 1 * 5 * 5),
        b_conv1=unif(ks[1], (10,), 1 * 5 * 5),
        # conv2: Conv2d(10, 20, 5) stored HWIO (5, 5, 10, 20)
        w_conv2=unif(ks[2], (5, 5, 10, 20), 10 * 5 * 5),
        b_conv2=unif(ks[3], (20,), 10 * 5 * 5),
        # fc1: Linear(320, 50) stored (in, out), rows in PyTorch NCHW-flatten order
        w_fc1=unif(ks[4], (320, 50), 320),
        b_fc1=unif(ks[5], (50,), 320),
        # fc2: Linear(50, 10) stored (in, out)
        w_fc2=unif(ks[6], (50, 10), 50),
        b_fc2=unif(ks[7], (10,), 50),
    )


if __name__ == "__main__":
    key = jax.random.PRNGKey(0)
    pkey, xkey = jax.random.split(key)
    params = init_params(pkey)
    packed = prepare_net_params(params)      # one-time weight repacking

    # batch=2, MNIST-shaped input (1 channel, 28x28) so that flatten -> 320.
    x = jax.random.normal(xkey, (2, 1, 28, 28), jnp.float32)

    out = net_forward(x, packed)
    out = jax.block_until_ready(out)

    assert out.shape == (2, NCLS)
    assert bool(jnp.all(jnp.isfinite(out)))
    # log_softmax rows must exponentiate-sum to ~1
    row_sums = jnp.sum(jnp.exp(out), axis=-1)
    assert bool(jnp.all(jnp.abs(row_sums - 1.0) < 1e-4))
    # match the pure-JAX reference forward pass
    ref = net_reference(params, x)
    assert bool(jnp.allclose(out, ref, atol=1e-3, rtol=1e-3))

    print("KERNEL_OK")
</pallas_src>

<mosaic_0001>
module attributes {stable_mosaic.version = 11 : i64} {
  func.func @net_fused_kernel(%arg0: i32, %arg1: memref<8x28x28xf32, #tpu.memory_space<vmem>>, %arg2: memref<5x28x240xf32, #tpu.memory_space<vmem>>, %arg3: memref<1x240xf32, #tpu.memory_space<vmem>>, %arg4: memref<2x240x120xf32, #tpu.memory_space<vmem>>, %arg5: memref<2x96x192xf32, #tpu.memory_space<vmem>>, %arg6: memref<5x64x96xf32, #tpu.memory_space<vmem>>, %arg7: memref<5x120x160xf32, #tpu.memory_space<vmem>>, %arg8: memref<1x160xf32, #tpu.memory_space<vmem>>, %arg9: memref<2x160x80xf32, #tpu.memory_space<vmem>>, %arg10: memref<2x32x64xf32, #tpu.memory_space<vmem>>, %arg11: memref<4x8x32xf32, #tpu.memory_space<vmem>>, %arg12: memref<4x80x50xf32, #tpu.memory_space<vmem>>, %arg13: memref<1x50xf32, #tpu.memory_space<vmem>>, %arg14: memref<50x10xf32, #tpu.memory_space<vmem>>, %arg15: memref<1x10xf32, #tpu.memory_space<vmem>>, %arg16: memref<8x10xf32, #tpu.memory_space<vmem>>) attributes {dimension_semantics = [#tpu.dimension_semantics<parallel>], iteration_bounds = array<i64: 1>, scalar_prefetch = 0 : i64, scratch_operands = 0 : i64, tpu.core_type = #tpu.core_type<tc>, window_params = [{transform_indices = @transform_0, window_bounds = array<i64: 8, 28, 28>}, {pipeline_mode = #tpu.pipeline_mode<synchronous>, transform_indices = @transform_1, window_bounds = array<i64: 5, 28, 240>}, {pipeline_mode = #tpu.pipeline_mode<synchronous>, transform_indices = @transform_2, window_bounds = array<i64: 1, 240>}, {pipeline_mode = #tpu.pipeline_mode<synchronous>, transform_indices = @transform_3, window_bounds = array<i64: 2, 240, 120>}, {pipeline_mode = #tpu.pipeline_mode<synchronous>, transform_indices = @transform_4, window_bounds = array<i64: 2, 96, 192>}, {pipeline_mode = #tpu.pipeline_mode<synchronous>, transform_indices = @transform_5, window_bounds = array<i64: 5, 64, 96>}, {pipeline_mode = #tpu.pipeline_mode<synchronous>, transform_indices = @transform_6, window_bounds = array<i64: 5, 120, 160>}, {pipeline_mode = #tpu.pipeline_mode<synchronous>, transform_indices = @transform_7, window_bounds = array<i64: 1, 160>}, {pipeline_mode = #tpu.pipeline_mode<synchronous>, transform_indices = @transform_8, window_bounds = array<i64: 2, 160, 80>}, {pipeline_mode = #tpu.pipeline_mode<synchronous>, transform_indices = @transform_9, window_bounds = array<i64: 2, 32, 64>}, {pipeline_mode = #tpu.pipeline_mode<synchronous>, transform_indices = @transform_10, window_bounds = array<i64: 4, 8, 32>}, {pipeline_mode = #tpu.pipeline_mode<synchronous>, transform_indices = @transform_11, window_bounds = array<i64: 4, 80, 50>}, {pipeline_mode = #tpu.pipeline_mode<synchronous>, transform_indices = @transform_12, window_bounds = array<i64: 1, 50>}, {pipeline_mode = #tpu.pipeline_mode<synchronous>, transform_indices = @transform_13, window_bounds = array<i64: 50, 10>}, {pipeline_mode = #tpu.pipeline_mode<synchronous>, transform_indices = @transform_14, window_bounds = array<i64: 1, 10>}, {transform_indices = @transform_15, window_bounds = array<i64: 8, 10>}]} {
    %c0 = arith.constant 0 : index
    %c0_0 = arith.constant 0 : index
    %c0_1 = arith.constant 0 : index
    %0 = vector.load %arg1[%c0, %c0_0, %c0_1] : memref<8x28x28xf32, #tpu.memory_space<vmem>>, vector<8x28x28xf32>
    %cst = arith.constant 0.000000e+00 : f32
    %1 = vector.broadcast %cst : f32 to vector<192x240xf32>
    %2 = vector.extract_strided_slice %0 {offsets = [0, 0, 0], sizes = [8, 24, 28], strides = [1, 1, 1]} : vector<8x28x28xf32> to vector<8x24x28xf32>
    %3 = vector.shape_cast %2 : vector<8x24x28xf32> to vector<192x28xf32>
    %c0_2 = arith.constant 0 : index
    %c0_3 = arith.constant 0 : index
    %c0_4 = arith.constant 0 : index
    %4 = vector.load %arg2[%c0_2, %c0_3, %c0_4] : memref<5x28x240xf32, #tpu.memory_space<vmem>>, vector<1x28x240xf32>
    %5 = vector.shape_cast %4 : vector<1x28x240xf32> to vector<28x240xf32>
    %cst_5 = arith.constant dense<0.000000e+00> : vector<192x240xf32>
    %6 = tpu.matmul %3, %5, %cst_5 {dimension_numbers = #tpu.dot_dimension_numbers<[1], [0], [0], [1], [0, 0, 1, 1], [], []>} : vector<192x28xf32>, vector<28x240xf32>, vector<192x240xf32> -> vector<192x240xf32>
    %7 = arith.addf %1, %6 : vector<192x240xf32>
    %8 = vector.extract_strided_slice %0 {offsets = [0, 1, 0], sizes = [8, 24, 28], strides = [1, 1, 1]} : vector<8x28x28xf32> to vector<8x24x28xf32>
    %9 = vector.shape_cast %8 : vector<8x24x28xf32> to vector<192x28xf32>
    %c1 = arith.constant 1 : index
    %c0_6 = arith.constant 0 : index
    %c0_7 = arith.constant 0 : index
    %10 = vector.load %arg2[%c1, %c0_6, %c0_7] : memref<5x28x240xf32, #tpu.memory_space<vmem>>, vector<1x28x240xf32>
    %11 = vector.shape_cast %10 : vector<1x28x240xf32> to vector<28x240xf32>
    %cst_8 = arith.constant dense<0.000000e+00> : vector<192x240xf32>
    %12 = tpu.matmul %9, %11, %cst_8 {dimension_numbers = #tpu.dot_dimension_numbers<[1], [0], [0], [1], [0, 0, 1, 1], [], []>} : vector<192x28xf32>, vector<28x240xf32>, vector<192x240xf32> -> vector<192x240xf32>
    %13 = arith.addf %7, %12 : vector<192x240xf32>
    %14 = vector.extract_strided_slice %0 {offsets = [0, 2, 0], sizes = [8, 24, 28], strides = [1, 1, 1]} : vector<8x28x28xf32> to vector<8x24x28xf32>
    %15 = vector.shape_cast %14 : vector<8x24x28xf32> to vector<192x28xf32>
    %c2 = arith.constant 2 : index
    %c0_9 = arith.constant 0 : index
    %c0_10 = arith.constant 0 : index
    %16 = vector.load %arg2[%c2, %c0_9, %c0_10] : memref<5x28x240xf32, #tpu.memory_space<vmem>>, vector<1x28x240xf32>
    %17 = vector.shape_cast %16 : vector<1x28x240xf32> to vector<28x240xf32>
    %cst_11 = arith.constant dense<0.000000e+00> : vector<192x240xf32>
    %18 = tpu.matmul %15, %17, %cst_11 {dimension_numbers = #tpu.dot_dimension_numbers<[1], [0], [0], [1], [0, 0, 1, 1], [], []>} : vector<192x28xf32>, vector<28x240xf32>, vector<192x240xf32> -> vector<192x240xf32>
    %19 = arith.addf %13, %18 : vector<192x240xf32>
    %20 = vector.extract_strided_slice %0 {offsets = [0, 3, 0], sizes = [8, 24, 28], strides = [1, 1, 1]} : vector<8x28x28xf32> to vector<8x24x28xf32>
    %21 = vector.shape_cast %20 : vector<8x24x28xf32> to vector<192x28xf32>
    %c3 = arith.constant 3 : index
    %c0_12 = arith.constant 0 : index
    %c0_13 = arith.constant 0 : index
    %22 = vector.load %arg2[%c3, %c0_12, %c0_13] : memref<5x28x240xf32, #tpu.memory_space<vmem>>, vector<1x28x240xf32>
    %23 = vector.shape_cast %22 : vector<1x28x240xf32> to vector<28x240xf32>
    %cst_14 = arith.constant dense<0.000000e+00> : vector<192x240xf32>
    %24 = tpu.matmul %21, %23, %cst_14 {dimension_numbers = #tpu.dot_dimension_numbers<[1], [0], [0], [1], [0, 0, 1, 1], [], []>} : vector<192x28xf32>, vector<28x240xf32>, vector<192x240xf32> -> vector<192x240xf32>
    %25 = arith.addf %19, %24 : vector<192x240xf32>
    %26 = vector.extract_strided_slice %0 {offsets = [0, 4, 0], sizes = [8, 24, 28], strides = [1, 1, 1]} : vector<8x28x28xf32> to vector<8x24x28xf32>
    %27 = vector.shape_cast %26 : vector<8x24x28xf32> to vector<192x28xf32>
    %c4 = arith.constant 4 : index
    %c0_15 = arith.constant 0 : index
    %c0_16 = arith.constant 0 : index
    %28 = vector.load %arg2[%c4, %c0_15, %c0_16] : memref<5x28x240xf32, #tpu.memory_space<vmem>>, vector<1x28x240xf32>
    %29 = vector.shape_cast %28 : vector<1x28x240xf32> to vector<28x240xf32>
    %cst_17 = arith.constant dense<0.000000e+00> : vector<192x240xf32>
    %30 = tpu.matmul %27, %29, %cst_17 {dimension_numbers = #tpu.dot_dimension_numbers<[1], [0], [0], [1], [0, 0, 1, 1], [], []>} : vector<192x28xf32>, vector<28x240xf32>, vector<192x240xf32> -> vector<192x240xf32>
    %31 = arith.addf %25, %30 : vector<192x240xf32>
    %c0_18 = arith.constant 0 : index
    %c0_19 = arith.constant 0 : index
    %32 = vector.load %arg3[%c0_18, %c0_19] : memref<1x240xf32, #tpu.memory_space<vmem>>, vector<1x240xf32>
    %33 = vector.broadcast %32 : vector<1x240xf32> to vector<192x240xf32>
    %34 = arith.addf %31, %33 : vector<192x240xf32>
    %c0_20 = arith.constant 0 : index
    %c0_21 = arith.constant 0 : index
    %c0_22 = arith.constant 0 : index
    %35 = vector.load %arg4[%c0_20, %c0_21, %c0_22] : memref<2x240x120xf32, #tpu.memory_space<vmem>>, vector<1x240x120xf32>
    %36 = vector.shape_cast %35 : vector<1x240x120xf32> to vector<240x120xf32>
    %cst_23 = arith.constant dense<0.000000e+00> : vector<192x120xf32>
    %37 = tpu.matmul %34, %36, %cst_23 {dimension_numbers = #tpu.dot_dimension_numbers<[1], [0], [0], [1], [0, 0, 1, 1], [], []>} : vector<192x240xf32>, vector<240x120xf32>, vector<192x120xf32> -> vector<192x120xf32>
    %c1_24 = arith.constant 1 : index
    %c0_25 = arith.constant 0 : index
    %c0_26 = arith.constant 0 : index
    %38 = vector.load %arg4[%c1_24, %c0_25, %c0_26] : memref<2x240x120xf32, #tpu.memory_space<vmem>>, vector<1x240x120xf32>
    %39 = vector.shape_cast %38 : vector<1x240x120xf32> to vector<240x120xf32>
    %cst_27 = arith.constant dense<0.000000e+00> : vector<192x120xf32>
    %40 = tpu.matmul %34, %39, %cst_27 {dimension_numbers = #tpu.dot_dimension_numbers<[1], [0], [0], [1], [0, 0, 1, 1], [], []>} : vector<192x240xf32>, vector<240x120xf32>, vector<192x120xf32> -> vector<192x120xf32>
    %41 = arith.maximumf %37, %40 : vector<192x120xf32>
    %c0_28 = arith.constant 0 : index
    %c0_29 = arith.constant 0 : index
    %c0_30 = arith.constant 0 : index
    %42 = vector.load %arg5[%c0_28, %c0_29, %c0_30] : memref<2x96x192xf32, #tpu.memory_space<vmem>>, vector<1x96x192xf32>
    %43 = vector.shape_cast %42 : vector<1x96x192xf32> to vector<96x192xf32>
    %cst_31 = arith.constant dense<0.000000e+00> : vector<96x120xf32>
    %44 = tpu.matmul %43, %41, %cst_31 {dimension_numbers = #tpu.dot_dimension_numbers<[1], [0], [0], [1], [0, 0, 1, 1], [], []>} : vector<96x192xf32>, vector<192x120xf32>, vector<96x120xf32> -> vector<96x120xf32>
    %c1_32 = arith.constant 1 : index
    %c0_33 = arith.constant 0 : index
    %c0_34 = arith.constant 0 : index
    %45 = vector.load %arg5[%c1_32, %c0_33, %c0_34] : memref<2x96x192xf32, #tpu.memory_space<vmem>>, vector<1x96x192xf32>
    %46 = vector.shape_cast %45 : vector<1x96x192xf32> to vector<96x192xf32>
    %cst_35 = arith.constant dense<0.000000e+00> : vector<96x120xf32>
    %47 = tpu.matmul %46, %41, %cst_35 {dimension_numbers = #tpu.dot_dimension_numbers<[1], [0], [0], [1], [0, 0, 1, 1], [], []>} : vector<96x192xf32>, vector<192x120xf32>, vector<96x120xf32> -> vector<96x120xf32>
    %48 = arith.maximumf %44, %47 : vector<96x120xf32>
    %cst_36 = arith.constant 0.000000e+00 : f32
    %49 = vector.broadcast %cst_36 : f32 to vector<96x120xf32>
    %50 = arith.maximumf %48, %49 : vector<96x120xf32>
    %cst_37 = arith.constant 0.000000e+00 : f32
    %51 = vector.broadcast %cst_37 : f32 to vector<64x160xf32>
    %c0_38 = arith.constant 0 : index
    %c0_39 = arith.constant 0 : index
    %c0_40 = arith.constant 0 : index
    %52 = vector.load %arg6[%c0_38, %c0_39, %c0_40] : memref<5x64x96xf32, #tpu.memory_space<vmem>>, vector<1x64x96xf32>
    %53 = vector.shape_cast %52 : vector<1x64x96xf32> to vector<64x96xf32>
    %cst_41 = arith.constant dense<0.000000e+00> : vector<64x120xf32>
    %54 = tpu.matmul %53, %50, %cst_41 {dimension_numbers = #tpu.dot_dimension_numbers<[1], [0], [0], [1], [0, 0, 1, 1], [], []>} : vector<64x96xf32>, vector<96x120xf32>, vector<64x120xf32> -> vector<64x120xf32>
    %c0_42 = arith.constant 0 : index
    %c0_43 = arith.constant 0 : index
    %c0_44 = arith.constant 0 : index
    %55 = vector.load %arg7[%c0_42, %c0_43, %c0_44] : memref<5x120x160xf32, #tpu.memory_space<vmem>>, vector<1x120x160xf32>
    %56 = vector.shape_cast %55 : vector<1x120x160xf32> to vector<120x160xf32>
    %cst_45 = arith.constant dense<0.000000e+00> : vector<64x160xf32>
    %57 = tpu.matmul %54, %56, %cst_45 {dimension_numbers = #tpu.dot_dimension_numbers<[1], [0], [0], [1], [0, 0, 1, 1], [], []>} : vector<64x120xf32>, vector<120x160xf32>, vector<64x160xf32> -> vector<64x160xf32>
    %58 = arith.addf %51, %57 : vector<64x160xf32>
    %c1_46 = arith.constant 1 : index
    %c0_47 = arith.constant 0 : index
    %c0_48 = arith.constant 0 : index
    %59 = vector.load %arg6[%c1_46, %c0_47, %c0_48] : memref<5x64x96xf32, #tpu.memory_space<vmem>>, vector<1x64x96xf32>
    %60 = vector.shape_cast %59 : vector<1x64x96xf32> to vector<64x96xf32>
    %cst_49 = arith.constant dense<0.000000e+00> : vector<64x120xf32>
    %61 = tpu.matmul %60, %50, %cst_49 {dimension_numbers = #tpu.dot_dimension_numbers<[1], [0], [0], [1], [0, 0, 1, 1], [], []>} : vector<64x96xf32>, vector<96x120xf32>, vector<64x120xf32> -> vector<64x120xf32>
    %c1_50 = arith.constant 1 : index
    %c0_51 = arith.constant 0 : index
    %c0_52 = arith.constant 0 : index
    %62 = vector.load %arg7[%c1_50, %c0_51, %c0_52] : memref<5x120x160xf32, #tpu.memory_space<vmem>>, vector<1x120x160xf32>
    %63 = vector.shape_cast %62 : vector<1x120x160xf32> to vector<120x160xf32>
    %cst_53 = arith.constant dense<0.000000e+00> : vector<64x160xf32>
    %64 = tpu.matmul %61, %63, %cst_53 {dimension_numbers = #tpu.dot_dimension_numbers<[1], [0], [0], [1], [0, 0, 1, 1], [], []>} : vector<64x120xf32>, vector<120x160xf32>, vector<64x160xf32> -> vector<64x160xf32>
    %65 = arith.addf %58, %64 : vector<64x160xf32>
    %c2_54 = arith.constant 2 : index
    %c0_55 = arith.constant 0 : index
    %c0_56 = arith.constant 0 : index
    %66 = vector.load %arg6[%c2_54, %c0_55, %c0_56] : memref<5x64x96xf32, #tpu.memory_space<vmem>>, vector<1x64x96xf32>
    %67 = vector.shape_cast %66 : vector<1x64x96xf32> to vector<64x96xf32>
    %cst_57 = arith.constant dense<0.000000e+00> : vector<64x120xf32>
    %68 = tpu.matmul %67, %50, %cst_57 {dimension_numbers = #tpu.dot_dimension_numbers<[1], [0], [0], [1], [0, 0, 1, 1], [], []>} : vector<64x96xf32>, vector<96x120xf32>, vector<64x120xf32> -> vector<64x120xf32>
    %c2_58 = arith.constant 2 : index
    %c0_59 = arith.constant 0 : index
    %c0_60 = arith.constant 0 : index
    %69 = vector.load %arg7[%c2_58, %c0_59, %c0_60] : memref<5x120x160xf32, #tpu.memory_space<vmem>>, vector<1x120x160xf32>
    %70 = vector.shape_cast %69 : vector<1x120x160xf32> to vector<120x160xf32>
    %cst_61 = arith.constant dense<0.000000e+00> : vector<64x160xf32>
    %71 = tpu.matmul %68, %70, %cst_61 {dimension_numbers = #tpu.dot_dimension_numbers<[1], [0], [0], [1], [0, 0, 1, 1], [], []>} : vector<64x120xf32>, vector<120x160xf32>, vector<64x160xf32> -> vector<64x160xf32>
    %72 = arith.addf %65, %71 : vector<64x160xf32>
    %c3_62 = arith.constant 3 : index
    %c0_63 = arith.constant 0 : index
    %c0_64 = arith.constant 0 : index
    %73 = vector.load %arg6[%c3_62, %c0_63, %c0_64] : memref<5x64x96xf32, #tpu.memory_space<vmem>>, vector<1x64x96xf32>
    %74 = vector.shape_cast %73 : vector<1x64x96xf32> to vector<64x96xf32>
    %cst_65 = arith.constant dense<0.000000e+00> : vector<64x120xf32>
    %75 = tpu.matmul %74, %50, %cst_65 {dimension_numbers = #tpu.dot_dimension_numbers<[1], [0], [0], [1], [0, 0, 1, 1], [], []>} : vector<64x96xf32>, vector<96x120xf32>, vector<64x120xf32> -> vector<64x120xf32>
    %c3_66 = arith.constant 3 : index
    %c0_67 = arith.constant 0 : index
    %c0_68 = arith.constant 0 : index
    %76 = vector.load %arg7[%c3_66, %c0_67, %c0_68] : memref<5x120x160xf32, #tpu.memory_space<vmem>>, vector<1x120x160xf32>
    %77 = vector.shape_cast %76 : vector<1x120x160xf32> to vector<120x160xf32>
    %cst_69 = arith.constant dense<0.000000e+00> : vector<64x160xf32>
    %78 = tpu.matmul %75, %77, %cst_69 {dimension_numbers = #tpu.dot_dimension_numbers<[1], [0], [0], [1], [0, 0, 1, 1], [], []>} : vector<64x120xf32>, vector<120x160xf32>, vector<64x160xf32> -> vector<64x160xf32>
    %79 = arith.addf %72, %78 : vector<64x160xf32>
    %c4_70 = arith.constant 4 : index
    %c0_71 = arith.constant 0 : index
    %c0_72 = arith.constant 0 : index
    %80 = vector.load %arg6[%c4_70, %c0_71, %c0_72] : memref<5x64x96xf32, #tpu.memory_space<vmem>>, vector<1x64x96xf32>
    %81 = vector.shape_cast %80 : vector<1x64x96xf32> to vector<64x96xf32>
    %cst_73 = arith.constant dense<0.000000e+00> : vector<64x120xf32>
    %82 = tpu.matmul %81, %50, %cst_73 {dimension_numbers = #tpu.dot_dimension_numbers<[1], [0], [0], [1], [0, 0, 1, 1], [], []>} : vector<64x96xf32>, vector<96x120xf32>, vector<64x120xf32> -> vector<64x120xf32>
    %c4_74 = arith.constant 4 : index
    %c0_75 = arith.constant 0 : index
    %c0_76 = arith.constant 0 : index
    %83 = vector.load %arg7[%c4_74, %c0_75, %c0_76] : memref<5x120x160xf32, #tpu.memory_space<vmem>>, vector<1x120x160xf32>
    %84 = vector.shape_cast %83 : vector<1x120x160xf32> to vector<120x160xf32>
    %cst_77 = arith.constant dense<0.000000e+00> : vector<64x160xf32>
    %85 = tpu.matmul %82, %84, %cst_77 {dimension_numbers = #tpu.dot_dimension_numbers<[1], [0], [0], [1], [0, 0, 1, 1], [], []>} : vector<64x120xf32>, vector<120x160xf32>, vector<64x160xf32> -> vector<64x160xf32>
    %86 = arith.addf %79, %85 : vector<64x160xf32>
    %c0_78 = arith.constant 0 : index
    %c0_79 = arith.constant 0 : index
    %87 = vector.load %arg8[%c0_78, %c0_79] : memref<1x160xf32, #tpu.memory_space<vmem>>, vector<1x160xf32>
    %88 = vector.broadcast %87 : vector<1x160xf32> to vector<64x160xf32>
    %89 = arith.addf %86, %88 : vector<64x160xf32>
    %c0_80 = arith.constant 0 : index
    %c0_81 = arith.constant 0 : index
    %c0_82 = arith.constant 0 : index
    %90 = vector.load %arg9[%c0_80, %c0_81, %c0_82] : memref<2x160x80xf32, #tpu.memory_space<vmem>>, vector<1x160x80xf32>
    %91 = vector.shape_cast %90 : vector<1x160x80xf32> to vector<160x80xf32>
    %cst_83 = arith.constant dense<0.000000e+00> : vector<64x80xf32>
    %92 = tpu.matmul %89, %91, %cst_83 {dimension_numbers = #tpu.dot_dimension_numbers<[1], [0], [0], [1], [0, 0, 1, 1], [], []>} : vector<64x160xf32>, vector<160x80xf32>, vector<64x80xf32> -> vector<64x80xf32>
    %c1_84 = arith.constant 1 : index
    %c0_85 = arith.constant 0 : index
    %c0_86 = arith.constant 0 : index
    %93 = vector.load %arg9[%c1_84, %c0_85, %c0_86] : memref<2x160x80xf32, #tpu.memory_space<vmem>>, vector<1x160x80xf32>
    %94 = vector.shape_cast %93 : vector<1x160x80xf32> to vector<160x80xf32>
    %cst_87 = arith.constant dense<0.000000e+00> : vector<64x80xf32>
    %95 = tpu.matmul %89, %94, %cst_87 {dimension_numbers = #tpu.dot_dimension_numbers<[1], [0], [0], [1], [0, 0, 1, 1], [], []>} : vector<64x160xf32>, vector<160x80xf32>, vector<64x80xf32> -> vector<64x80xf32>
    %96 = arith.maximumf %92, %95 : vector<64x80xf32>
    %c0_88 = arith.constant 0 : index
    %c0_89 = arith.constant 0 : index
    %c0_90 = arith.constant 0 : index
    %97 = vector.load %arg10[%c0_88, %c0_89, %c0_90] : memref<2x32x64xf32, #tpu.memory_space<vmem>>, vector<1x32x64xf32>
    %98 = vector.shape_cast %97 : vector<1x32x64xf32> to vector<32x64xf32>
    %cst_91 = arith.constant dense<0.000000e+00> : vector<32x80xf32>
    %99 = tpu.matmul %98, %96, %cst_91 {dimension_numbers = #tpu.dot_dimension_numbers<[1], [0], [0], [1], [0, 0, 1, 1], [], []>} : vector<32x64xf32>, vector<64x80xf32>, vector<32x80xf32> -> vector<32x80xf32>
    %c1_92 = arith.constant 1 : index
    %c0_93 = arith.constant 0 : index
    %c0_94 = arith.constant 0 : index
    %100 = vector.load %arg10[%c1_92, %c0_93, %c0_94] : memref<2x32x64xf32, #tpu.memory_space<vmem>>, vector<1x32x64xf32>
    %101 = vector.shape_cast %100 : vector<1x32x64xf32> to vector<32x64xf32>
    %cst_95 = arith.constant dense<0.000000e+00> : vector<32x80xf32>
    %102 = tpu.matmul %101, %96, %cst_95 {dimension_numbers = #tpu.dot_dimension_numbers<[1], [0], [0], [1], [0, 0, 1, 1], [], []>} : vector<32x64xf32>, vector<64x80xf32>, vector<32x80xf32> -> vector<32x80xf32>
    %103 = arith.maximumf %99, %102 : vector<32x80xf32>
    %cst_96 = arith.constant 0.000000e+00 : f32
    %104 = vector.broadcast %cst_96 : f32 to vector<32x80xf32>
    %105 = arith.maximumf %103, %104 : vector<32x80xf32>
    %cst_97 = arith.constant 0.000000e+00 : f32
    %106 = vector.broadcast %cst_97 : f32 to vector<8x50xf32>
    %c0_98 = arith.constant 0 : index
    %c0_99 = arith.constant 0 : index
    %c0_100 = arith.constant 0 : index
    %107 = vector.load %arg11[%c0_98, %c0_99, %c0_100] : memref<4x8x32xf32, #tpu.memory_space<vmem>>, vector<1x8x32xf32>
    %108 = vector.shape_cast %107 : vector<1x8x32xf32> to vector<8x32xf32>
    %cst_101 = arith.constant dense<0.000000e+00> : vector<8x80xf32>
    %109 = tpu.matmul %108, %105, %cst_101 {dimension_numbers = #tpu.dot_dimension_numbers<[1], [0], [0], [1], [0, 0, 1, 1], [], []>} : vector<8x32xf32>, vector<32x80xf32>, vector<8x80xf32> -> vector<8x80xf32>
    %c0_102 = arith.constant 0 : index
    %c0_103 = arith.constant 0 : index
    %c0_104 = arith.constant 0 : index
    %110 = vector.load %arg12[%c0_102, %c0_103, %c0_104] : memref<4x80x50xf32, #tpu.memory_space<vmem>>, vector<1x80x50xf32>
    %111 = vector.shape_cast %110 : vector<1x80x50xf32> to vector<80x50xf32>
    %cst_105 = arith.constant dense<0.000000e+00> : vector<8x50xf32>
    %112 = tpu.matmul %109, %111, %cst_105 {dimension_numbers = #tpu.dot_dimension_numbers<[1], [0], [0], [1], [0, 0, 1, 1], [], []>} : vector<8x80xf32>, vector<80x50xf32>, vector<8x50xf32> -> vector<8x50xf32>
    %113 = arith.addf %106, %112 : vector<8x50xf32>
    %c1_106 = arith.constant 1 : index
    %c0_107 = arith.constant 0 : index
    %c0_108 = arith.constant 0 : index
    %114 = vector.load %arg11[%c1_106, %c0_107, %c0_108] : memref<4x8x32xf32, #tpu.memory_space<vmem>>, vector<1x8x32xf32>
    %115 = vector.shape_cast %114 : vector<1x8x32xf32> to vector<8x32xf32>
    %cst_109 = arith.constant dense<0.000000e+00> : vector<8x80xf32>
    %116 = tpu.matmul %115, %105, %cst_109 {dimension_numbers = #tpu.dot_dimension_numbers<[1], [0], [0], [1], [0, 0, 1, 1], [], []>} : vector<8x32xf32>, vector<32x80xf32>, vector<8x80xf32> -> vector<8x80xf32>
    %c1_110 = arith.constant 1 : index
    %c0_111 = arith.constant 0 : index
    %c0_112 = arith.constant 0 : index
    %117 = vector.load %arg12[%c1_110, %c0_111, %c0_112] : memref<4x80x50xf32, #tpu.memory_space<vmem>>, vector<1x80x50xf32>
    %118 = vector.shape_cast %117 : vector<1x80x50xf32> to vector<80x50xf32>
    %cst_113 = arith.constant dense<0.000000e+00> : vector<8x50xf32>
    %119 = tpu.matmul %116, %118, %cst_113 {dimension_numbers = #tpu.dot_dimension_numbers<[1], [0], [0], [1], [0, 0, 1, 1], [], []>} : vector<8x80xf32>, vector<80x50xf32>, vector<8x50xf32> -> vector<8x50xf32>
    %120 = arith.addf %113, %119 : vector<8x50xf32>
    %c2_114 = arith.constant 2 : index
    %c0_115 = arith.constant 0 : index
    %c0_116 = arith.constant 0 : index
    %121 = vector.load %arg11[%c2_114, %c0_115, %c0_116] : memref<4x8x32xf32, #tpu.memory_space<vmem>>, vector<1x8x32xf32>
    %122 = vector.shape_cast %121 : vector<1x8x32xf32> to vector<8x32xf32>
    %cst_117 = arith.constant dense<0.000000e+00> : vector<8x80xf32>
    %123 = tpu.matmul %122, %105, %cst_117 {dimension_numbers = #tpu.dot_dimension_numbers<[1], [0], [0], [1], [0, 0, 1, 1], [], []>} : vector<8x32xf32>, vector<32x80xf32>, vector<8x80xf32> -> vector<8x80xf32>
    %c2_118 = arith.constant 2 : index
    %c0_119 = arith.constant 0 : index
    %c0_120 = arith.constant 0 : index
    %124 = vector.load %arg12[%c2_118, %c0_119, %c0_120] : memref<4x80x50xf32, #tpu.memory_space<vmem>>, vector<1x80x50xf32>
    %125 = vector.shape_cast %124 : vector<1x80x50xf32> to vector<80x50xf32>
    %cst_121 = arith.constant dense<0.000000e+00> : vector<8x50xf32>
    %126 = tpu.matmul %123, %125, %cst_121 {dimension_numbers = #tpu.dot_dimension_numbers<[1], [0], [0], [1], [0, 0, 1, 1], [], []>} : vector<8x80xf32>, vector<80x50xf32>, vector<8x50xf32> -> vector<8x50xf32>
    %127 = arith.addf %120, %126 : vector<8x50xf32>
    %c3_122 = arith.constant 3 : index
    %c0_123 = arith.constant 0 : index
    %c0_124 = arith.constant 0 : index
    %128 = vector.load %arg11[%c3_122, %c0_123, %c0_124] : memref<4x8x32xf32, #tpu.memory_space<vmem>>, vector<1x8x32xf32>
    %129 = vector.shape_cast %128 : vector<1x8x32xf32> to vector<8x32xf32>
    %cst_125 = arith.constant dense<0.000000e+00> : vector<8x80xf32>
    %130 = tpu.matmul %129, %105, %cst_125 {dimension_numbers = #tpu.dot_dimension_numbers<[1], [0], [0], [1], [0, 0, 1, 1], [], []>} : vector<8x32xf32>, vector<32x80xf32>, vector<8x80xf32> -> vector<8x80xf32>
    %c3_126 = arith.constant 3 : index
    %c0_127 = arith.constant 0 : index
    %c0_128 = arith.constant 0 : index
    %131 = vector.load %arg12[%c3_126, %c0_127, %c0_128] : memref<4x80x50xf32, #tpu.memory_space<vmem>>, vector<1x80x50xf32>
    %132 = vector.shape_cast %131 : vector<1x80x50xf32> to vector<80x50xf32>
    %cst_129 = arith.constant dense<0.000000e+00> : vector<8x50xf32>
    %133 = tpu.matmul %130, %132, %cst_129 {dimension_numbers = #tpu.dot_dimension_numbers<[1], [0], [0], [1], [0, 0, 1, 1], [], []>} : vector<8x80xf32>, vector<80x50xf32>, vector<8x50xf32> -> vector<8x50xf32>
    %134 = arith.addf %127, %133 : vector<8x50xf32>
    %c0_130 = arith.constant 0 : index
    %c0_131 = arith.constant 0 : index
    %135 = vector.load %arg13[%c0_130, %c0_131] : memref<1x50xf32, #tpu.memory_space<vmem>>, vector<1x50xf32>
    %136 = vector.broadcast %135 : vector<1x50xf32> to vector<8x50xf32>
    %137 = arith.addf %134, %136 : vector<8x50xf32>
    %cst_132 = arith.constant 0.000000e+00 : f32
    %138 = vector.broadcast %cst_132 : f32 to vector<8x50xf32>
    %139 = arith.maximumf %137, %138 : vector<8x50xf32>
    %c0_133 = arith.constant 0 : index
    %c0_134 = arith.constant 0 : index
    %140 = vector.load %arg14[%c0_133, %c0_134] : memref<50x10xf32, #tpu.memory_space<vmem>>, vector<50x10xf32>
    %cst_135 = arith.constant dense<0.000000e+00> : vector<8x10xf32>
    %141 = tpu.matmul %139, %140, %cst_135 {dimension_numbers = #tpu.dot_dimension_numbers<[1], [0], [0], [1], [0, 0, 1, 1], [], []>} : vector<8x50xf32>, vector<50x10xf32>, vector<8x10xf32> -> vector<8x10xf32>
    %c0_136 = arith.constant 0 : index
    %c0_137 = arith.constant 0 : index
    %142 = vector.load %arg15[%c0_136, %c0_137] : memref<1x10xf32, #tpu.memory_space<vmem>>, vector<1x10xf32>
    %143 = vector.broadcast %142 : vector<1x10xf32> to vector<8x10xf32>
    %144 = arith.addf %141, %143 : vector<8x10xf32>
    %cst_138 = arith.constant dense<0xFF800000> : vector<8xf32>
    %145 = vector.multi_reduction <maximumf>, %144, %cst_138 [1] : vector<8x10xf32> to vector<8xf32>
    %146 = vector.shape_cast %145 : vector<8xf32> to vector<8x1xf32>
    %147 = vector.broadcast %146 : vector<8x1xf32> to vector<8x10xf32>
    %148 = arith.subf %144, %147 : vector<8x10xf32>
    %149 = math.exp %148 : vector<8x10xf32>
    %cst_139 = arith.constant dense<0.000000e+00> : vector<8xf32>
    %150 = vector.multi_reduction <add>, %149, %cst_139 [1] : vector<8x10xf32> to vector<8xf32>
    %151 = vector.shape_cast %150 : vector<8xf32> to vector<8x1xf32>
    %152 = math.log %151 : vector<8x1xf32>
    %153 = arith.addf %146, %152 : vector<8x1xf32>
    %154 = vector.broadcast %153 : vector<8x1xf32> to vector<8x10xf32>
    %155 = arith.subf %144, %154 : vector<8x10xf32>
    %c0_140 = arith.constant 0 : index
    %c0_141 = arith.constant 0 : index
    %156 = vector.load %arg16[%c0_140, %c0_141] : memref<8x10xf32, #tpu.memory_space<vmem>>, vector<8x10xf32>
    tpu.vector_store %arg16[%c0_140, %c0_141], %155 {strides = array<i32>} : memref<8x10xf32, #tpu.memory_space<vmem>>, vector<8x10xf32>,
    return
  }
  func.func @transform_0(%arg0: i32) -> (i32, i32, i32) {
    %c0_i32 = arith.constant 0 : i32
    %c0_i32_0 = arith.constant 0 : i32
    %c0_i32_1 = arith.constant 0 : i32
    return %arg0, %c0_i32, %c0_i32_0 : i32, i32, i32
  }
  func.func @transform_1(%arg0: i32) -> (i32, i32, i32) {
    %c0_i32 = arith.constant 0 : i32
    %c0_i32_0 = arith.constant 0 : i32
    %c0_i32_1 = arith.constant 0 : i32
    %c0_i32_2 = arith.constant 0 : i32
    return %c0_i32, %c0_i32_0, %c0_i32_1 : i32, i32, i32
  }
  func.func @transform_2(%arg0: i32) -> (i32, i32) {
    %c0_i32 = arith.constant 0 : i32
    %c0_i32_0 = arith.constant 0 : i32
    %c0_i32_1 = arith.constant 0 : i32
    return %c0_i32, %c0_i32_0 : i32, i32
  }
  func.func @transform_3(%arg0: i32) -> (i32, i32, i32) {
    %c0_i32 = arith.constant 0 : i32
    %c0_i32_0 = arith.constant 0 : i32
    %c0_i32_1 = arith.constant 0 : i32
    %c0_i32_2 = arith.constant 0 : i32
    return %c0_i32, %c0_i32_0, %c0_i32_1 : i32, i32, i32
  }
  func.func @transform_4(%arg0: i32) -> (i32, i32, i32) {
    %c0_i32 = arith.constant 0 : i32
    %c0_i32_0 = arith.constant 0 : i32
    %c0_i32_1 = arith.constant 0 : i32
    %c0_i32_2 = arith.constant 0 : i32
    return %c0_i32, %c0_i32_0, %c0_i32_1 : i32, i32, i32
  }
  func.func @transform_5(%arg0: i32) -> (i32, i32, i32) {
    %c0_i32 = arith.constant 0 : i32
    %c0_i32_0 = arith.constant 0 : i32
    %c0_i32_1 = arith.constant 0 : i32
    %c0_i32_2 = arith.constant 0 : i32
    return %c0_i32, %c0_i32_0, %c0_i32_1 : i32, i32, i32
  }
  func.func @transform_6(%arg0: i32) -> (i32, i32, i32) {
    %c0_i32 = arith.constant 0 : i32
    %c0_i32_0 = arith.constant 0 : i32
    %c0_i32_1 = arith.constant 0 : i32
    %c0_i32_2 = arith.constant 0 : i32
    return %c0_i32, %c0_i32_0, %c0_i32_1 : i32, i32, i32
  }
  func.func @transform_7(%arg0: i32) -> (i32, i32) {
    %c0_i32 = arith.constant 0 : i32
    %c0_i32_0 = arith.constant 0 : i32
    %c0_i32_1 = arith.constant 0 : i32
    return %c0_i32, %c0_i32_0 : i32, i32
  }
  func.func @transform_8(%arg0: i32) -> (i32, i32, i32) {
    %c0_i32 = arith.constant 0 : i32
    %c0_i32_0 = arith.constant 0 : i32
    %c0_i32_1 = arith.constant 0 : i32
    %c0_i32_2 = arith.constant 0 : i32
    return %c0_i32, %c0_i32_0, %c0_i32_1 : i32, i32, i32
  }
  func.func @transform_9(%arg0: i32) -> (i32, i32, i32) {
    %c0_i32 = arith.constant 0 : i32
    %c0_i32_0 = arith.constant 0 : i32
    %c0_i32_1 = arith.constant 0 : i32
    %c0_i32_2 = arith.constant 0 : i32
    return %c0_i32, %c0_i32_0, %c0_i32_1 : i32, i32, i32
  }
  func.func @transform_10(%arg0: i32) -> (i32, i32, i32) {
    %c0_i32 = arith.constant 0 : i32
    %c0_i32_0 = arith.constant 0 : i32
    %c0_i32_1 = arith.constant 0 : i32
    %c0_i32_2 = arith.constant 0 : i32
    return %c0_i32, %c0_i32_0, %c0_i32_1 : i32, i32, i32
  }
  func.func @transform_11(%arg0: i32) -> (i32, i32, i32) {
    %c0_i32 = arith.constant 0 : i32
    %c0_i32_0 = arith.constant 0 : i32
    %c0_i32_1 = arith.constant 0 : i32
    %c0_i32_2 = arith.constant 0 : i32
    return %c0_i32, %c0_i32_0, %c0_i32_1 : i32, i32, i32
  }
  func.func @transform_12(%arg0: i32) -> (i32, i32) {
    %c0_i32 = arith.constant 0 : i32
    %c0_i32_0 = arith.constant 0 : i32
    %c0_i32_1 = arith.constant 0 : i32
    return %c0_i32, %c0_i32_0 : i32, i32
  }
  func.func @transform_13(%arg0: i32) -> (i32, i32) {
    %c0_i32 = arith.constant 0 : i32
    %c0_i32_0 = arith.constant 0 : i32
    %c0_i32_1 = arith.constant 0 : i32
    return %c0_i32, %c0_i32_0 : i32, i32
  }
  func.func @transform_14(%arg0: i32) -> (i32, i32) {
    %c0_i32 = arith.constant 0 : i32
    %c0_i32_0 = arith.constant 0 : i32
    %c0_i32_1 = arith.constant 0 : i32
    return %c0_i32, %c0_i32_0 : i32, i32
  }
  func.func @transform_15(%arg0: i32) -> (i32, i32) {
    %c0_i32 = arith.constant 0 : i32
    %c0_i32_0 = arith.constant 0 : i32
    return %arg0, %c0_i32 : i32, i32
  }
}

</mosaic_0001>

<bundles_post_ra>
// kernel: net_forward.1
= control target key start
LH: loop header
LB: loop body
LE: loop exit
PB: predicated region body
PF: predicated region fallthrough
CT: control target
= control target key end

     0   :  { %vm237_vm0 = vcmask 1043456   ;;  %v7795_v3 = vmov 0.0   ;;  %vm7796_vm1 = vmmov 1   ;;  %vm122_vm3 = vcmask 1046528   ;;  %s10784_s1 = inlined_call_operand.vmem [shape: f32[5,28,240], index: 1, kind: input, shape index: {}]   ;;  %s10785_s0 = inlined_call_operand.vmem [shape: f32[8,28,28], index: 0, kind: input, shape index: {}]   ;;  %s10786_s3 = inlined_call_operand.vmem [shape: f32[2,240,120], index: 3, kind: input, shape index: {}]   ;;  %s10787_s2 = inlined_call_operand.vmem [shape: f32[1,240], index: 2, kind: input, shape index: {}]   ;;  %s10788_s4 = inlined_call_operand.vmem [shape: f32[2,96,192], index: 4, kind: input, shape index: {}]   ;;  %s10789_s5 = inlined_call_operand.vmem [shape: f32[5,64,96], index: 5, kind: input, shape index: {}]   ;;  %s10790_s6 = inlined_call_operand.vmem [shape: f32[5,120,160], index: 6, kind: input, shape index: {}]   ;;  %s10791_s8 = inlined_call_operand.vmem [shape: f32[2,160,80], index: 8, kind: input, shape index: {}]   ;;  %s10792_s7 = inlined_call_operand.vmem [shape: f32[1,160], index: 7, kind: input, shape index: {}]   ;;  %s10793_s9 = inlined_call_operand.vmem [shape: f32[2,32,64], index: 9, kind: input, shape index: {}]   ;;  %s10794_s11 = inlined_call_operand.vmem [shape: f32[4,80,50], index: 11, kind: input, shape index: {}]   ;;  %s10795_s10 = inlined_call_operand.vmem [shape: f32[4,8,32], index: 10, kind: input, shape index: {}]   ;;  %s10796_s13 = inlined_call_operand.vmem [shape: f32[50,10], index: 13, kind: input, shape index: {}]   ;;  %s10797_s12 = inlined_call_operand.vmem [shape: f32[1,50], index: 12, kind: input, shape index: {}]   ;;  %s10798_s14 = inlined_call_operand.vmem [shape: f32[1,10], index: 14, kind: input, shape index: {}]   ;;  %s10799_s15 = inlined_call_operand.vmem [shape: f32[8,10], index: 15, kind: output, shape index: {}]  }
   0x1   :  { %v5689_v0 = vld [vmem:[%s10784_s1 + $0x48] sm:$0xff]  ;;  %v5691_v1 = vld [vmem:[%s10784_s1 + $0x58] sm:$0xff]  ;;  %v5688_v2 = vld [vmem:[%s10784_s1 + $0x40] sm:$0xff]  ;;  %308 = vmatprep.mubr.f32.mxu0 %v7795_v3  ;;  %vm188_vm4 = vcmask 228352   ;;  %vm716_vm5 = vcmask 1045504   ;;  %vm1093_vm6 = vcmask 1044480  }
   0x2   :  { %v6874_v4 = vpack.c.bf16 %v5691_v1, %v5689_v0  ;;  %v5690_v5 = vld [vmem:[%s10784_s1 + $0x50] sm:$0xff]  ;;  %v5693_v6 = vld [vmem:[%s10784_s1 + $0x68] sm:$0xff]  ;;  %v5695_v7 = vld [vmem:[%s10784_s1 + $0x78] sm:$0xf]  ;;  %vm1936_vm7 = vcmask 916480   ;;  %vm2458_vm8 = vcmask 523264  }
   0x3   :  { %v6876_v8 = vpack.c.bf16 %v5690_v5, %v5688_v2  ;;  %v6878_v9 = vpack.c.bf16 %v5695_v7, %v5693_v6  ;;  %vm7899_vm2 = vmpackc.low %vm237_vm0, %vm7796_vm1  ;;  %v5692_v11 = vld [vmem:[%s10784_s1 + $0x60] sm:$0xff]  ;;  %v5694_v12 = vld [vmem:[%s10784_s1 + $0x70] sm:$0xf]  ;;  %vm2838_vm9 = vcmask 785408   ;;  %vm3167_vm10 = vcmask 982016  }
   0x4   :  { %6875 = vmatprep.subr.bf16.mxu0 %v6874_v4  ;;  %v7912_v13 = vld [vmem:[%s10785_s0] sm:$0xff]  ;;  %v7917_v14 = vld [vmem:[%s10785_s0 + $0x8] sm:$0xff]  ;;  %v6881_v15 = vpack.c.bf16 %v5694_v12, %v5692_v11  ;;  %v7926_v18 = vld [vmem:[%s10785_s0 + $0x10] sm:$0xff]  ;;  %vm4456_vm11 = vcmask 261120   ;;  %vm7798_vm12 = vmmov 0   ;;  %vm5101_vm13 = vcmask 654336  }
   0x5   :  { %6877 = vmatpush1.bf16.msra.mxu0 %v6876_v8  ;;  %v123_v16 = vrot.slane %v7912_v13, 1  ;;  %v124_v17 = vrot.slane %v7917_v14, 1  ;;  %v83_v19 = vld [vmem:[%s10784_s1 + $0x8] sm:$0xff]  ;;  %v85_v20 = vld [vmem:[%s10784_s1 + $0x18] sm:$0xff]  ;;  %v82_v21 = vld [vmem:[%s10784_s1] sm:$0xff]  ;;  %v126_v24 = vrot.slane %v7926_v18, 1 }
   0x6   :  { %6880 = vmatprep.subr.msk.bf16.mxu0 %vm7899_vm2, %v6878_v9  ;;  %v84_v22 = vld [vmem:[%s10784_s1 + $0x10] sm:$0xff]  ;;  %v6884_v25 = vpack.c.bf16 %v85_v20, %v83_v19  ;;  %v7947_v27 = vld [vmem:[%s10785_s0 + $0x18] sm:$0xf]  ;;  %v7956_v30 = vld [vmem:[%s10785_s0 + $0x20] sm:$0xff]  ;;  %vm5595_vm14 = vcmask 1041408   ;;  %vm5591_vm15 = vcmask 408576  }
   0x7   :  { %v125_v23 = vsel %vm122_vm3, %v123_v16, %v124_v17  ;;  %v6886_v26 = vpack.c.bf16 %v84_v22, %v82_v21  ;;  %v127_v28 = vsel %vm122_vm3, %v124_v17, %v126_v24  ;;  %v128_v29 = vrot.slane %v7947_v27, 1  ;;  %v7961_v31 = vld [vmem:[%s10785_s0 + $0x28] sm:$0xff]  ;;  %v89_v33 = vld [vmem:[%s10784_s1 + $0x38] sm:$0xf]  ;;  %v86_v34 = vld [vmem:[%s10784_s1 + $0x20] sm:$0xff] }
   0x8   :  { %v87_v32 = vld [vmem:[%s10784_s1 + $0x28] sm:$0xff]  ;;  %v88_v36 = vld [vmem:[%s10784_s1 + $0x30] sm:$0xf]  ;;  %v130_v38 = vrot.slane %v7956_v30, 1  ;;  %v131_v39 = vrot.slane %v7961_v31, 1  ;;  %v5751_v43 = vld [vmem:[%s10784_s1 + $0x98] sm:$0xff] }
   0x9   :  { %6883 = vmatpush1.bf16.msk.msra.mxu0 %vm7899_vm2, %v6881_v15  ;;  %v6888_v35 = vpack.c.bf16 %v89_v33, %v87_v32  ;;  %v129_v37 = vsel %vm122_vm3, %v126_v24, %v128_v29  ;;  %v6891_v40 = vpack.c.bf16 %v88_v36, %v86_v34  ;;  %v7983_v41 = vld [vmem:[%s10785_s0 + $0x30] sm:$0xff]  ;;  %v5749_v42 = vld [vmem:[%s10784_s1 + $0x88] sm:$0xff]  ;;  %v8002_v47 = vld [vmem:[%s10785_s0 + $0x38] sm:$0xf] }
   0xa   :  { %6885 = vmatprep.subr.bf16.mxu0 %v6884_v25  ;;  %v6894_v44 = vpack.c.bf16 %v5751_v43, %v5749_v42  ;;  %v132_v45 = vsel %vm122_vm3, %v130_v38, %v131_v39  ;;  %v133_v46 = vrot.slane %v7983_v41, 1  ;;  %v135_v49 = vrot.slane %v8002_v47, 1  ;;  %v8011_v50 = vld [vmem:[%s10785_s0 + $0x40] sm:$0xff]  ;;  %v8016_v51 = vld [vmem:[%s10785_s0 + $0x48] sm:$0xff]  ;;  %v8026_v55 = vld [vmem:[%s10785_s0 + $0x50] sm:$0xff] }
   0xb   :  { %v137_v53 = vrot.slane %v8011_v50, 1  ;;  %v138_v54 = vrot.slane %v8016_v51, 1  ;;  %v140_v57 = vrot.slane %v8026_v55, 1  ;;  %v8035_v58 = vld [vmem:[%s10785_s0 + $0x58] sm:$0xf]  ;;  %v8044_v61 = vld [vmem:[%s10785_s0 + $0x60] sm:$0xff] }
   0xc   :  { %5698 = vmatmul.mubr.msk.f32.vlgmr.msra.gmra.mrb[0].mxu0 %vm188_vm4, %v125_v23  ;;  %v134_v48 = vsel %vm122_vm3, %v131_v39, %v133_v46  ;;  %v136_v52 = vsel %vm122_vm3, %v133_v46, %v135_v49  ;;  %v142_v60 = vrot.slane %v8035_v58, 1  ;;  %v8049_v62 = vld [vmem:[%s10785_s0 + $0x68] sm:$0xff]  ;;  %v144_v0 = vrot.slane %v8044_v61, 1  ;;  %v8059_v2 = vld [vmem:[%s10785_s0 + $0x70] sm:$0xff]  ;;  %v8068_v6 = vld [vmem:[%s10785_s0 + $0x78] sm:$0xf] }
   0xd   :  { %314 = vmatprep.mubr.f32.mxu0 %v7795_v3  ;;  %6887 = vmatpush1.bf16.msra.mxu0 %v6886_v26  ;;  %v139_v56 = vsel %vm122_vm3, %v137_v53, %v138_v54  ;;  %v141_v59 = vsel %vm122_vm3, %v138_v54, %v140_v57  ;;  %v145_v1 = vrot.slane %v8049_v62, 1  ;;  %v147_v5 = vrot.slane %v8059_v2, 1  ;;  %v8077_v9 = vld [vmem:[%s10785_s0 + $0x80] sm:$0xff]  ;;  %v8082_v11 = vld [vmem:[%s10785_s0 + $0x88] sm:$0xff]  ;;  %v8092_v17 = vld [vmem:[%s10785_s0 + $0x90] sm:$0xff] }
   0xe   :  { %6890 = vmatprep.subr.msk.bf16.mxu0 %vm7899_vm2, %v6888_v35  ;;  %v143_v63 = vsel %vm122_vm3, %v140_v57, %v142_v60  ;;  %v149_v8 = vrot.slane %v8068_v6, 1  ;;  %v151_v15 = vrot.slane %v8077_v9, 1  ;;  %v152_v16 = vrot.slane %v8082_v11, 1  ;;  %v8101_v21 = vld [vmem:[%s10785_s0 + $0x98] sm:$0xf]  ;;  %v8110_v24 = vld [vmem:[%s10785_s0 + $0xa0] sm:$0xff] }
   0xf   :  { %v146_v4 = vsel %vm122_vm3, %v144_v0, %v145_v1  ;;  %v148_v7 = vsel %vm122_vm3, %v145_v1, %v147_v5  ;;  %v154_v20 = vrot.slane %v8092_v17, 1  ;;  %v156_v23 = vrot.slane %v8101_v21, 1  ;;  %v8115_v25 = vld [vmem:[%s10785_s0 + $0xa8] sm:$0xff]  ;;  %v8125_v32 = vld [vmem:[%s10785_s0 + $0xb0] sm:$0xff]  ;;  %v8134_v35 = vld [vmem:[%s10785_s0 + $0xb8] sm:$0xf] }
  0x10   :  { %5699 = vmatmul.mubr.msk.f32.gmra.mrb[2].mxu0 %vm188_vm4, %v127_v28  ;;  %v150_v12 = vsel %vm122_vm3, %v147_v5, %v149_v8  ;;  %v153_v19 = vsel %vm122_vm3, %v151_v15, %v152_v16  ;;  %v158_v28 = vrot.slane %v8110_v24, 1  ;;  %v159_v29 = vrot.slane %v8115_v25, 1  ;;  %v8143_v38 = vld [vmem:[%s10785_s0 + $0xc0] sm:$0xff]  ;;  %v8148_v39 = vld [vmem:[%s10785_s0 + $0xc8] sm:$0xff]  ;;  %v8191_v60 = vld [vmem:[%s10785_s0 + $0xf0] sm:$0xff] }
  0x11   :  { %320 = vmatprep.mubr.f32.mxu0 %v7795_v3  ;;  %6893 = vmatpush1.bf16.msk.msra.mxu0 %vm7899_vm2, %v6891_v40  ;;  %v155_v22 = vsel %vm122_vm3, %v152_v16, %v154_v20  ;;  %v157_v26 = vsel %vm122_vm3, %v154_v20, %v156_v23  ;;  %v161_v34 = vrot.slane %v8125_v32, 1  ;;  %v165_v42 = vrot.slane %v8143_v38, 1  ;;  %v8176_v53 = vld [vmem:[%s10785_s0 + $0xe0] sm:$0xff]  ;;  %v8181_v54 = vld [vmem:[%s10785_s0 + $0xe8] sm:$0xff]  ;;  %v8200_v1 = vld [vmem:[%s10785_s0 + $0xf8] sm:$0xf] }
  0x12   :  { %6895 = vmatprep.subr.bf16.mxu0 %v6894_v44  ;;  %v160_v33 = vsel %vm122_vm3, %v158_v28, %v159_v29  ;;  %v166_v43 = vrot.slane %v8148_v39, 1  ;;  %v8158_v44 = vld [vmem:[%s10785_s0 + $0xd0] sm:$0xff]  ;;  %v172_v57 = vrot.slane %v8176_v53, 1  ;;  %v175_v0 = vrot.slane %v8191_v60, 1  ;;  %v5748_v8 = vld [vmem:[%s10784_s1 + $0x80] sm:$0xff]  ;;  %v5753_v15 = vld [vmem:[%s10784_s1 + $0xa8] sm:$0xff] }
  0x13   :  { %v162_v36 = vsel %vm122_vm3, %v159_v29, %v161_v34  ;;  %v168_v46 = vrot.slane %v8158_v44, 1  ;;  %v177_v5 = vrot.slane %v8200_v1, 1  ;;  %v5755_v16 = vld [vmem:[%s10784_s1 + $0xb8] sm:$0xf]  ;;  %v5754_v23 = vld [vmem:[%s10784_s1 + $0xb0] sm:$0xf] }
  0x14   :  { %5700 = vmatmul.mubr.msk.f32.gmra.mrb[4].mxu0 %vm188_vm4, %v129_v37  ;;  %v163_v37 = vrot.slane %v8134_v35, 1  ;;  %v6898_v20 = vpack.c.bf16 %v5755_v16, %v5753_v15  ;;  %v5785_v28 = vld [vmem:[%s10784_s1 + $0xd8] sm:$0xff]  ;;  %v725_v15 = vrot.slane %v7961_v31, 2 }
  0x15   :  { %326 = vmatprep.mubr.f32.mxu0 %v7795_v3  ;;  %v169_v49 = vsel %vm122_vm3, %v166_v43, %v168_v46 }
  0x16   :  { %v164_v40 = vsel %vm122_vm3, %v161_v34, %v163_v37  ;;  %v717_v34 = vrot.slane %v7912_v13, 2  ;;  %v5782_v37 = vld [vmem:[%s10784_s1 + $0xc0] sm:$0xff] }
  0x18   :  { %5701 = vmatmul.mubr.msk.f32.gmra.mrb[6].mxu0 %vm188_vm4, %v132_v45  ;;  %v167_v45 = vsel %vm122_vm3, %v165_v42, %v166_v43  ;;  %v5787_v42 = vld [vmem:[%s10784_s1 + $0xe8] sm:$0xff]  ;;  %v5789_v43 = vld [vmem:[%s10784_s1 + $0xf8] sm:$0xf] }
  0x19   :  { %332 = vmatprep.mubr.f32.mxu0 %v7795_v3 }
  0x1c   :  { %5702 = vmatmul.mubr.msk.f32.gmra.mrb[8].mxu0 %vm188_vm4, %v134_v48  ;;  %v8167_v48 = vld [vmem:[%s10785_s0 + $0xd8] sm:$0xf] }
  0x1d   :  { %338 = vmatprep.mubr.f32.mxu0 %v7795_v3 }
  0x20   :  { %5703 = vmatmul.mubr.msk.f32.gmra.mrb[10].mxu0 %vm188_vm4, %v136_v52  ;;  %v170_v52 = vrot.slane %v8167_v48, 1 }
  0x21   :  { %344 = vmatprep.mubr.f32.mxu0 %v7795_v3 }
  0x24   :  { %5704 = vmatmul.mubr.msk.f32.gmra.mrb[12].mxu0 %vm188_vm4, %v139_v56  ;;  %v171_v56 = vsel %vm122_vm3, %v168_v46, %v170_v52  ;;  %v720_v46 = vrot.slane %v7926_v18, 2  ;;  %v6908_v52 = vpack.c.bf16 %v5789_v43, %v5787_v42  ;;  %v739_v42 = vrot.slane %v8049_v62, 2 }
  0x25   :  { %350 = vmatprep.mubr.f32.mxu0 %v7795_v3 }
  0x28   :  { %5705 = vmatmul.mubr.msk.f32.gmra.mrb[14].mxu0 %vm188_vm4, %v141_v59  ;;  %v173_v59 = vrot.slane %v8181_v54, 1 }
  0x29   :  { %356 = vmatprep.mubr.f32.mxu0 %v7795_v3 }
  0x2c   :  { %5706 = vmatmul.mubr.msk.f32.gmra.mrb[16].mxu0 %vm188_vm4, %v143_v63  ;;  %v174_v63 = vsel %vm122_vm3, %v172_v57, %v173_v59  ;;  %v5788_v57 = vld [vmem:[%s10784_s1 + $0xf0] sm:$0xf] }
  0x2d   :  { %362 = vmatprep.mubr.f32.mxu0 %v7795_v3 }
  0x30   :  { %5707 = vmatmul.mubr.msk.f32.gmra.mrb[18].mxu0 %vm188_vm4, %v146_v4  ;;  %v176_v4 = vsel %vm122_vm3, %v173_v59, %v175_v0  ;;  %v5817_v59 = vld [vmem:[%s10784_s1 + $0x108] sm:$0xff] }
  0x31   :  { %368 = vmatprep.mubr.f32.mxu0 %v7795_v3 }
  0x34   :  { %5708 = vmatmul.mubr.msk.f32.gmra.mrb[20].mxu0 %vm188_vm4, %v148_v7  ;;  %v178_v7 = vsel %vm122_vm3, %v175_v0, %v177_v5 }
  0x35   :  { %374 = vmatprep.mubr.f32.mxu0 %v7795_v3 }
  0x38   :  { %5709 = vmatmul.mubr.msk.f32.gmra.mrb[22].mxu0 %vm188_vm4, %v150_v12  ;;  %v5750_v12 = vld [vmem:[%s10784_s1 + $0x90] sm:$0xff] }
  0x39   :  { %380 = vmatprep.mubr.f32.mxu0 %v7795_v3 }
  0x3c   :  { %5710 = vmatmul.mubr.msk.f32.gmra.mrb[24].mxu0 %vm188_vm4, %v153_v19  ;;  %v6896_v19 = vpack.c.bf16 %v5750_v12, %v5748_v8  ;;  %v724_v12 = vrot.slane %v7956_v30, 2 }
  0x3d   :  { %386 = vmatprep.mubr.f32.mxu0 %v7795_v3 }
  0x3e   :  { %v726_v16 = vsel %vm716_vm5, %v724_v12, %v725_v15 }
  0x40   :  { %5711 = vmatmul.mubr.msk.f32.gmra.mrb[26].mxu0 %vm188_vm4, %v155_v22  ;;  %v5752_v22 = vld [vmem:[%s10784_s1 + $0xa0] sm:$0xff] }
  0x41   :  { %392 = vmatprep.mubr.f32.mxu0 %v7795_v3  ;;  %v6901_v29 = vpack.c.bf16 %v5754_v23, %v5752_v22  ;;  %v729_v22 = vrot.slane %v8002_v47, 2 }
  0x44   :  { %5712 = vmatmul.mubr.msk.f32.gmra.mrb[28].mxu0 %vm188_vm4, %v157_v26  ;;  %v5783_v26 = vld [vmem:[%s10784_s1 + $0xc8] sm:$0xff] }
  0x45   :  { %398 = vmatprep.mubr.f32.mxu0 %v7795_v3 }
  0x48   :  { %5713 = vmatmul.mubr.msk.f32.gmra.mrb[30].mxu0 %vm188_vm4, %v160_v33  ;;  %v6904_v33 = vpack.c.bf16 %v5785_v28, %v5783_v26  ;;  %v731_v26 = vrot.slane %v8011_v50, 2  ;;  %v732_v28 = vrot.slane %v8016_v51, 2 }
  0x49   :  { %404 = vmatprep.mubr.f32.mxu0 %v7795_v3 }
  0x4c   :  { %5714 = vmatmul.mubr.msk.f32.gmra.mrb[32].mxu0 %vm188_vm4, %v162_v36  ;;  %v718_v36 = vrot.slane %v7917_v14, 2 }
  0x4d   :  { %410 = vmatprep.mubr.f32.mxu0 %v7795_v3 }
  0x4e   :  { %v721_v0 = vsel %vm716_vm5, %v718_v36, %v720_v46 }
  0x50   :  { %5715 = vmatmul.mubr.msk.f32.gmra.mrb[34].mxu0 %vm188_vm4, %v164_v40  ;;  %v5784_v40 = vld [vmem:[%s10784_s1 + $0xd0] sm:$0xff] }
  0x51   :  { %416 = vmatprep.mubr.f32.mxu0 %v7795_v3 }
  0x54   :  { %5716 = vmatmul.mubr.msk.f32.gmra.mrb[36].mxu0 %vm188_vm4, %v167_v45  ;;  %v719_v45 = vsel %vm716_vm5, %v717_v34, %v718_v36  ;;  %v736_v36 = vrot.slane %v8035_v58, 2 }
  0x55   :  { %422 = vmatprep.mubr.f32.mxu0 %v7795_v3 }
  0x58   :  { %5717 = vmatmul.mubr.msk.f32.gmra.mrb[38].mxu0 %vm188_vm4, %v169_v49  ;;  %v6906_v49 = vpack.c.bf16 %v5784_v40, %v5782_v37  ;;  %v738_v40 = vrot.slane %v8044_v61, 2 }
  0x59   :  { %428 = vmatprep.mubr.f32.mxu0 %v7795_v3 }
  0x5a   :  { %v740_v43 = vsel %vm716_vm5, %v738_v40, %v739_v42 }
  0x5c   :  { %5718 = vmatmul.mubr.msk.f32.gmra.mrb[40].mxu0 %vm188_vm4, %v171_v56  ;;  %v5786_v56 = vld [vmem:[%s10784_s1 + $0xe0] sm:$0xff] }
  0x5d   :  { %434 = vmatprep.mubr.f32.mxu0 %v7795_v3  ;;  %v6911_v5 = vpack.c.bf16 %v5788_v57, %v5786_v56  ;;  %v745_v56 = vrot.slane %v8077_v9, 2  ;;  %v746_v57 = vrot.slane %v8082_v11, 2 }
  0x60   :  { %5719 = vmatmul.mubr.msk.f32.gmra.mrb[42].mxu0 %vm188_vm4, %v174_v63  ;;  %v5819_v63 = vld [vmem:[%s10784_s1 + $0x118] sm:$0xff] }
  0x61   :  { %440 = vmatprep.mubr.f32.mxu0 %v7795_v3 }
  0x64   :  { %5720 = vmatmul.mubr.msk.f32.gmra.mrb[44].mxu0 %vm188_vm4, %v176_v4  ;;  %v722_v4 = vrot.slane %v7947_v27, 2 }
  0x65   :  { %446 = vmatprep.mubr.f32.mxu0 %v7795_v3 }
  0x66   :  { %v723_v8 = vsel %vm716_vm5, %v720_v46, %v722_v4  ;;  %v750_v4 = vrot.slane %v8101_v21, 2 }
  0x68   :  { %5721 = vmatmul.mubr.msk.f32.gmra.mrb[46].mxu0 %vm188_vm4, %v178_v7  ;;  %v6914_v7 = vpack.c.bf16 %v5819_v63, %v5817_v59  ;;  %v747_v59 = vsel %vm716_vm5, %v745_v56, %v746_v57  ;;  %v748_v63 = vrot.slane %v8092_v17, 2  ;;  %v5816_v56 = vld [vmem:[%s10784_s1 + $0x100] sm:$0xff] }
  0x69   :  { %571 = vmatprep.mubr.f32.mxu0 %v7795_v3 }
  0x6c   :  { %5724 = vmatmul.mubr.msk.f32.vlgmr.msra.gmra.mrb[0].mxu0 %vm188_vm4, %v7912_v13 }
  0x6d   :  { %577 = vmatprep.mubr.f32.mxu0 %v7795_v3  ;;  %6897 = vmatpush1.bf16.msra.mxu0 %v6896_v19  ;;  %v727_v19 = vrot.slane %v7983_v41, 2 }
  0x6e   :  { %6900 = vmatprep.subr.msk.bf16.mxu0 %vm7899_vm2, %v6898_v20 }
  0x6f   :  { %v728_v20 = vsel %vm716_vm5, %v725_v15, %v727_v19  ;;  %v730_v23 = vsel %vm716_vm5, %v727_v19, %v729_v22  ;;  %v755_v15 = vrot.slane %v8125_v32, 2  ;;  %v757_v19 = vrot.slane %v8134_v35, 2 }
  0x70   :  { %5725 = vmatmul.mubr.msk.f32.gmra.mrb[2].mxu0 %vm188_vm4, %v7917_v14  ;;  %v759_v22 = vrot.slane %v8143_v38, 2 }
  0x71   :  { %583 = vmatprep.mubr.f32.mxu0 %v7795_v3  ;;  %6903 = vmatpush1.bf16.msk.msra.mxu0 %vm7899_vm2, %v6901_v29  ;;  %v733_v29 = vsel %vm716_vm5, %v731_v26, %v732_v28 }
  0x72   :  { %6905 = vmatprep.subr.bf16.mxu0 %v6904_v33  ;;  %v734_v33 = vrot.slane %v8026_v55, 2 }
  0x74   :  { %5726 = vmatmul.mubr.msk.f32.gmra.mrb[4].mxu0 %vm188_vm4, %v7926_v18  ;;  %v735_v34 = vsel %vm716_vm5, %v732_v28, %v734_v33  ;;  %v737_v37 = vsel %vm716_vm5, %v734_v33, %v736_v36  ;;  %v762_v28 = vrot.slane %v8158_v44, 2  ;;  %v764_v33 = vrot.slane %v8167_v48, 2 }
  0x75   :  { %589 = vmatprep.mubr.f32.mxu0 %v7795_v3  ;;  %v766_v36 = vrot.slane %v8176_v53, 2 }
  0x78   :  { %5727 = vmatmul.mubr.msk.f32.gmra.mrb[6].mxu0 %vm188_vm4, %v7956_v30 }
  0x79   :  { %595 = vmatprep.mubr.f32.mxu0 %v7795_v3 }
  0x7c   :  { %5728 = vmatmul.mubr.msk.f32.gmra.mrb[8].mxu0 %vm188_vm4, %v7961_v31 }
  0x7d   :  { %601 = vmatprep.mubr.f32.mxu0 %v7795_v3 }
  0x80   :  { %5729 = vmatmul.mubr.msk.f32.gmra.mrb[10].mxu0 %vm188_vm4, %v7983_v41 }
  0x81   :  { %607 = vmatprep.mubr.f32.mxu0 %v7795_v3 }
  0x84   :  { %5730 = vmatmul.mubr.msk.f32.gmra.mrb[12].mxu0 %vm188_vm4, %v8011_v50 }
  0x85   :  { %613 = vmatprep.mubr.f32.mxu0 %v7795_v3 }
  0x88   :  { %5731 = vmatmul.mubr.msk.f32.gmra.mrb[14].mxu0 %vm188_vm4, %v8016_v51 }
  0x89   :  { %619 = vmatprep.mubr.f32.mxu0 %v7795_v3 }
  0x8c   :  { %5732 = vmatmul.mubr.msk.f32.gmra.mrb[16].mxu0 %vm188_vm4, %v8026_v55 }
  0x8d   :  { %625 = vmatprep.mubr.f32.mxu0 %v7795_v3 }
  0x90   :  { %5733 = vmatmul.mubr.msk.f32.gmra.mrb[18].mxu0 %vm188_vm4, %v8044_v61 }
  0x91   :  { %631 = vmatprep.mubr.f32.mxu0 %v7795_v3 }
  0x94   :  { %5734 = vmatmul.mubr.msk.f32.gmra.mrb[20].mxu0 %vm188_vm4, %v8049_v62 }
  0x95   :  { %637 = vmatprep.mubr.f32.mxu0 %v7795_v3 }
  0x98   :  { %5735 = vmatmul.mubr.msk.f32.gmra.mrb[22].mxu0 %vm188_vm4, %v8059_v2 }
  0x99   :  { %643 = vmatprep.mubr.f32.mxu0 %v7795_v3 }
  0x9c   :  { %5736 = vmatmul.mubr.msk.f32.gmra.mrb[24].mxu0 %vm188_vm4, %v8077_v9 }
  0x9d   :  { %649 = vmatprep.mubr.f32.mxu0 %v7795_v3 }
  0xa0   :  { %5737 = vmatmul.mubr.msk.f32.gmra.mrb[26].mxu0 %vm188_vm4, %v8082_v11 }
  0xa1   :  { %655 = vmatprep.mubr.f32.mxu0 %v7795_v3 }
  0xa4   :  { %5738 = vmatmul.mubr.msk.f32.gmra.mrb[28].mxu0 %vm188_vm4, %v8092_v17 }
  0xa5   :  { %661 = vmatprep.mubr.f32.mxu0 %v7795_v3 }
  0xa8   :  { %5739 = vmatmul.mubr.msk.f32.gmra.mrb[30].mxu0 %vm188_vm4, %v8110_v24 }
  0xa9   :  { %667 = vmatprep.mubr.f32.mxu0 %v7795_v3 }
  0xac   :  { %5740 = vmatmul.mubr.msk.f32.gmra.mrb[32].mxu0 %vm188_vm4, %v8115_v25 }
  0xad   :  { %673 = vmatprep.mubr.f32.mxu0 %v7795_v3 }
  0xb0   :  { %5741 = vmatmul.mubr.msk.f32.gmra.mrb[34].mxu0 %vm188_vm4, %v8125_v32 }
  0xb1   :  { %679 = vmatprep.mubr.f32.mxu0 %v7795_v3 }
  0xb4   :  { %5742 = vmatmul.mubr.msk.f32.gmra.mrb[36].mxu0 %vm188_vm4, %v8143_v38 }
  0xb5   :  { %685 = vmatprep.mubr.f32.mxu0 %v7795_v3 }
  0xb8   :  { %5743 = vmatmul.mubr.msk.f32.gmra.mrb[38].mxu0 %vm188_vm4, %v8148_v39 }
  0xb9   :  { %691 = vmatprep.mubr.f32.mxu0 %v7795_v3 }
  0xbc   :  { %5744 = vmatmul.mubr.msk.f32.gmra.mrb[40].mxu0 %vm188_vm4, %v8158_v44 }
  0xbd   :  { %697 = vmatprep.mubr.f32.mxu0 %v7795_v3 }
  0xc0   :  { %5745 = vmatmul.mubr.msk.f32.gmra.mrb[42].mxu0 %vm188_vm4, %v8176_v53 }
  0xc1   :  { %703 = vmatprep.mubr.f32.mxu0 %v7795_v3 }
  0xc4   :  { %5746 = vmatmul.mubr.msk.f32.gmra.mrb[44].mxu0 %vm188_vm4, %v8181_v54 }
  0xc5   :  { %709 = vmatprep.mubr.f32.mxu0 %v7795_v3 }
  0xc8   :  { %5747 = vmatmul.mubr.msk.f32.gmra.mrb[46].mxu0 %vm188_vm4, %v8191_v60 }
  0xc9   :  { %900 = vmatprep.mubr.f32.mxu0 %v7795_v3 }
  0xcc   :  { %5758 = vmatmul.mubr.msk.f32.vlgmr.msra.gmra.mrb[0].mxu0 %vm188_vm4, %v719_v45  ;;  %v741_v45 = vrot.slane %v8059_v2, 2 }
  0xcd   :  { %906 = vmatprep.mubr.f32.mxu0 %v7795_v3  ;;  %6907 = vmatpush1.bf16.msra.mxu0 %v6906_v49  ;;  %v743_v49 = vrot.slane %v8068_v6, 2 }
  0xce   :  { %6910 = vmatprep.subr.msk.bf16.mxu0 %vm7899_vm2, %v6908_v52  ;;  %v742_v46 = vsel %vm716_vm5, %v739_v42, %v741_v45  ;;  %v769_v42 = vrot.slane %v8191_v60, 2 }
  0xcf   :  { %v744_v52 = vsel %vm716_vm5, %v741_v45, %v743_v49  ;;  %v771_v45 = vrot.slane %v8200_v1, 2  ;;  %v1094_v49 = vrot.slane %v7912_v13, 3 }
  0xd0   :  { %5759 = vmatmul.mubr.msk.f32.gmra.mrb[2].mxu0 %vm188_vm4, %v721_v0  ;;  %v749_v0 = vsel %vm716_vm5, %v746_v57, %v748_v63  ;;  %v5818_v57 = vld [vmem:[%s10784_s1 + $0x110] sm:$0xff] }
  0xd1   :  { %912 = vmatprep.mubr.f32.mxu0 %v7795_v3  ;;  %6913 = vmatpush1.bf16.msk.msra.mxu0 %vm7899_vm2, %v6911_v5  ;;  %v751_v5 = vsel %vm716_vm5, %v748_v63, %v750_v4  ;;  %v5823_v63 = vld [vmem:[%s10784_s1 + $0x138] sm:$0xf]  ;;  %v1097_v4 = vrot.slane %v7926_v18, 3 }
  0xd2   :  { %6915 = vmatprep.subr.bf16.mxu0 %v6914_v7  ;;  %v752_v7 = vrot.slane %v8110_v24, 2 }
  0xd4   :  { %5760 = vmatmul.mubr.msk.f32.gmra.mrb[4].mxu0 %vm188_vm4, %v723_v8  ;;  %v753_v8 = vrot.slane %v8115_v25, 2 }
  0xd5   :  { %918 = vmatprep.mubr.f32.mxu0 %v7795_v3 }
  0xd6   :  { %v754_v12 = vsel %vm716_vm5, %v752_v7, %v753_v8 }
  0xd8   :  { %5761 = vmatmul.mubr.msk.f32.gmra.mrb[6].mxu0 %vm188_vm4, %v726_v16  ;;  %v756_v16 = vsel %vm716_vm5, %v753_v8, %v755_v15  ;;  %v5820_v8 = vld [vmem:[%s10784_s1 + $0x120] sm:$0xff] }
  0xd9   :  { %924 = vmatprep.mubr.f32.mxu0 %v7795_v3 }
  0xdc   :  { %5762 = vmatmul.mubr.msk.f32.gmra.mrb[8].mxu0 %vm188_vm4, %v728_v20  ;;  %v758_v20 = vsel %vm716_vm5, %v755_v15, %v757_v19 }
  0xdd   :  { %930 = vmatprep.mubr.f32.mxu0 %v7795_v3 }
  0xe0   :  { %5763 = vmatmul.mubr.msk.f32.gmra.mrb[10].mxu0 %vm188_vm4, %v730_v23  ;;  %v760_v23 = vrot.slane %v8148_v39, 2 }
  0xe1   :  { %936 = vmatprep.mubr.f32.mxu0 %v7795_v3 }
  0xe2   :  { %v761_v26 = vsel %vm716_vm5, %v759_v22, %v760_v23  ;;  %v1101_v22 = vrot.slane %v7956_v30, 3 }
  0xe4   :  { %5764 = vmatmul.mubr.msk.f32.gmra.mrb[12].mxu0 %vm188_vm4, %v733_v29  ;;  %v763_v29 = vsel %vm716_vm5, %v760_v23, %v762_v28  ;;  %v1102_v23 = vrot.slane %v7961_v31, 3 }
  0xe5   :  { %942 = vmatprep.mubr.f32.mxu0 %v7795_v3 }
  0xe8   :  { %5765 = vmatmul.mubr.msk.f32.gmra.mrb[14].mxu0 %vm188_vm4, %v735_v34  ;;  %v765_v34 = vsel %vm716_vm5, %v762_v28, %v764_v33  ;;  %v1104_v28 = vrot.slane %v7983_v41, 3  ;;  %v1106_v33 = vrot.slane %v8002_v47, 3 }
  0xe9   :  { %948 = vmatprep.mubr.f32.mxu0 %v7795_v3 }
  0xea   :  { %v1107_v10 = vsel %vm1093_vm6, %v1104_v28, %v1106_v33  ;;  %v1907_v33 = vld [vmem:[%s10786_s3 + $0x8] sm:$0xff] }
  0xec   :  { %5766 = vmatmul.mubr.msk.f32.gmra.mrb[16].mxu0 %vm188_vm4, %v737_v37  ;;  %v767_v37 = vrot.slane %v8181_v54, 2 }
  0xed   :  { %954 = vmatprep.mubr.f32.mxu0 %v7795_v3 }
  0xee   :  { %v768_v40 = vsel %vm716_vm5, %v766_v36, %v767_v37  ;;  %v1109_v36 = vrot.slane %v8016_v51, 3 }
  0xf0   :  { %5767 = vmatmul.mubr.msk.f32.gmra.mrb[18].mxu0 %vm188_vm4, %v740_v43  ;;  %v770_v43 = vsel %vm716_vm5, %v767_v37, %v769_v42 }
  0xf1   :  { %960 = vmatprep.mubr.f32.mxu0 %v7795_v3 }
  0xf4   :  { %5768 = vmatmul.mubr.msk.f32.gmra.mrb[20].mxu0 %vm188_vm4, %v742_v46  ;;  %v772_v46 = vsel %vm716_vm5, %v769_v42, %v771_v45 }
  0xf5   :  { %966 = vmatprep.mubr.f32.mxu0 %v7795_v3 }
  0xf8   :  { %5769 = vmatmul.mubr.msk.f32.gmra.mrb[22].mxu0 %vm188_vm4, %v744_v52  ;;  %v1095_v52 = vrot.slane %v7917_v14, 3 }
  0xf9   :  { %972 = vmatprep.mubr.f32.mxu0 %v7795_v3 }
  0xfa   :  { %v1098_v15 = vsel %vm1093_vm6, %v1095_v52, %v1097_v4 }
  0xfc   :  { %5770 = vmatmul.mubr.msk.f32.gmra.mrb[24].mxu0 %vm188_vm4, %v747_v59  ;;  %v5821_v59 = vld [vmem:[%s10784_s1 + $0x128] sm:$0xff] }
  0xfd   :  { %978 = vmatprep.mubr.f32.mxu0 %v7795_v3  ;;  %v6918_v7 = vpack.c.bf16 %v5823_v63, %v5821_v59  ;;  %v1120_v59 = vrot.slane %v8068_v6, 3 }
 0x100   :  { %5771 = vmatmul.mubr.msk.f32.gmra.mrb[26].mxu0 %vm188_vm4, %v749_v0  ;;  %v1096_v0 = vsel %vm1093_vm6, %v1094_v49, %v1095_v52  ;;  %v1116_v49 = vrot.slane %v8049_v62, 3 }
 0x101   :  { %984 = vmatprep.mubr.f32.mxu0 %v7795_v3 }
 0x104   :  { %5772 = vmatmul.mubr.msk.f32.gmra.mrb[28].mxu0 %vm188_vm4, %v751_v5  ;;  %v6916_v5 = vpack.c.bf16 %v5818_v57, %v5816_v56  ;;  %v1118_v56 = vrot.slane %v8059_v2, 3 }
 0x105   :  { %990 = vmatprep.mubr.f32.mxu0 %v7795_v3 }
 0x106   :  { %v1119_v57 = vsel %vm1093_vm6, %v1116_v49, %v1118_v56  ;;  %v1121_v63 = vsel %vm1093_vm6, %v1118_v56, %v1120_v59  ;;  %v1139_v56 = vrot.slane %v8158_v44, 3  ;;  %v1913_v59 = vld [vmem:[%s10786_s3 + $0x38] sm:$0xff] }
 0x108   :  { %5773 = vmatmul.mubr.msk.f32.gmra.mrb[30].mxu0 %vm188_vm4, %v754_v12  ;;  %v5822_v12 = vld [vmem:[%s10784_s1 + $0x130] sm:$0xf] }
 0x109   :  { %996 = vmatprep.mubr.f32.mxu0 %v7795_v3  ;;  %v6921_v19 = vpack.c.bf16 %v5822_v12, %v5820_v8  ;;  %v1127_v12 = vrot.slane %v8101_v21, 3 }
 0x10c   :  { %5774 = vmatmul.mubr.msk.f32.gmra.mrb[32].mxu0 %vm188_vm4, %v756_v16  ;;  %v1099_v16 = vrot.slane %v7947_v27, 3 }
 0x10d   :  { %1002 = vmatprep.mubr.f32.mxu0 %v7795_v3 }
 0x110   :  { %5775 = vmatmul.mubr.msk.f32.gmra.mrb[34].mxu0 %vm188_vm4, %v758_v20  ;;  %v1100_v20 = vsel %vm1093_vm6, %v1097_v4, %v1099_v16  ;;  %v1123_v4 = vrot.slane %v8082_v11, 3  ;;  %v1129_v16 = vrot.slane %v8110_v24, 3 }
 0x111   :  { %1008 = vmatprep.mubr.f32.mxu0 %v7795_v3 }
 0x114   :  { %5776 = vmatmul.mubr.msk.f32.gmra.mrb[36].mxu0 %vm188_vm4, %v761_v26  ;;  %v1103_v26 = vsel %vm1093_vm6, %v1101_v22, %v1102_v23  ;;  %v1132_v22 = vrot.slane %v8125_v32, 3 }
 0x115   :  { %1014 = vmatprep.mubr.f32.mxu0 %v7795_v3 }
 0x118   :  { %5777 = vmatmul.mubr.msk.f32.gmra.mrb[38].mxu0 %vm188_vm4, %v763_v29  ;;  %v1105_v29 = vsel %vm1093_vm6, %v1102_v23, %v1104_v28  ;;  %v7797_v28 = vmov 0.0|0.0  }
 0x119   :  { %1020 = vmatprep.mubr.f32.mxu0 %v7795_v3  ;;  %6924 = vmatprep.subr.bf16.mxu1 %v7797_v28 }
 0x11c   :  { %5778 = vmatmul.mubr.msk.f32.gmra.mrb[40].mxu0 %vm188_vm4, %v765_v34  ;;  %v1108_v34 = vrot.slane %v8011_v50, 3 }
 0x11d   :  { %1026 = vmatprep.mubr.f32.mxu0 %v7795_v3 }
 0x11e   :  { %v1110_v37 = vsel %vm1093_vm6, %v1108_v34, %v1109_v36 }
 0x120   :  { %5779 = vmatmul.mubr.msk.f32.gmra.mrb[42].mxu0 %vm188_vm4, %v768_v40  ;;  %v1111_v40 = vrot.slane %v8026_v55, 3 }
 0x121   :  { %1032 = vmatprep.mubr.f32.mxu0 %v7795_v3 }
 0x122   :  { %v1112_v42 = vsel %vm1093_vm6, %v1109_v36, %v1111_v40  ;;  %v1909_v36 = vld [vmem:[%s10786_s3 + $0x18] sm:$0xff] }
 0x124   :  { %5780 = vmatmul.mubr.msk.f32.gmra.mrb[44].mxu0 %vm188_vm4, %v770_v43  ;;  %v1113_v43 = vrot.slane %v8035_v58, 3 }
 0x125   :  { %1038 = vmatprep.mubr.f32.mxu0 %v7795_v3 }
 0x126   :  { %v1114_v45 = vsel %vm1093_vm6, %v1111_v40, %v1113_v43  ;;  %v1137_v43 = vrot.slane %v8148_v39, 3 }
 0x128   :  { %5781 = vmatmul.mubr.msk.f32.gmra.mrb[46].mxu0 %vm188_vm4, %v772_v46  ;;  %v1115_v46 = vrot.slane %v8044_v61, 3 }
 0x129   :  { %1277 = vmatprep.mubr.f32.mxu0 %v7795_v3 }
 0x12a   :  { %v1117_v52 = vsel %vm1093_vm6, %v1115_v46, %v1116_v49  ;;  %v1911_v46 = vld [vmem:[%s10786_s3 + $0x28] sm:$0xff] }
 0x12c   :  { %5792 = vmatmul.mubr.msk.f32.vlgmr.msra.gmra.mrb[0].mxu0 %vm188_vm4, %v1096_v0  ;;  %v1122_v0 = vrot.slane %v8077_v9, 3 }
 0x12d   :  { %1283 = vmatprep.mubr.f32.mxu0 %v7795_v3  ;;  %6917 = vmatpush1.bf16.msra.mxu0 %v6916_v5 }
 0x12e   :  { %6920 = vmatprep.subr.msk.bf16.mxu0 %vm7899_vm2, %v6918_v7  ;;  %v1124_v5 = vsel %vm1093_vm6, %v1122_v0, %v1123_v4  ;;  %v1125_v7 = vrot.slane %v8092_v17, 3  ;;  %v1140_v0 = vsel %vm1093_vm6, %v1137_v43, %v1139_v56 }
 0x130   :  { %5793 = vmatmul.mubr.msk.f32.gmra.mrb[2].mxu0 %vm188_vm4, %v1098_v15  ;;  %v1126_v8 = vsel %vm1093_vm6, %v1123_v4, %v1125_v7  ;;  %v1128_v15 = vsel %vm1093_vm6, %v1125_v7, %v1127_v12  ;;  %v1141_v4 = vrot.slane %v8167_v48, 3  ;;  %v1915_v7 = vld [vmem:[%s10786_s3 + $0x48] sm:$0xff] }
 0x131   :  { %1289 = vmatprep.mubr.f32.mxu0 %v7795_v3  ;;  %6923 = vmatpush1.bf16.msk.msra.mxu0 %vm7899_vm2, %v6921_v19  ;;  %v1130_v19 = vrot.slane %v8115_v25, 3 }
 0x132   :  { %v1142_v12 = vsel %vm1093_vm6, %v1139_v56, %v1141_v4  ;;  %v1926_v4 = vld [vmem:[%s10786_s3 + $0xa0] sm:$0xff] }
 0x133   :  { %v1133_v23 = vsel %vm1093_vm6, %v1130_v19, %v1132_v22 }
 0x134   :  { %5794 = vmatmul.mubr.msk.f32.gmra.mrb[4].mxu0 %vm188_vm4, %v1100_v20  ;;  %v1131_v20 = vsel %vm1093_vm6, %v1129_v16, %v1130_v19  ;;  %v1144_v16 = vrot.slane %v8181_v54, 3  ;;  %v1916_v19 = vld [vmem:[%s10786_s3 + $0x50] sm:$0xff] }
 0x135   :  { %1295 = vmatprep.mubr.f32.mxu0 %v7795_v3 }
 0x138   :  { %5795 = vmatmul.mubr.msk.f32.gmra.mrb[6].mxu0 %vm188_vm4, %v1103_v26  ;;  %v1134_v26 = vrot.slane %v8134_v35, 3 }
 0x139   :  { %1301 = vmatprep.mubr.f32.mxu0 %v7795_v3 }
 0x13a   :  { %v1135_v40 = vsel %vm1093_vm6, %v1132_v22, %v1134_v26  ;;  %v1146_v26 = vrot.slane %v8191_v60, 3 }
 0x13c   :  { %5796 = vmatmul.mubr.msk.f32.gmra.mrb[8].mxu0 %vm188_vm4, %v1105_v29  ;;  %v1906_v29 = vld [vmem:[%s10786_s3] sm:$0xff] }
 0x13d   :  { %1307 = vmatprep.mubr.f32.mxu0 %v7795_v3  ;;  %v6925_v34 = vpack.c.bf16 %v1907_v33, %v1906_v29  ;;  %v1918_v29 = vld [vmem:[%s10786_s3 + $0x60] sm:$0xff]  ;;  %v1919_v33 = vld [vmem:[%s10786_s3 + $0x68] sm:$0xff] }
 0x13f   :  { %6926 = vmatpush1.bf16.msra.mxu1 %v6925_v34  ;;  %v1147_v34 = vsel %vm1093_vm6, %v1144_v16, %v1146_v26 }
 0x140   :  { %5797 = vmatmul.mubr.msk.f32.gmra.mrb[10].mxu0 %vm188_vm4, %v1107_v10  ;;  %v1908_v10 = vld [vmem:[%s10786_s3 + $0x10] sm:$0xff]  ;;  %6927 = vmatprep.subr.bf16.mxu1 %v7797_v28 }
 0x141   :  { %1313 = vmatprep.mubr.f32.mxu0 %v7795_v3 }
 0x144   :  { %5798 = vmatmul.mubr.msk.f32.gmra.mrb[12].mxu0 %vm188_vm4, %v1110_v37  ;;  %v6928_v37 = vpack.c.bf16 %v1909_v36, %v1908_v10  ;;  %v6943_v10 = vpack.c.bf16 %v1919_v33, %v1918_v29  ;;  %v1148_v36 = vrot.slane %v8200_v1, 3  ;;  %v1932_v29 = vld [vmem:[%s10786_s3 + $0xd0] sm:$0xff]  ;;  %v1933_v33 = vld [vmem:[%s10786_s3 + $0xd8] sm:$0xff] }
 0x145   :  { %1319 = vmatprep.mubr.f32.mxu0 %v7795_v3 }
 0x146   :  { %6929 = vmatpush1.bf16.msra.mxu1 %v6928_v37  ;;  %v1920_v37 = vld [vmem:[%s10786_s3 + $0x70] sm:$0xff] }
 0x147   :  { %6930 = vmatprep.subr.bf16.mxu1 %v7797_v28 }
 0x148   :  { %5799 = vmatmul.mubr.msk.f32.gmra.mrb[14].mxu0 %vm188_vm4, %v1112_v42  ;;  %v1136_v42 = vrot.slane %v8143_v38, 3 }
 0x149   :  { %1325 = vmatprep.mubr.f32.mxu0 %v7795_v3 }
 0x14c   :  { %5800 = vmatmul.mubr.msk.f32.gmra.mrb[16].mxu0 %vm188_vm4, %v1114_v45  ;;  %v1910_v45 = vld [vmem:[%s10786_s3 + $0x20] sm:$0xff] }
 0x14d   :  { %1331 = vmatprep.mubr.f32.mxu0 %v7795_v3  ;;  %v6931_v49 = vpack.c.bf16 %v1911_v46, %v1910_v45  ;;  %v1470_v45 = vrot.slane %v7912_v13, 4  ;;  %v1471_v46 = vrot.slane %v7917_v14, 4  ;;  %v1473_v14 = vrot.slane %v7926_v18, 4 }
 0x14e   :  { %v1475_v18 = vrot.slane %v7947_v27, 4  ;;  %v1477_v27 = vrot.slane %v7956_v30, 4 }
 0x14f   :  { %6932 = vmatpush1.bf16.msra.mxu1 %v6931_v49  ;;  %v1922_v49 = vld [vmem:[%s10786_s3 + $0x80] sm:$0xff]  ;;  %v1472_v13 = vsel %vm237_vm0, %v1470_v45, %v1471_v46 }
 0x150   :  { %5801 = vmatmul.mubr.msk.f32.gmra.mrb[18].mxu0 %vm188_vm4, %v1117_v52  ;;  %v1138_v52 = vsel %vm1093_vm6, %v1136_v42, %v1137_v43  ;;  %6933 = vmatprep.subr.bf16.mxu1 %v7797_v28  ;;  %v1149_v43 = vsel %vm1093_vm6, %v1146_v26, %v1148_v36  ;;  %v1485_v36 = vrot.slane %v8016_v51, 4  ;;  %v1489_v51 = vrot.slane %v8035_v58, 4 }
 0x151   :  { %1337 = vmatprep.mubr.f32.mxu0 %v7795_v3 }
 0x154   :  { %5802 = vmatmul.mubr.msk.f32.gmra.mrb[20].mxu0 %vm188_vm4, %v1119_v57  ;;  %v1912_v57 = vld [vmem:[%s10786_s3 + $0x30] sm:$0xff] }
 0x155   :  { %1343 = vmatprep.mubr.f32.mxu0 %v7795_v3 }
 0x158   :  { %5803 = vmatmul.mubr.msk.f32.gmra.mrb[22].mxu0 %vm188_vm4, %v1121_v63  ;;  %v6934_v63 = vpack.c.bf16 %v1913_v59, %v1912_v57  ;;  %v1924_v57 = vld [vmem:[%s10786_s3 + $0x90] sm:$0xff]  ;;  %v1925_v59 = vld [vmem:[%s10786_s3 + $0x98] sm:$0xff] }
 0x159   :  { %1349 = vmatprep.mubr.f32.mxu0 %v7795_v3 }
 0x15a   :  { %6935 = vmatpush1.bf16.msra.mxu1 %v6934_v63  ;;  %v6952_v63 = vpack.c.bf16 %v1925_v59, %v1924_v57  ;;  %v1508_v57 = vrot.slane %v8125_v32, 4  ;;  %v1510_v59 = vrot.slane %v8134_v35, 4 }
 0x15b   :  { %6936 = vmatprep.subr.bf16.mxu1 %v7797_v28 }
 0x15c   :  { %5804 = vmatmul.mubr.msk.f32.gmra.mrb[24].mxu0 %vm188_vm4, %v1124_v5  ;;  %v1914_v5 = vld [vmem:[%s10786_s3 + $0x40] sm:$0xff] }
 0x15d   :  { %1355 = vmatprep.mubr.f32.mxu0 %v7795_v3 }
 0x160   :  { %5805 = vmatmul.mubr.msk.f32.gmra.mrb[26].mxu0 %vm188_vm4, %v1126_v8  ;;  %v6937_v8 = vpack.c.bf16 %v1915_v7, %v1914_v5  ;;  %v1927_v5 = vld [vmem:[%s10786_s3 + $0xa8] sm:$0xff] }
 0x161   :  { %1361 = vmatprep.mubr.f32.mxu0 %v7795_v3  ;;  %v6955_v7 = vpack.c.bf16 %v1927_v5, %v1926_v4  ;;  %v1520_v4 = vrot.slane %v8181_v54, 4  ;;  %v1522_v5 = vrot.slane %v8191_v60, 4  ;;  %v1524_v54 = vrot.slane %v8200_v1, 4  ;;  %v1846_v1 = vld [vmem:[%s10787_s2] sm:$0x3] }
 0x162   :  { %6938 = vmatpush1.bf16.msra.mxu1 %v6937_v8  ;;  %v1476_v8 = vsel %vm237_vm0, %v1473_v14, %v1475_v18  ;;  %v1517_v18 = vrot.slane %v8167_v48, 4  ;;  %v1934_v48 = vld [vmem:[%s10786_s3 + $0xe0] sm:$0xff] }
 0x163   :  { %6939 = vmatprep.subr.bf16.mxu1 %v7797_v28  ;;  %v1525_v60 = vsel %vm237_vm0, %v1522_v5, %v1524_v54 }
 0x164   :  { %5806 = vmatmul.mubr.msk.f32.gmra.mrb[28].mxu0 %vm188_vm4, %v1128_v15  ;;  %v1143_v15 = vrot.slane %v8176_v53, 3 }
 0x165   :  { %1367 = vmatprep.mubr.f32.mxu0 %v7795_v3 }
 0x168   :  { %5807 = vmatmul.mubr.msk.f32.gmra.mrb[30].mxu0 %vm188_vm4, %v1131_v20  ;;  %v1917_v20 = vld [vmem:[%s10786_s3 + $0x58] sm:$0xff] }
 0x169   :  { %1373 = vmatprep.mubr.f32.mxu0 %v7795_v3  ;;  %v6940_v22 = vpack.c.bf16 %v1917_v20, %v1916_v19  ;;  %v1930_v20 = vld [vmem:[%s10786_s3 + $0xc0] sm:$0xff] }
 0x16b   :  { %6941 = vmatpush1.bf16.msra.mxu1 %v6940_v22  ;;  %v1931_v22 = vld [vmem:[%s10786_s3 + $0xc8] sm:$0xff] }
 0x16c   :  { %5808 = vmatmul.mubr.msk.f32.gmra.mrb[32].mxu0 %vm188_vm4, %v1133_v23  ;;  %v1145_v23 = vsel %vm1093_vm6, %v1143_v15, %v1144_v16  ;;  %6942 = vmatprep.subr.bf16.mxu1 %v7797_v28  ;;  %v1928_v15 = vld [vmem:[%s10786_s3 + $0xb0] sm:$0xff]  ;;  %v1929_v16 = vld [vmem:[%s10786_s3 + $0xb8] sm:$0xff] }
 0x16d   :  { %1379 = vmatprep.mubr.f32.mxu0 %v7795_v3  ;;  %v6958_v19 = vpack.c.bf16 %v1929_v16, %v1928_v15 }
 0x16f   :  { %6944 = vmatpush1.bf16.msra.mxu1 %v6943_v10  ;;  %v6964_v10 = vpack.c.bf16 %v1933_v33, %v1932_v29  ;;  %v5876_v33 = vld [vmem:[%s10786_s3 + $0x100] sm:$0xff] }
 0x170   :  { %5809 = vmatmul.mubr.msk.f32.gmra.mrb[34].mxu0 %vm188_vm4, %v1135_v40  ;;  %v1921_v40 = vld [vmem:[%s10786_s3 + $0x78] sm:$0xff]  ;;  %6945 = vmatprep.subr.bf16.mxu1 %v7797_v28 }
 0x171   :  { %1385 = vmatprep.mubr.f32.mxu0 %v7795_v3  ;;  %v6946_v42 = vpack.c.bf16 %v1921_v40, %v1920_v37  ;;  %v1487_v40 = vrot.slane %v8026_v55, 4  ;;  %v1492_v55 = vrot.slane %v8049_v62, 4  ;;  %v1498_v62 = vrot.slane %v8077_v9, 4 }
 0x173   :  { %6947 = vmatpush1.bf16.msra.mxu1 %v6946_v42  ;;  %v1490_v42 = vsel %vm237_vm0, %v1487_v40, %v1489_v51  ;;  %v5879_v51 = vld [vmem:[%s10786_s3 + $0x118] sm:$0xff] }
 0x174   :  { %5810 = vmatmul.mubr.msk.f32.gmra.mrb[36].mxu0 %vm188_vm4, %v1138_v52  ;;  %v1923_v52 = vld [vmem:[%s10786_s3 + $0x88] sm:$0xff]  ;;  %6948 = vmatprep.subr.bf16.mxu1 %v7797_v28 }
 0x175   :  { %1391 = vmatprep.mubr.f32.mxu0 %v7795_v3  ;;  %v6949_v56 = vpack.c.bf16 %v1923_v52, %v1922_v49  ;;  %v1496_v49 = vrot.slane %v8068_v6, 4  ;;  %v1499_v52 = vrot.slane %v8082_v11, 4  ;;  %v1505_v11 = vrot.slane %v8110_v24, 4 }
 0x176   :  { %v1511_v24 = vsel %vm237_vm0, %v1508_v57, %v1510_v59  ;;  %v5885_v59 = vld [vmem:[%s10786_s3 + $0x148] sm:$0xff] }
 0x177   :  { %6950 = vmatpush1.bf16.msra.mxu1 %v6949_v56  ;;  %v1501_v56 = vrot.slane %v8092_v17, 4 }
 0x178   :  { %5811 = vmatmul.mubr.msk.f32.gmra.mrb[38].mxu0 %vm188_vm4, %v1140_v0  ;;  %v1474_v0 = vsel %vm237_vm0, %v1471_v46, %v1473_v14  ;;  %6951 = vmatprep.subr.bf16.mxu1 %v7797_v28  ;;  %v1494_v46 = vrot.slane %v8059_v2, 4  ;;  %v1500_v2 = vsel %vm237_vm0, %v1498_v62, %v1499_v52  ;;  %v1506_v14 = vrot.slane %v8115_v25, 4 }
 0x179   :  { %1397 = vmatprep.mubr.f32.mxu0 %v7795_v3  ;;  %v1502_v6 = vsel %vm237_vm0, %v1499_v52, %v1501_v56  ;;  %v1512_v25 = vrot.slane %v8143_v38, 4 }
 0x17a   :  { %v1495_v58 = vsel %vm237_vm0, %v1492_v55, %v1494_v46  ;;  %v1507_v17 = vsel %vm237_vm0, %v1505_v11, %v1506_v14 }
 0x17b   :  { %6953 = vmatpush1.bf16.msra.mxu1 %v6952_v63  ;;  %v1513_v63 = vrot.slane %v8148_v39, 4  ;;  %v1519_v39 = vrot.slane %v8176_v53, 4  ;;  %v1523_v53 = vsel %vm237_vm0, %v1520_v4, %v1522_v5 }
 0x17c   :  { %5812 = vmatmul.mubr.msk.f32.gmra.mrb[40].mxu0 %vm188_vm4, %v1142_v12  ;;  %v1478_v12 = vrot.slane %v7961_v31, 4  ;;  %6954 = vmatprep.subr.bf16.mxu1 %v7797_v28  ;;  %v1480_v31 = vrot.slane %v7983_v41, 4  ;;  %v1482_v41 = vrot.slane %v8002_v47, 4  ;;  %v1484_v47 = vrot.slane %v8011_v50, 4 }
 0x17d   :  { %1403 = vmatprep.mubr.f32.mxu0 %v7795_v3  ;;  %v1488_v50 = vsel %vm237_vm0, %v1485_v36, %v1487_v40  ;;  %v1514_v32 = vsel %vm237_vm0, %v1512_v25, %v1513_v63 }
 0x17e   :  { %v1479_v30 = vsel %vm237_vm0, %v1477_v27, %v1478_v12  ;;  %v1481_v26 = vsel %vm237_vm0, %v1478_v12, %v1480_v31  ;;  %v1486_v37 = vsel %vm237_vm0, %v1484_v47, %v1485_v36  ;;  %v1848_v27 = vlaneseq }
 0x17f   :  { %6956 = vmatpush1.bf16.msra.mxu1 %v6955_v7  ;;  %v1935_v7 = vld [vmem:[%s10786_s3 + $0xe8] sm:$0xff] }
 0x180   :  { %5813 = vmatmul.mubr.msk.f32.gmra.mrb[42].mxu0 %vm188_vm4, %v1145_v23  ;;  %6957 = vmatprep.subr.bf16.mxu1 %v7797_v28  ;;  %v6961_v23 = vpack.c.bf16 %v1931_v22, %v1930_v20  ;;  %v8778_v12 = vshrl.u32 %v1848_v27, 7  ;;  %v5875_v20 = vld [vmem:[%s10786_s3 + $0xf8] sm:$0xff] }
 0x181   :  { %1409 = vmatprep.mubr.f32.mxu0 %v7795_v3 }
 0x182   :  { %v1854_v15 = vsub.s32 1, %v8778_v12  ;;  %v1850_v16 = vsub.s32 0, %v8778_v12  ;;  %v6218_v12 = vld [vmem:[%s10791_s8 + $0xb0] sm:$0xff] }
 0x183   :  { %6959 = vmatpush1.bf16.msra.mxu1 %v6958_v19 }
 0x184   :  { %5814 = vmatmul.mubr.msk.f32.gmra.mrb[44].mxu0 %vm188_vm4, %v1147_v34  ;;  %6960 = vmatprep.subr.bf16.mxu1 %v7797_v28  ;;  %v1483_v34 = vsel %vm237_vm0, %v1480_v31, %v1482_v41  ;;  %v8787_v19 = vrot.slane %v1846_v1, %v1854_v15  ;;  %v5874_v31 = vld [vmem:[%s10786_s3 + $0xf0] sm:$0xff] }
 0x185   :  { %1415 = vmatprep.mubr.f32.mxu0 %v7795_v3  ;;  %v6970_v41 = vpack.c.bf16 %v5875_v20, %v5874_v31  ;;  %v5891_v31 = vld [vmem:[%s10786_s3 + $0x178] sm:$0xff] }
 0x187   :  { %6962 = vmatpush1.bf16.msra.mxu1 %v6961_v23 }
 0x188   :  { %5815 = vmatmul.mubr.msk.f32.gmra.mrb[46].mxu0 %vm188_vm4, %v1149_v43  ;;  %6963 = vmatprep.subr.bf16.mxu1 %v7797_v28  ;;  %v1491_v43 = vrot.slane %v8044_v61, 4  ;;  %v1497_v61 = vsel %vm237_vm0, %v1494_v46, %v1496_v49  ;;  %v5881_v49 = vld [vmem:[%s10786_s3 + $0x128] sm:$0xff] }
 0x189   :  { %1653 = vmatprep.mubr.f32.mxu0 %v7795_v3 }
 0x18a   :  { %v1493_v45 = vsel %vm237_vm0, %v1491_v43, %v1492_v55 }
 0x18b   :  { %6965 = vmatpush1.bf16.msra.mxu1 %v6964_v10  ;;  %v5877_v10 = vld [vmem:[%s10786_s3 + $0x108] sm:$0xff] }
 0x18c   :  { %5826 = vmatmul.mubr.msk.f32.vlgmr.msra.gmra.mrb[0].mxu0 %vm188_vm4, %v1472_v13  ;;  %6966 = vmatprep.subr.bf16.mxu1 %v7797_v28  ;;  %v1503_v13 = vrot.slane %v8101_v21, 4  ;;  %v1509_v21 = vsel %vm237_vm0, %v1506_v14, %v1508_v57 }
 0x18d   :  { %1659 = vmatprep.mubr.f32.mxu0 %v7795_v3 }
 0x18e   :  { %v1504_v9 = vsel %vm237_vm0, %v1501_v56, %v1503_v13  ;;  %v5883_v13 = vld [vmem:[%s10786_s3 + $0x138] sm:$0xff] }
 0x190   :  { %5827 = vmatmul.mubr.msk.f32.gmra.mrb[2].mxu0 %vm188_vm4, %v1474_v0  ;;  %v1515_v0 = vrot.slane %v8158_v44, 4  ;;  %v1521_v44 = vsel %vm237_vm0, %v1519_v39, %v1520_v4 }
 0x191   :  { %1665 = vmatprep.mubr.f32.mxu0 %v7795_v3 }
 0x192   :  { %v1516_v35 = vsel %vm237_vm0, %v1513_v63, %v1515_v0  ;;  %v1518_v38 = vsel %vm237_vm0, %v1515_v0, %v1517_v18  ;;  %v5887_v18 = vld [vmem:[%s10786_s3 + $0x158] sm:$0xff]  ;;  %vm5669_vm0 = vcmask 80896  }
 0x194   :  { %5828 = vmatmul.mubr.msk.f32.gmra.mrb[4].mxu0 %vm188_vm4, %v1476_v8  ;;  %v6967_v8 = vpack.c.bf16 %v1935_v7, %v1934_v48  ;;  %v5888_v48 = vld [vmem:[%s10786_s3 + $0x160] sm:$0xff]  ;;  %v5889_v7 = vld [vmem:[%s10786_s3 + $0x168] sm:$0xff] }
 0x195   :  { %1671 = vmatprep.mubr.f32.mxu0 %v7795_v3 }
 0x196   :  { %6968 = vmatpush1.bf16.msra.mxu1 %v6967_v8 }
 0x197   :  { %6969 = vmatprep.subr.bf16.mxu1 %v7797_v28 }
 0x198   :  { %5829 = vmatmul.mubr.msk.f32.gmra.mrb[6].mxu0 %vm188_vm4, %v1479_v30  ;;  %v8791_v30 = vrot.slane %v1846_v1, %v1850_v16  ;;  %v5890_v1 = vld [vmem:[%s10786_s3 + $0x170] sm:$0xff] }
 0x199   :  { %1677 = vmatprep.mubr.f32.mxu0 %v7795_v3 }
 0x19c   :  { %5830 = vmatmul.mubr.msk.f32.gmra.mrb[8].mxu0 %vm188_vm4, %v1481_v26 }
 0x19d   :  { %1683 = vmatprep.mubr.f32.mxu0 %v7795_v3 }
 0x1a0   :  { %5831 = vmatmul.mubr.msk.f32.gmra.mrb[10].mxu0 %vm188_vm4, %v1483_v34 }
 0x1a1   :  { %1689 = vmatprep.mubr.f32.mxu0 %v7795_v3 }
 0x1a4   :  { %5832 = vmatmul.mubr.msk.f32.gmra.mrb[12].mxu0 %vm188_vm4, %v1486_v37  ;;  %v6973_v37 = vpack.c.bf16 %v5877_v10, %v5876_v33  ;;  %v5892_v10 = vld [vmem:[%s10786_s3 + $0x180] sm:$0xff] }
 0x1a5   :  { %1695 = vmatprep.mubr.f32.mxu0 %v7795_v3 }
 0x1a8   :  { %5833 = vmatmul.mubr.msk.f32.gmra.mrb[14].mxu0 %vm188_vm4, %v1488_v50  ;;  %v5878_v50 = vld [vmem:[%s10786_s3 + $0x110] sm:$0xff] }
 0x1a9   :  { %1701 = vmatprep.mubr.f32.mxu0 %v7795_v3 }
 0x1ac   :  { %5834 = vmatmul.mubr.msk.f32.gmra.mrb[16].mxu0 %vm188_vm4, %v1490_v42 }
 0x1ad   :  { %1707 = vmatprep.mubr.f32.mxu0 %v7795_v3 }
 0x1b0   :  { %5835 = vmatmul.mubr.msk.f32.gmra.mrb[18].mxu0 %vm188_vm4, %v1493_v45  ;;  %v6976_v45 = vpack.c.bf16 %v5879_v51, %v5878_v50 }
 0x1b1   :  { %1713 = vmatprep.mubr.f32.mxu0 %v7795_v3 }
 0x1b4   :  { %5836 = vmatmul.mubr.msk.f32.gmra.mrb[20].mxu0 %vm188_vm4, %v1495_v58  ;;  %v5880_v58 = vld [vmem:[%s10786_s3 + $0x120] sm:$0xff] }
 0x1b5   :  { %1719 = vmatprep.mubr.f32.mxu0 %v7795_v3 }
 0x1b8   :  { %5837 = vmatmul.mubr.msk.f32.gmra.mrb[22].mxu0 %vm188_vm4, %v1497_v61 }
 0x1b9   :  { %1725 = vmatprep.mubr.f32.mxu0 %v7795_v3 }
 0x1bc   :  { %5838 = vmatmul.mubr.msk.f32.gmra.mrb[24].mxu0 %vm188_vm4, %v1500_v2  ;;  %v6979_v2 = vpack.c.bf16 %v5881_v49, %v5880_v58 }
 0x1bd   :  { %1731 = vmatprep.mubr.f32.mxu0 %v7795_v3 }
 0x1c0   :  { %5839 = vmatmul.mubr.msk.f32.gmra.mrb[26].mxu0 %vm188_vm4, %v1502_v6  ;;  %v5882_v6 = vld [vmem:[%s10786_s3 + $0x130] sm:$0xff] }
 0x1c1   :  { %1737 = vmatprep.mubr.f32.mxu0 %v7795_v3 }
 0x1c4   :  { %5840 = vmatmul.mubr.msk.f32.gmra.mrb[28].mxu0 %vm188_vm4, %v1504_v9 }
 0x1c5   :  { %1743 = vmatprep.mubr.f32.mxu0 %v7795_v3 }
 0x1c8   :  { %5841 = vmatmul.mubr.msk.f32.gmra.mrb[30].mxu0 %vm188_vm4, %v1507_v17  ;;  %v6982_v17 = vpack.c.bf16 %v5883_v13, %v5882_v6  ;;  %v5896_v6 = vld [vmem:[%s10786_s3 + $0x1a0] sm:$0xff]  ;;  %v5897_v13 = vld [vmem:[%s10786_s3 + $0x1a8] sm:$0xff] }
 0x1c9   :  { %1749 = vmatprep.mubr.f32.mxu0 %v7795_v3 }
 0x1cc   :  { %5842 = vmatmul.mubr.msk.f32.gmra.mrb[32].mxu0 %vm188_vm4, %v1509_v21  ;;  %v5884_v21 = vld [vmem:[%s10786_s3 + $0x140] sm:$0xff] }
 0x1cd   :  { %1755 = vmatprep.mubr.f32.mxu0 %v7795_v3 }
 0x1d0   :  { %5843 = vmatmul.mubr.msk.f32.gmra.mrb[34].mxu0 %vm188_vm4, %v1511_v24 }
 0x1d1   :  { %1761 = vmatprep.mubr.f32.mxu0 %v7795_v3 }
 0x1d4   :  { %5844 = vmatmul.mubr.msk.f32.gmra.mrb[36].mxu0 %vm188_vm4, %v1514_v32  ;;  %v6985_v32 = vpack.c.bf16 %v5885_v59, %v5884_v21  ;;  %v7003_v21 = vpack.c.bf16 %v5897_v13, %v5896_v6 }
 0x1d5   :  { %1767 = vmatprep.mubr.f32.mxu0 %v7795_v3 }
 0x1d8   :  { %5845 = vmatmul.mubr.msk.f32.gmra.mrb[38].mxu0 %vm188_vm4, %v1516_v35  ;;  %v5886_v35 = vld [vmem:[%s10786_s3 + $0x150] sm:$0xff] }
 0x1d9   :  { %1773 = vmatprep.mubr.f32.mxu0 %v7795_v3 }
 0x1dc   :  { %5846 = vmatmul.mubr.msk.f32.gmra.mrb[40].mxu0 %vm188_vm4, %v1518_v38 }
 0x1dd   :  { %1779 = vmatprep.mubr.f32.mxu0 %v7795_v3 }
 0x1e0   :  { %5847 = vmatmul.mubr.msk.f32.gmra.mrb[42].mxu0 %vm188_vm4, %v1521_v44  ;;  %v6988_v44 = vpack.c.bf16 %v5887_v18, %v5886_v35 }
 0x1e1   :  { %1785 = vmatprep.mubr.f32.mxu0 %v7795_v3 }
 0x1e4   :  { %5848 = vmatmul.mubr.msk.f32.gmra.mrb[44].mxu0 %vm188_vm4, %v1523_v53 }
 0x1e5   :  { %1791 = vmatprep.mubr.f32.mxu0 %v7795_v3 }
 0x1e8   :  { %5849 = vmatmul.mubr.msk.f32.gmra.mrb[46].mxu0 %vm188_vm4, %v1525_v60  ;;  %v6991_v60 = vpack.c.bf16 %v5889_v7, %v5888_v48  ;;  %v5901_v48 = vld [vmem:[%s10786_s3 + $0x1c8] sm:$0xff] }
 0x25f   :  { %v1655_v22 = vpop.f32.mrb[0].mxu0 }
 0x260   :  { %v1657_v23 = vpop.f32.mrb[1].mxu0  ;;  %v8803_v29 = vadd.f32 %v8791_v30, %v1655_v22 }
 0x261   :  { %v8800_v26 = vadd.f32 %v8787_v19, %v1657_v23 }
 0x263   :  { %v1661_v34 = vpop.f32.mrb[2].mxu0  ;;  %5850 = vmatprep.mubr.msk.f32.mxu1 %vm1936_vm7, %v8800_v26 }
 0x264   :  { %v1663_v47 = vpop.f32.mrb[3].mxu0  ;;  %2074 = vmatmul.mubr.f32.vlgmr.msra.gmra.mrb[0].mxu1 %v8803_v29  ;;  %v8818_v40 = vadd.f32 %v8791_v30, %v1661_v34  ;;  %v5893_v34 = vld [vmem:[%s10786_s3 + $0x188] sm:$0xff] }
 0x265   :  { %v8815_v36 = vadd.f32 %v8787_v19, %v1663_v47  ;;  %6971 = vmatpush1.bf16.msra.mxu1 %v6970_v41  ;;  %v6994_v41 = vpack.c.bf16 %v5891_v31, %v5890_v1  ;;  %v6997_v51 = vpack.c.bf16 %v5893_v34, %v5892_v10  ;;  %v5902_v31 = vld [vmem:[%s10786_s3 + $0x1d0] sm:$0xff] }
 0x266   :  { %6972 = vmatprep.subr.bf16.mxu1 %v7797_v28 }
 0x267   :  { %v1667_v42 = vpop.f32.mrb[4].mxu0  ;;  %5851 = vmatprep.mubr.msk.f32.mxu1 %vm1936_vm7, %v8815_v36 }
 0x268   :  { %v1669_v43 = vpop.f32.mrb[5].mxu0  ;;  %2079 = vmatmul.mubr.f32.gmra.mrb[2].mxu1 %v8818_v40  ;;  %v8834_v46 = vadd.f32 %v8791_v30, %v1667_v42 }
 0x269   :  { %v8831_v55 = vadd.f32 %v8787_v19, %v1669_v43  ;;  %6974 = vmatpush1.bf16.msra.mxu1 %v6973_v37  ;;  %v5894_v43 = vld [vmem:[%s10786_s3 + $0x190] sm:$0xff] }
 0x26a   :  { %6975 = vmatprep.subr.bf16.mxu1 %v7797_v28 }
 0x26b   :  { %v1673_v61 = vpop.f32.mrb[6].mxu0  ;;  %5852 = vmatprep.mubr.msk.f32.mxu1 %vm1936_vm7, %v8831_v55 }
 0x26c   :  { %v1675_v62 = vpop.f32.mrb[7].mxu0  ;;  %2084 = vmatmul.mubr.f32.gmra.mrb[4].mxu1 %v8834_v46  ;;  %v8850_v56 = vadd.f32 %v8791_v30, %v1673_v61 }
 0x26d   :  { %v8847_v52 = vadd.f32 %v8787_v19, %v1675_v62  ;;  %6977 = vmatpush1.bf16.msra.mxu1 %v6976_v45  ;;  %v5895_v45 = vld [vmem:[%s10786_s3 + $0x198] sm:$0xff] }
 0x26e   :  { %6978 = vmatprep.subr.bf16.mxu1 %v7797_v28  ;;  %v7000_v62 = vpack.c.bf16 %v5895_v45, %v5894_v43 }
 0x26f   :  { %v1679_v9 = vpop.f32.mrb[8].mxu0  ;;  %5853 = vmatprep.mubr.msk.f32.mxu1 %vm1936_vm7, %v8847_v52 }
 0x270   :  { %v1681_v11 = vpop.f32.mrb[9].mxu0  ;;  %2089 = vmatmul.mubr.f32.gmra.mrb[6].mxu1 %v8850_v56  ;;  %v8866_v57 = vadd.f32 %v8791_v30, %v1679_v9 }
 0x271   :  { %v8863_v14 = vadd.f32 %v8787_v19, %v1681_v11  ;;  %6980 = vmatpush1.bf16.msra.mxu1 %v6979_v2 }
 0x272   :  { %6981 = vmatprep.subr.bf16.mxu1 %v7797_v28 }
 0x273   :  { %v1685_v24 = vpop.f32.mrb[10].mxu0  ;;  %5854 = vmatprep.mubr.msk.f32.mxu1 %vm1936_vm7, %v8863_v14 }
 0x274   :  { %v1687_v25 = vpop.f32.mrb[11].mxu0  ;;  %2094 = vmatmul.mubr.f32.gmra.mrb[8].mxu1 %v8866_v57  ;;  %v8882_v0 = vadd.f32 %v8791_v30, %v1685_v24  ;;  %v5898_v24 = vld [vmem:[%s10786_s3 + $0x1b0] sm:$0xff] }
 0x275   :  { %v8879_v63 = vadd.f32 %v8787_v19, %v1687_v25  ;;  %6983 = vmatpush1.bf16.msra.mxu1 %v6982_v17  ;;  %v5899_v25 = vld [vmem:[%s10786_s3 + $0x1b8] sm:$0xff] }
 0x276   :  { %6984 = vmatprep.subr.bf16.mxu1 %v7797_v28 }
 0x277   :  { %v1691_v38 = vpop.f32.mrb[12].mxu0  ;;  %5855 = vmatprep.mubr.msk.f32.mxu1 %vm1936_vm7, %v8879_v63 }
 0x278   :  { %v1693_v39 = vpop.f32.mrb[13].mxu0  ;;  %2099 = vmatmul.mubr.f32.gmra.mrb[10].mxu1 %v8882_v0  ;;  %v8898_v5 = vadd.f32 %v8791_v30, %v1691_v38  ;;  %v7006_v38 = vpack.c.bf16 %v5899_v25, %v5898_v24 }
 0x279   :  { %v8895_v4 = vadd.f32 %v8787_v19, %v1693_v39  ;;  %6986 = vmatpush1.bf16.msra.mxu1 %v6985_v32 }
 0x27a   :  { %6987 = vmatprep.subr.bf16.mxu1 %v7797_v28 }
 0x27b   :  { %v1697_v8 = vpop.f32.mrb[14].mxu0  ;;  %5856 = vmatprep.mubr.msk.f32.mxu1 %vm1936_vm7, %v8895_v4 }
 0x27c   :  { %v1699_v53 = vpop.f32.mrb[15].mxu0  ;;  %2104 = vmatmul.mubr.f32.gmra.mrb[12].mxu1 %v8898_v5  ;;  %v8914_v27 = vadd.f32 %v8791_v30, %v1697_v8 }
 0x27d   :  { %v8911_v54 = vadd.f32 %v8787_v19, %v1699_v53  ;;  %6989 = vmatpush1.bf16.msra.mxu1 %v6988_v44  ;;  %v5900_v44 = vld [vmem:[%s10786_s3 + $0x1c0] sm:$0xff] }
 0x27e   :  { %6990 = vmatprep.subr.bf16.mxu1 %v7797_v28 }
 0x27f   :  { %v1703_v20 = vpop.f32.mrb[16].mxu0  ;;  %5857 = vmatprep.mubr.msk.f32.mxu1 %vm1936_vm7, %v8911_v54 }
 0x280   :  { %v1705_v22 = vpop.f32.mrb[17].mxu0  ;;  %2109 = vmatmul.mubr.f32.gmra.mrb[14].mxu1 %v8914_v27  ;;  %v8930_v33 = vadd.f32 %v8791_v30, %v1703_v20  ;;  %v5903_v20 = vld [vmem:[%s10786_s3 + $0x1d8] sm:$0xff] }
 0x281   :  { %v8927_v23 = vadd.f32 %v8787_v19, %v1705_v22  ;;  %6992 = vmatpush1.bf16.msra.mxu1 %v6991_v60  ;;  %v7009_v60 = vpack.c.bf16 %v5901_v48, %v5900_v44  ;;  %v7012_v34 = vpack.c.bf16 %v5903_v20, %v5902_v31 }
 0x282   :  { %6993 = vmatprep.subr.bf16.mxu1 %v7797_v28 }
 0x283   :  { %v1709_v47 = vpop.f32.mrb[18].mxu0  ;;  %5858 = vmatprep.mubr.msk.f32.mxu1 %vm1936_vm7, %v8927_v23 }
 0x284   :  { %v1711_v37 = vpop.f32.mrb[19].mxu0  ;;  %2114 = vmatmul.mubr.f32.gmra.mrb[16].mxu1 %v8930_v33  ;;  %v8946_v42 = vadd.f32 %v8791_v30, %v1709_v47 }
 0x285   :  { %v8943_v50 = vadd.f32 %v8787_v19, %v1711_v37  ;;  %6995 = vmatpush1.bf16.msra.mxu1 %v6994_v41 }
 0x286   :  { %6996 = vmatprep.subr.bf16.mxu1 %v7797_v28 }
 0x287   :  { %v1715_v58 = vpop.f32.mrb[20].mxu0  ;;  %5859 = vmatprep.mubr.msk.f32.mxu1 %vm1936_vm7, %v8943_v50 }
 0x288   :  { %v1717_v49 = vpop.f32.mrb[21].mxu0  ;;  %2119 = vmatmul.mubr.f32.gmra.mrb[18].mxu1 %v8946_v42  ;;  %v8962_v2 = vadd.f32 %v8791_v30, %v1715_v58 }
 0x289   :  { %v8959_v61 = vadd.f32 %v8787_v19, %v1717_v49  ;;  %6998 = vmatpush1.bf16.msra.mxu1 %v6997_v51 }
 0x28a   :  { %6999 = vmatprep.subr.bf16.mxu1 %v7797_v28 }
 0x28b   :  { %v1721_v9 = vpop.f32.mrb[22].mxu0  ;;  %5860 = vmatprep.mubr.msk.f32.mxu1 %vm1936_vm7, %v8959_v61 }
 0x28c   :  { %v1723_v11 = vpop.f32.mrb[23].mxu0  ;;  %2124 = vmatmul.mubr.f32.gmra.mrb[20].mxu1 %v8962_v2  ;;  %v8978_v59 = vadd.f32 %v8791_v30, %v1721_v9 }
 0x28d   :  { %v8975_v17 = vadd.f32 %v8787_v19, %v1723_v11  ;;  %7001 = vmatpush1.bf16.msra.mxu1 %v7000_v62 }
 0x28e   :  { %7002 = vmatprep.subr.bf16.mxu1 %v7797_v28 }
 0x28f   :  { %v1727_v32 = vpop.f32.mrb[24].mxu0  ;;  %5861 = vmatprep.mubr.msk.f32.mxu1 %vm1936_vm7, %v8975_v17 }
 0x290   :  { %v1729_v35 = vpop.f32.mrb[25].mxu0  ;;  %2129 = vmatmul.mubr.f32.gmra.mrb[22].mxu1 %v8978_v59  ;;  %v8994_v39 = vadd.f32 %v8791_v30, %v1727_v32 }
 0x291   :  { %v8991_v18 = vadd.f32 %v8787_v19, %v1729_v35  ;;  %7004 = vmatpush1.bf16.msra.mxu1 %v7003_v21 }
 0x292   :  { %7005 = vmatprep.subr.bf16.mxu1 %v7797_v28 }
 0x293   :  { %v1733_v7 = vpop.f32.mrb[26].mxu0  ;;  %5862 = vmatprep.mubr.msk.f32.mxu1 %vm1936_vm7, %v8991_v18 }
 0x294   :  { %v1735_v8 = vpop.f32.mrb[27].mxu0  ;;  %2134 = vmatmul.mubr.f32.gmra.mrb[24].mxu1 %v8994_v39  ;;  %v9010_v1 = vadd.f32 %v8791_v30, %v1733_v7 }
 0x295   :  { %v9007_v53 = vadd.f32 %v8787_v19, %v1735_v8  ;;  %7007 = vmatpush1.bf16.msra.mxu1 %v7006_v38 }
 0x296   :  { %7008 = vmatprep.subr.bf16.mxu1 %v7797_v28 }
 0x297   :  { %v1739_v22 = vpop.f32.mrb[28].mxu0  ;;  %5863 = vmatprep.mubr.msk.f32.mxu1 %vm1936_vm7, %v9007_v53 }
 0x298   :  { %v1741_v41 = vpop.f32.mrb[29].mxu0  ;;  %2139 = vmatmul.mubr.f32.gmra.mrb[26].mxu1 %v9010_v1  ;;  %v9026_v47 = vadd.f32 %v8791_v30, %v1739_v22 }
 0x299   :  { %v9023_v10 = vadd.f32 %v8787_v19, %v1741_v41  ;;  %7010 = vmatpush1.bf16.msra.mxu1 %v7009_v60 }
 0x29a   :  { %7011 = vmatprep.subr.bf16.mxu1 %v7797_v28 }
 0x29b   :  { %v1745_v37 = vpop.f32.mrb[30].mxu0  ;;  %5864 = vmatprep.mubr.msk.f32.mxu1 %vm1936_vm7, %v9023_v10 }
 0x29c   :  { %v1747_v51 = vpop.f32.mrb[31].mxu0  ;;  %2144 = vmatmul.mubr.f32.gmra.mrb[28].mxu1 %v9026_v47  ;;  %v9036_v45 = vadd.f32 %v8791_v30, %v1745_v37 }
 0x29d   :  { %v9033_v43 = vadd.f32 %v8787_v19, %v1747_v51  ;;  %7013 = vmatpush1.bf16.msra.mxu1 %v7012_v34 }
 0x29e   :  { %7014 = vmatprep.subr.bf16.mxu1 %v7797_v28 }
 0x29f   :  { %v1751_v58 = vpop.f32.mrb[32].mxu0  ;;  %5865 = vmatprep.mubr.msk.f32.mxu1 %vm1936_vm7, %v9033_v43 }
 0x2a0   :  { %v1753_v49 = vpop.f32.mrb[33].mxu0  ;;  %2149 = vmatmul.mubr.f32.gmra.mrb[30].mxu1 %v9036_v45  ;;  %v9046_v6 = vadd.f32 %v8791_v30, %v1751_v58 }
 0x2a1   :  { %v9043_v62 = vadd.f32 %v8787_v19, %v1753_v49 }
 0x2a3   :  { %v1757_v13 = vpop.f32.mrb[34].mxu0  ;;  %5866 = vmatprep.mubr.msk.f32.mxu1 %vm1936_vm7, %v9043_v62 }
 0x2a4   :  { %v1759_v9 = vpop.f32.mrb[35].mxu0  ;;  %2154 = vmatmul.mubr.f32.gmra.mrb[32].mxu1 %v9046_v6  ;;  %v9055_v21 = vadd.f32 %v8791_v30, %v1757_v13 }
 0x2a5   :  { %v9052_v11 = vadd.f32 %v8787_v19, %v1759_v9 }
 0x2a7   :  { %v1763_v24 = vpop.f32.mrb[36].mxu0  ;;  %5867 = vmatprep.mubr.msk.f32.mxu1 %vm1936_vm7, %v9052_v11 }
 0x2a8   :  { %v1765_v25 = vpop.f32.mrb[37].mxu0  ;;  %2159 = vmatmul.mubr.f32.gmra.mrb[34].mxu1 %v9055_v21  ;;  %v9064_v35 = vadd.f32 %v8791_v30, %v1763_v24 }
 0x2a9   :  { %v9061_v32 = vadd.f32 %v8787_v19, %v1765_v25 }
 0x2ab   :  { %v1769_v38 = vpop.f32.mrb[38].mxu0  ;;  %5868 = vmatprep.mubr.msk.f32.mxu1 %vm1936_vm7, %v9061_v32 }
 0x2ac   :  { %v1771_v44 = vpop.f32.mrb[39].mxu0  ;;  %2164 = vmatmul.mubr.f32.gmra.mrb[36].mxu1 %v9064_v35  ;;  %v9073_v7 = vadd.f32 %v8791_v30, %v1769_v38 }
 0x2ad   :  { %v9070_v48 = vadd.f32 %v8787_v19, %v1771_v44 }
 0x2af   :  { %v1775_v8 = vpop.f32.mrb[40].mxu0  ;;  %5869 = vmatprep.mubr.msk.f32.mxu1 %vm1936_vm7, %v9070_v48 }
 0x2b0   :  { %v1777_v60 = vpop.f32.mrb[41].mxu0  ;;  %2169 = vmatmul.mubr.f32.gmra.mrb[38].mxu1 %v9073_v7  ;;  %v1898_v20 = vadd.f32 %v8791_v30, %v1775_v8 }
 0x2b1   :  { %v1899_v31 = vadd.f32 %v8787_v19, %v1777_v60 }
 0x2b3   :  { %v1781_v22 = vpop.f32.mrb[42].mxu0  ;;  %5870 = vmatprep.mubr.msk.f32.mxu1 %vm1936_vm7, %v1899_v31 }
 0x2b4   :  { %v1783_v41 = vpop.f32.mrb[43].mxu0  ;;  %2174 = vmatmul.mubr.f32.gmra.mrb[40].mxu1 %v1898_v20  ;;  %v1900_v37 = vadd.f32 %v8791_v30, %v1781_v22 }
 0x2b5   :  { %v1901_v34 = vadd.f32 %v8787_v19, %v1783_v41 }
 0x2b7   :  { %v1787_v51 = vpop.f32.mrb[44].mxu0  ;;  %5871 = vmatprep.mubr.msk.f32.mxu1 %vm1936_vm7, %v1901_v34 }
 0x2b8   :  { %v1789_v58 = vpop.f32.mrb[45].mxu0  ;;  %2179 = vmatmul.mubr.f32.gmra.mrb[42].mxu1 %v1900_v37  ;;  %v1902_v13 = vadd.f32 %v8791_v30, %v1787_v51 }
 0x2b9   :  { %v1903_v49 = vadd.f32 %v8787_v19, %v1789_v58 }
 0x2bb   :  { %v1793_v9 = vpop.f32.mrb[46].mxu0  ;;  %5872 = vmatprep.mubr.msk.f32.mxu1 %vm1936_vm7, %v1903_v49 }
 0x2bc   :  { %v1795_v24 = vpop.f32.mrb[47].mxu0  ;;  %2184 = vmatmul.mubr.f32.gmra.mrb[44].mxu1 %v1902_v13  ;;  %v1904_v38 = vadd.f32 %v8791_v30, %v1793_v9 }
 0x2bd   :  { %v1905_v25 = vadd.f32 %v8787_v19, %v1795_v24 }
 0x2bf   :  { %5873 = vmatprep.mubr.msk.f32.mxu1 %vm1936_vm7, %v1905_v25 }
 0x2c0   :  { %2189 = vmatmul.mubr.f32.gmra.mrb[46].mxu1 %v1904_v38 }
 0x2c1   :  { %5904 = vmatprep.mubr.msk.f32.mxu1 %vm1936_vm7, %v8800_v26 }
 0x2c4   :  { %2290 = vmatmul.mubr.f32.vlgmr.msra.gmra.mrb[48].mxu1 %v8803_v29 }
 0x2c5   :  { %5905 = vmatprep.mubr.msk.f32.mxu1 %vm1936_vm7, %v8815_v36 }
 0x2c8   :  { %2295 = vmatmul.mubr.f32.gmra.mrb[50].mxu1 %v8818_v40 }
 0x2c9   :  { %5906 = vmatprep.mubr.msk.f32.mxu1 %vm1936_vm7, %v8831_v55 }
 0x2cc   :  { %2300 = vmatmul.mubr.f32.gmra.mrb[52].mxu1 %v8834_v46 }
 0x2cd   :  { %5907 = vmatprep.mubr.msk.f32.mxu1 %vm1936_vm7, %v8847_v52 }
 0x2d0   :  { %2305 = vmatmul.mubr.f32.gmra.mrb[54].mxu1 %v8850_v56 }
 0x2d1   :  { %5908 = vmatprep.mubr.msk.f32.mxu1 %vm1936_vm7, %v8863_v14 }
 0x2d4   :  { %2310 = vmatmul.mubr.f32.gmra.mrb[56].mxu1 %v8866_v57 }
 0x2d5   :  { %5909 = vmatprep.mubr.msk.f32.mxu1 %vm1936_vm7, %v8879_v63 }
 0x2d8   :  { %2315 = vmatmul.mubr.f32.gmra.mrb[58].mxu1 %v8882_v0 }
 0x2d9   :  { %5910 = vmatprep.mubr.msk.f32.mxu1 %vm1936_vm7, %v8895_v4 }
 0x2dc   :  { %2320 = vmatmul.mubr.f32.gmra.mrb[60].mxu1 %v8898_v5 }
 0x2dd   :  { %5911 = vmatprep.mubr.msk.f32.mxu1 %vm1936_vm7, %v8911_v54 }
 0x2e0   :  { %2325 = vmatmul.mubr.f32.gmra.mrb[62].mxu1 %v8914_v27 }
 0x2e1   :  { %5912 = vmatprep.mubr.msk.f32.mxu1 %vm1936_vm7, %v8927_v23 }
 0x2e4   :  { %2330 = vmatmul.mubr.f32.gmra.mrb[64].mxu1 %v8930_v33 }
 0x2e5   :  { %5913 = vmatprep.mubr.msk.f32.mxu1 %vm1936_vm7, %v8943_v50 }
 0x2e8   :  { %2335 = vmatmul.mubr.f32.gmra.mrb[66].mxu1 %v8946_v42 }
 0x2e9   :  { %5914 = vmatprep.mubr.msk.f32.mxu1 %vm1936_vm7, %v8959_v61 }
 0x2ec   :  { %2340 = vmatmul.mubr.f32.gmra.mrb[68].mxu1 %v8962_v2 }
 0x2ed   :  { %5915 = vmatprep.mubr.msk.f32.mxu1 %vm1936_vm7, %v8975_v17 }
 0x2f0   :  { %2345 = vmatmul.mubr.f32.gmra.mrb[70].mxu1 %v8978_v59 }
 0x2f1   :  { %5916 = vmatprep.mubr.msk.f32.mxu1 %vm1936_vm7, %v8991_v18 }
 0x2f4   :  { %2350 = vmatmul.mubr.f32.gmra.mrb[72].mxu1 %v8994_v39 }
 0x2f5   :  { %5917 = vmatprep.mubr.msk.f32.mxu1 %vm1936_vm7, %v9007_v53 }
 0x2f8   :  { %2355 = vmatmul.mubr.f32.gmra.mrb[74].mxu1 %v9010_v1 }
 0x2f9   :  { %5918 = vmatprep.mubr.msk.f32.mxu1 %vm1936_vm7, %v9023_v10 }
 0x2fc   :  { %2360 = vmatmul.mubr.f32.gmra.mrb[76].mxu1 %v9026_v47 }
 0x2fd   :  { %5919 = vmatprep.mubr.msk.f32.mxu1 %vm1936_vm7, %v9033_v43 }
 0x300   :  { %2365 = vmatmul.mubr.f32.gmra.mrb[78].mxu1 %v9036_v45 }
 0x301   :  { %5920 = vmatprep.mubr.msk.f32.mxu1 %vm1936_vm7, %v9043_v62  ;;  %v2435_v62 = vld [vmem:[%s10788_s4 + $0x8] sm:$0xff] }
 0x304   :  { %2370 = vmatmul.mubr.f32.gmra.mrb[80].mxu1 %v9046_v6 }
 0x305   :  { %5921 = vmatprep.mubr.msk.f32.mxu1 %vm1936_vm7, %v9052_v11 }
 0x308   :  { %2375 = vmatmul.mubr.f32.gmra.mrb[82].mxu1 %v9055_v21 }
 0x309   :  { %5922 = vmatprep.mubr.msk.f32.mxu1 %vm1936_vm7, %v9061_v32 }
 0x30c   :  { %2380 = vmatmul.mubr.f32.gmra.mrb[84].mxu1 %v9064_v35 }
 0x30d   :  { %5923 = vmatprep.mubr.msk.f32.mxu1 %vm1936_vm7, %v9070_v48 }
 0x310   :  { %2385 = vmatmul.mubr.f32.gmra.mrb[86].mxu1 %v9073_v7 }
 0x311   :  { %5924 = vmatprep.mubr.msk.f32.mxu1 %vm1936_vm7, %v1899_v31 }
 0x314   :  { %2390 = vmatmul.mubr.f32.gmra.mrb[88].mxu1 %v1898_v20 }
 0x315   :  { %5925 = vmatprep.mubr.msk.f32.mxu1 %vm1936_vm7, %v1901_v34 }
 0x318   :  { %2395 = vmatmul.mubr.f32.gmra.mrb[90].mxu1 %v1900_v37 }
 0x319   :  { %5926 = vmatprep.mubr.msk.f32.mxu1 %vm1936_vm7, %v1903_v49 }
 0x31c   :  { %2400 = vmatmul.mubr.f32.gmra.mrb[92].mxu1 %v1902_v13 }
 0x31d   :  { %5927 = vmatprep.mubr.msk.f32.mxu1 %vm1936_vm7, %v1905_v25 }
 0x320   :  { %2405 = vmatmul.mubr.f32.gmra.mrb[94].mxu1 %v1904_v38 }
 0x321   :  { %5928 = vmatprep.mubr.msk.f32.mxu1 %vm2458_vm8, %v2435_v62 }
 0x337   :  { %v2075_v19 = vpop.f32.mrb[0].mxu1 }
 0x338   :  { %v2077_v30 = vpop.f32.mrb[1].mxu1 }
 0x33b   :  { %v2080_v26 = vpop.f32.mrb[2].mxu1 }
 0x33c   :  { %v2082_v29 = vpop.f32.mrb[3].mxu1 }
 0x33f   :  { %v9154_v36 = vpop.f32.mrb[4].mxu1 }
 0x340   :  { %v2087_v40 = vpop.f32.mrb[5].mxu1 }
 0x343   :  { %v2090_v55 = vpop.f32.mrb[6].mxu1 }
 0x344   :  { %v2092_v46 = vpop.f32.mrb[7].mxu1 }
 0x347   :  { %v9156_v52 = vpop.f32.mrb[8].mxu1 }
 0x348   :  { %v2097_v56 = vpop.f32.mrb[9].mxu1 }
 0x34b   :  { %v9158_v14 = vpop.f32.mrb[10].mxu1 }
 0x34c   :  { %v2102_v57 = vpop.f32.mrb[11].mxu1 }
 0x34f   :  { %v9160_v63 = vpop.f32.mrb[12].mxu1 }
 0x350   :  { %v2107_v0 = vpop.f32.mrb[13].mxu1 }
 0x353   :  { %v9162_v4 = vpop.f32.mrb[14].mxu1 }
 0x354   :  { %v2112_v5 = vpop.f32.mrb[15].mxu1 }
 0x357   :  { %v9164_v54 = vpop.f32.mrb[16].mxu1 }
 0x358   :  { %v2117_v27 = vpop.f32.mrb[17].mxu1 }
 0x35b   :  { %v9166_v23 = vpop.f32.mrb[18].mxu1 }
 0x35c   :  { %v2122_v33 = vpop.f32.mrb[19].mxu1 }
 0x35f   :  { %v9168_v50 = vpop.f32.mrb[20].mxu1 }
 0x360   :  { %v2127_v42 = vpop.f32.mrb[21].mxu1 }
 0x363   :  { %v9170_v61 = vpop.f32.mrb[22].mxu1 }
 0x364   :  { %v2132_v2 = vpop.f32.mrb[23].mxu1 }
 0x367   :  { %v9172_v17 = vpop.f32.mrb[24].mxu1 }
 0x368   :  { %v2137_v59 = vpop.f32.mrb[25].mxu1 }
 0x36b   :  { %v9174_v18 = vpop.f32.mrb[26].mxu1 }
 0x36c   :  { %v2142_v39 = vpop.f32.mrb[27].mxu1 }
 0x36f   :  { %v9176_v53 = vpop.f32.mrb[28].mxu1 }
 0x370   :  { %v2147_v1 = vpop.f32.mrb[29].mxu1 }
 0x373   :  { %v9178_v10 = vpop.f32.mrb[30].mxu1 }
 0x374   :  { %v2152_v47 = vpop.f32.mrb[31].mxu1 }
 0x377   :  { %v9180_v43 = vpop.f32.mrb[32].mxu1 }
 0x378   :  { %v2157_v45 = vpop.f32.mrb[33].mxu1 }
 0x37b   :  { %v9186_v6 = vpop.f32.mrb[34].mxu1 }
 0x37c   :  { %v2162_v11 = vpop.f32.mrb[35].mxu1 }
 0x37f   :  { %v9188_v21 = vpop.f32.mrb[36].mxu1 }
 0x380   :  { %v2167_v32 = vpop.f32.mrb[37].mxu1 }
 0x383   :  { %v9190_v35 = vpop.f32.mrb[38].mxu1 }
 0x384   :  { %v2172_v44 = vpop.f32.mrb[39].mxu1 }
 0x387   :  { %v9192_v48 = vpop.f32.mrb[40].mxu1 }
 0x388   :  { %v2177_v7 = vpop.f32.mrb[41].mxu1 }
 0x38b   :  { %v9194_v8 = vpop.f32.mrb[42].mxu1 }
 0x38c   :  { %v2182_v60 = vpop.f32.mrb[43].mxu1 }
 0x38f   :  { %v9196_v31 = vpop.f32.mrb[44].mxu1 }
 0x390   :  { %v2187_v20 = vpop.f32.mrb[45].mxu1 }
 0x393   :  { %v9198_v22 = vpop.f32.mrb[46].mxu1 }
 0x394   :  { %v2192_v41 = vpop.f32.mrb[47].mxu1 }
 0x397   :  { %v2291_v34 = vpop.f32.mrb[48].mxu1 }
 0x398   :  { %v2410_v37 = vmax.f32 %v2075_v19, %v2291_v34  ;;  %v2293_v51 = vpop.f32.mrb[49].mxu1 }
 0x39b   :  { %v2296_v58 = vpop.f32.mrb[50].mxu1 }
 0x39c   :  { %v2411_v49 = vmax.f32 %v2080_v26, %v2296_v58  ;;  %v2298_v13 = vpop.f32.mrb[51].mxu1 }
 0x39e   :  { %v9200_v9 = vpack.c.bf16 %v2411_v49, %v2410_v37 }
 0x39f   :  { %v2301_v24 = vpop.f32.mrb[52].mxu1 }
 0x3a0   :  { %v2412_v25 = vmax.f32 %v9154_v36, %v2301_v24  ;;  %v2303_v38 = vpop.f32.mrb[53].mxu1  ;;  %7016 = vmatpush1.bf16.msra.mxu1 %v9200_v9 }
 0x3a1   :  { %7017 = vmatprep.subr.bf16.mxu1 %v7797_v28 }
 0x3a3   :  { %v2306_v30 = vpop.f32.mrb[54].mxu1 }
 0x3a4   :  { %v2413_v29 = vmax.f32 %v2090_v55, %v2306_v30  ;;  %v2308_v40 = vpop.f32.mrb[55].mxu1 }
 0x3a6   :  { %v9205_v46 = vpack.c.bf16 %v2413_v29, %v2412_v25 }
 0x3a7   :  { %v2311_v19 = vpop.f32.mrb[56].mxu1 }
 0x3a8   :  { %v2414_v56 = vmax.f32 %v9156_v52, %v2311_v19  ;;  %v2313_v26 = vpop.f32.mrb[57].mxu1  ;;  %7019 = vmatpush1.bf16.msra.mxu1 %v9205_v46 }
 0x3a9   :  { %7020 = vmatprep.subr.bf16.mxu1 %v7797_v28 }
 0x3ab   :  { %v2316_v57 = vpop.f32.mrb[58].mxu1 }
 0x3ac   :  { %v2415_v36 = vmax.f32 %v9158_v14, %v2316_v57  ;;  %v2318_v0 = vpop.f32.mrb[59].mxu1 }
 0x3ae   :  { %v9211_v5 = vpack.c.bf16 %v2415_v36, %v2414_v56 }
 0x3af   :  { %v2321_v27 = vpop.f32.mrb[60].mxu1 }
 0x3b0   :  { %v2416_v55 = vmax.f32 %v9160_v63, %v2321_v27  ;;  %v2323_v33 = vpop.f32.mrb[61].mxu1  ;;  %7022 = vmatpush1.bf16.msra.mxu1 %v9211_v5 }
 0x3b1   :  { %7023 = vmatprep.subr.bf16.mxu1 %v7797_v28 }
 0x3b3   :  { %v2326_v52 = vpop.f32.mrb[62].mxu1 }
 0x3b4   :  { %v2417_v42 = vmax.f32 %v9162_v4, %v2326_v52  ;;  %v2328_v2 = vpop.f32.mrb[63].mxu1 }
 0x3b6   :  { %v9217_v59 = vpack.c.bf16 %v2417_v42, %v2416_v55 }
 0x3b7   :  { %v2331_v39 = vpop.f32.mrb[64].mxu1 }
 0x3b8   :  { %v2418_v14 = vmax.f32 %v9164_v54, %v2331_v39  ;;  %v2333_v1 = vpop.f32.mrb[65].mxu1  ;;  %7025 = vmatpush1.bf16.msra.mxu1 %v9217_v59 }
 0x3b9   :  { %7026 = vmatprep.subr.bf16.mxu1 %v7797_v28 }
 0x3bb   :  { %v2336_v63 = vpop.f32.mrb[66].mxu1 }
 0x3bc   :  { %v2419_v47 = vmax.f32 %v9166_v23, %v2336_v63  ;;  %v2338_v45 = vpop.f32.mrb[67].mxu1 }
 0x3bd   :  { %v2441_v45 = vld [vmem:[%s10788_s4 + $0x38] sm:$0xff] }
 0x3be   :  { %v9223_v62 = vpack.c.bf16 %v2419_v47, %v2418_v14  ;;  %v2439_v47 = vld [vmem:[%s10788_s4 + $0x28] sm:$0xff] }
 0x3bf   :  { %v2341_v11 = vpop.f32.mrb[68].mxu1 }
 0x3c0   :  { %v2420_v4 = vmax.f32 %v9168_v50, %v2341_v11  ;;  %v2343_v32 = vpop.f32.mrb[69].mxu1  ;;  %7028 = vmatpush1.bf16.msra.mxu1 %v9223_v62  ;;  %v2443_v11 = vld [vmem:[%s10788_s4 + $0x48] sm:$0xff] }
 0x3c1   :  { %7029 = vmatprep.subr.bf16.mxu1 %v7797_v28  ;;  %v2447_v32 = vld [vmem:[%s10788_s4 + $0x68] sm:$0xff] }
 0x3c3   :  { %v2346_v54 = vpop.f32.mrb[70].mxu1 }
 0x3c4   :  { %v2421_v44 = vmax.f32 %v9170_v61, %v2346_v54  ;;  %v2348_v7 = vpop.f32.mrb[71].mxu1  ;;  %v2449_v54 = vld [vmem:[%s10788_s4 + $0x78] sm:$0xff] }
 0x3c5   :  { %v2451_v7 = vld [vmem:[%s10788_s4 + $0x88] sm:$0xff] }
 0x3c6   :  { %v9229_v60 = vpack.c.bf16 %v2421_v44, %v2420_v4  ;;  %v2445_v4 = vld [vmem:[%s10788_s4 + $0x58] sm:$0xff]  ;;  %v2448_v44 = vld [vmem:[%s10788_s4 + $0x70] sm:$0xff] }
 0x3c7   :  { %v2351_v20 = vpop.f32.mrb[72].mxu1 }
 0x3c8   :  { %v2422_v23 = vmax.f32 %v9172_v17, %v2351_v20  ;;  %v2353_v41 = vpop.f32.mrb[73].mxu1  ;;  %7031 = vmatpush1.bf16.msra.mxu1 %v9229_v60  ;;  %v2453_v20 = vld [vmem:[%s10788_s4 + $0x98] sm:$0xff] }
 0x3c9   :  { %7032 = vmatprep.subr.bf16.mxu1 %v7797_v28  ;;  %v2455_v41 = vld [vmem:[%s10788_s4 + $0xa8] sm:$0xff] }
 0x3cb   :  { %v2356_v50 = vpop.f32.mrb[74].mxu1 }
 0x3cc   :  { %v2423_v34 = vmax.f32 %v9174_v18, %v2356_v50  ;;  %v2358_v37 = vpop.f32.mrb[75].mxu1  ;;  %v2454_v50 = vld [vmem:[%s10788_s4 + $0xa0] sm:$0xff] }
 0x3cd   :  { %v2456_v37 = vld [vmem:[%s10788_s4 + $0xb0] sm:$0xff] }
 0x3ce   :  { %v9235_v51 = vpack.c.bf16 %v2423_v34, %v2422_v23  ;;  %v2452_v23 = vld [vmem:[%s10788_s4 + $0x90] sm:$0xff]  ;;  %v2457_v34 = vld [vmem:[%s10788_s4 + $0xb8] sm:$0xff] }
 0x3cf   :  { %v2361_v58 = vpop.f32.mrb[76].mxu1 }
 0x3d0   :  { %v2424_v61 = vmax.f32 %v9176_v53, %v2361_v58  ;;  %v2363_v49 = vpop.f32.mrb[77].mxu1  ;;  %7034 = vmatpush1.bf16.msra.mxu1 %v9235_v51  ;;  %v5940_v58 = vld [vmem:[%s10788_s4 + $0xc0] sm:$0xff] }
 0x3d1   :  { %7035 = vmatprep.subr.bf16.mxu1 %v7797_v28  ;;  %v5942_v49 = vld [vmem:[%s10788_s4 + $0xd0] sm:$0xff] }
 0x3d3   :  { %v2366_v17 = vpop.f32.mrb[78].mxu1 }
 0x3d4   :  { %v2425_v13 = vmax.f32 %v9178_v10, %v2366_v17  ;;  %v2368_v24 = vpop.f32.mrb[79].mxu1  ;;  %v5945_v17 = vld [vmem:[%s10788_s4 + $0xe8] sm:$0xff] }
 0x3d5   :  { %v5947_v24 = vld [vmem:[%s10788_s4 + $0xf8] sm:$0xff] }
 0x3d6   :  { %v9241_v25 = vpack.c.bf16 %v2425_v13, %v2424_v61  ;;  %v5943_v61 = vld [vmem:[%s10788_s4 + $0xd8] sm:$0xff]  ;;  %v5944_v13 = vld [vmem:[%s10788_s4 + $0xe0] sm:$0xff] }
 0x3d7   :  { %v2371_v38 = vpop.f32.mrb[80].mxu1 }
 0x3d8   :  { %v2426_v18 = vmax.f32 %v9180_v43, %v2371_v38  ;;  %v2373_v30 = vpop.f32.mrb[81].mxu1  ;;  %7037 = vmatpush1.bf16.msra.mxu1 %v9241_v25  ;;  %v5949_v38 = vld [vmem:[%s10788_s4 + $0x108] sm:$0xff] }
 0x3d9   :  { %7038 = vmatprep.subr.bf16.mxu1 %v7797_v28  ;;  %v5951_v30 = vld [vmem:[%s10788_s4 + $0x118] sm:$0xff] }
 0x3db   :  { %v2376_v53 = vpop.f32.mrb[82].mxu1 }
 0x3dc   :  { %v2427_v29 = vmax.f32 %v9186_v6, %v2376_v53  ;;  %v2378_v40 = vpop.f32.mrb[83].mxu1  ;;  %v5950_v53 = vld [vmem:[%s10788_s4 + $0x110] sm:$0xff] }
 0x3dd   :  { %v5952_v40 = vld [vmem:[%s10788_s4 + $0x120] sm:$0xff] }
 0x3de   :  { %v9247_v19 = vpack.c.bf16 %v2427_v29, %v2426_v18  ;;  %v5948_v18 = vld [vmem:[%s10788_s4 + $0x100] sm:$0xff]  ;;  %v5953_v29 = vld [vmem:[%s10788_s4 + $0x128] sm:$0xff] }
 0x3df   :  { %v2381_v56 = vpop.f32.mrb[84].mxu1 }
 0x3e0   :  { %v2428_v10 = vmax.f32 %v9188_v21, %v2381_v56  ;;  %v2383_v26 = vpop.f32.mrb[85].mxu1  ;;  %7040 = vmatpush1.bf16.msra.mxu1 %v9247_v19  ;;  %v5954_v56 = vld [vmem:[%s10788_s4 + $0x130] sm:$0xff] }
 0x3e1   :  { %7041 = vmatprep.subr.bf16.mxu1 %v7797_v28  ;;  %v5956_v26 = vld [vmem:[%s10788_s4 + $0x140] sm:$0xff] }
 0x3e3   :  { %v2386_v43 = vpop.f32.mrb[86].mxu1 }
 0x3e4   :  { %v2429_v57 = vmax.f32 %v9190_v35, %v2386_v43  ;;  %v2388_v36 = vpop.f32.mrb[87].mxu1  ;;  %v5959_v43 = vld [vmem:[%s10788_s4 + $0x158] sm:$0xff] }
 0x3e5   :  { %v5961_v36 = vld [vmem:[%s10788_s4 + $0x168] sm:$0xff] }
 0x3e6   :  { %v9253_v0 = vpack.c.bf16 %v2429_v57, %v2428_v10  ;;  %v5957_v10 = vld [vmem:[%s10788_s4 + $0x148] sm:$0xff]  ;;  %v5958_v57 = vld [vmem:[%s10788_s4 + $0x150] sm:$0xff] }
 0x3e7   :  { %v2391_v27 = vpop.f32.mrb[88].mxu1 }
 0x3e8   :  { %v2430_v6 = vmax.f32 %v9192_v48, %v2391_v27  ;;  %v2393_v55 = vpop.f32.mrb[89].mxu1  ;;  %7043 = vmatpush1.bf16.msra.mxu1 %v9253_v0  ;;  %v5963_v27 = vld [vmem:[%s10788_s4 + $0x178] sm:$0xff] }
 0x3e9   :  { %7044 = vmatprep.subr.bf16.mxu1 %v7797_v28  ;;  %v2830_v55 = vld [vmem:[%s10789_s5] sm:$0xff] }
 0x3eb   :  { %v2396_v21 = vpop.f32.mrb[90].mxu1 }
 0x3ec   :  { %v2431_v33 = vmax.f32 %v9194_v8, %v2396_v21  ;;  %v2398_v52 = vpop.f32.mrb[91].mxu1  ;;  %v2434_v8 = vld [vmem:[%s10788_s4] sm:$0xff] }
 0x3ed   :  { %v6100_v21 = vld [vmem:[%s10789_s5 + $0xc0] sm:$0xff] }
 0x3ee   :  { %v9259_v42 = vpack.c.bf16 %v2431_v33, %v2430_v6  ;;  %v5962_v6 = vld [vmem:[%s10788_s4 + $0x170] sm:$0xff]  ;;  %6629 = vmatprep.mubr.msk.f32.mxu0 %vm2838_vm9, %v6100_v21 }
 0x3ef   :  { %v2401_v2 = vpop.f32.mrb[92].mxu1 }
 0x3f0   :  { %v2432_v35 = vmax.f32 %v9196_v31, %v2401_v2  ;;  %v2403_v39 = vpop.f32.mrb[93].mxu1  ;;  %7046 = vmatpush1.bf16.msra.mxu1 %v9259_v42  ;;  %v2437_v31 = vld [vmem:[%s10788_s4 + $0x18] sm:$0xff] }
 0x3f1   :  { %7047 = vmatprep.subr.bf16.mxu1 %v7797_v28 }
 0x3f3   :  { %v2406_v48 = vpop.f32.mrb[94].mxu1 }
 0x3f4   :  { %v2433_v14 = vmax.f32 %v9198_v22, %v2406_v48  ;;  %v2408_v1 = vpop.f32.mrb[95].mxu1  ;;  %v2436_v22 = vld [vmem:[%s10788_s4 + $0x10] sm:$0xff] }
 0x3f6   :  { %v9265_v63 = vpack.c.bf16 %v2433_v14, %v2432_v35 }
 0x3f8   :  { %7049 = vmatpush1.bf16.msra.mxu1 %v9265_v63 }
 0x3f9   :  { %7050 = vmatprep.subr.bf16.mxu1 %v7797_v28 }
 0x3fb   :  { %2560 = vmatmul.mubr.f32.vlgmr.msra.gmra.mrb[96].mxu1 %v2434_v8 }
 0x3fc   :  { %7052 = vmatpush1.bf16.msra.mxu1 %v9200_v9  ;;  %5929 = vmatprep.mubr.msk.f32.mxu1 %vm2458_vm8, %v2437_v31  ;;  %v2438_v9 = vld [vmem:[%s10788_s4 + $0x20] sm:$0xff] }
 0x3fd   :  { %7053 = vmatprep.subr.bf16.mxu1 %v7797_v28 }
 0x3ff   :  { %2565 = vmatmul.mubr.f32.gmra.mrb[98].mxu1 %v2436_v22 }
 0x400   :  { %7055 = vmatpush1.bf16.msra.mxu1 %v9205_v46  ;;  %5930 = vmatprep.mubr.msk.f32.mxu1 %vm2458_vm8, %v2439_v47  ;;  %v2440_v46 = vld [vmem:[%s10788_s4 + $0x30] sm:$0xff] }
 0x401   :  { %7056 = vmatprep.subr.bf16.mxu1 %v7797_v28 }
 0x403   :  { %2570 = vmatmul.mubr.f32.gmra.mrb[100].mxu1 %v2438_v9 }
 0x404   :  { %7058 = vmatpush1.bf16.msra.mxu1 %v9211_v5  ;;  %5931 = vmatprep.mubr.msk.f32.mxu1 %vm2458_vm8, %v2441_v45  ;;  %v2442_v5 = vld [vmem:[%s10788_s4 + $0x40] sm:$0xff] }
 0x405   :  { %7059 = vmatprep.subr.bf16.mxu1 %v7797_v28 }
 0x407   :  { %2575 = vmatmul.mubr.f32.gmra.mrb[102].mxu1 %v2440_v46 }
 0x408   :  { %7061 = vmatpush1.bf16.msra.mxu1 %v9217_v59  ;;  %5932 = vmatprep.mubr.msk.f32.mxu1 %vm2458_vm8, %v2443_v11  ;;  %v2444_v59 = vld [vmem:[%s10788_s4 + $0x50] sm:$0xff] }
 0x409   :  { %7062 = vmatprep.subr.bf16.mxu1 %v7797_v28 }
 0x40b   :  { %2580 = vmatmul.mubr.f32.gmra.mrb[104].mxu1 %v2442_v5 }
 0x40c   :  { %7064 = vmatpush1.bf16.msra.mxu1 %v9223_v62  ;;  %5933 = vmatprep.mubr.msk.f32.mxu1 %vm2458_vm8, %v2445_v4  ;;  %v2446_v62 = vld [vmem:[%s10788_s4 + $0x60] sm:$0xff] }
 0x40d   :  { %7065 = vmatprep.subr.bf16.mxu1 %v7797_v28 }
 0x40f   :  { %2585 = vmatmul.mubr.f32.gmra.mrb[106].mxu1 %v2444_v59 }
 0x410   :  { %7067 = vmatpush1.bf16.msra.mxu1 %v9229_v60  ;;  %5934 = vmatprep.mubr.msk.f32.mxu1 %vm2458_vm8, %v2447_v32  ;;  %v2450_v60 = vld [vmem:[%s10788_s4 + $0x80] sm:$0xff] }
 0x411   :  { %7068 = vmatprep.subr.bf16.mxu1 %v7797_v28 }
 0x413   :  { %2590 = vmatmul.mubr.f32.gmra.mrb[108].mxu1 %v2446_v62 }
 0x414   :  { %7070 = vmatpush1.bf16.msra.mxu1 %v9235_v51  ;;  %5935 = vmatprep.mubr.msk.f32.mxu1 %vm2458_vm8, %v2449_v54  ;;  %v5941_v51 = vld [vmem:[%s10788_s4 + $0xc8] sm:$0xff] }
 0x415   :  { %7071 = vmatprep.subr.bf16.mxu1 %v7797_v28 }
 0x417   :  { %2595 = vmatmul.mubr.f32.gmra.mrb[110].mxu1 %v2448_v44 }
 0x418   :  { %7073 = vmatpush1.bf16.msra.mxu1 %v9241_v25  ;;  %5936 = vmatprep.mubr.msk.f32.mxu1 %vm2458_vm8, %v2451_v7  ;;  %v5946_v25 = vld [vmem:[%s10788_s4 + $0xf0] sm:$0xff] }
 0x419   :  { %7074 = vmatprep.subr.bf16.mxu1 %v7797_v28 }
 0x41b   :  { %2600 = vmatmul.mubr.f32.gmra.mrb[112].mxu1 %v2450_v60 }
 0x41c   :  { %7076 = vmatpush1.bf16.msra.mxu1 %v9247_v19  ;;  %5937 = vmatprep.mubr.msk.f32.mxu1 %vm2458_vm8, %v2453_v20  ;;  %v5955_v19 = vld [vmem:[%s10788_s4 + $0x138] sm:$0xff] }
 0x41d   :  { %7077 = vmatprep.subr.bf16.mxu1 %v7797_v28 }
 0x41f   :  { %2605 = vmatmul.mubr.f32.gmra.mrb[114].mxu1 %v2452_v23 }
 0x420   :  { %7079 = vmatpush1.bf16.msra.mxu1 %v9253_v0  ;;  %5938 = vmatprep.mubr.msk.f32.mxu1 %vm2458_vm8, %v2455_v41  ;;  %v5960_v0 = vld [vmem:[%s10788_s4 + $0x160] sm:$0xff] }
 0x421   :  { %7080 = vmatprep.subr.bf16.mxu1 %v7797_v28 }
 0x423   :  { %2610 = vmatmul.mubr.f32.gmra.mrb[116].mxu1 %v2454_v50 }
 0x424   :  { %7082 = vmatpush1.bf16.msra.mxu1 %v9259_v42  ;;  %5939 = vmatprep.mubr.msk.f32.mxu1 %vm2458_vm8, %v2457_v34 }
 0x425   :  { %7083 = vmatprep.subr.bf16.mxu1 %v7797_v28 }
 0x427   :  { %2615 = vmatmul.mubr.f32.gmra.mrb[118].mxu1 %v2456_v37 }
 0x428   :  { %7085 = vmatpush1.bf16.msra.mxu1 %v9265_v63  ;;  %5964 = vmatprep.mubr.msk.f32.mxu1 %vm2458_vm8, %v5941_v51 }
 0x42b   :  { %2746 = vmatmul.mubr.f32.vlgmr.msra.gmra.mrb[120].mxu1 %v5940_v58 }
 0x42c   :  { %5965 = vmatprep.mubr.msk.f32.mxu1 %vm2458_vm8, %v5943_v61 }
 0x42f   :  { %2751 = vmatmul.mubr.f32.gmra.mrb[122].mxu1 %v5942_v49 }
 0x430   :  { %5966 = vmatprep.mubr.msk.f32.mxu1 %vm2458_vm8, %v5945_v17 }
 0x433   :  { %2756 = vmatmul.mubr.f32.gmra.mrb[124].mxu1 %v5944_v13 }
 0x434   :  { %5967 = vmatprep.mubr.msk.f32.mxu1 %vm2458_vm8, %v5947_v24 }
 0x437   :  { %2761 = vmatmul.mubr.f32.gmra.mrb[126].mxu1 %v5946_v25 }
 0x438   :  { %5968 = vmatprep.mubr.msk.f32.mxu1 %vm2458_vm8, %v5949_v38 }
 0x43b   :  { %2766 = vmatmul.mubr.f32.gmra.mrb[128].mxu1 %v5948_v18 }
 0x43c   :  { %5969 = vmatprep.mubr.msk.f32.mxu1 %vm2458_vm8, %v5951_v30 }
 0x43f   :  { %2771 = vmatmul.mubr.f32.gmra.mrb[130].mxu1 %v5950_v53 }
 0x440   :  { %5970 = vmatprep.mubr.msk.f32.mxu1 %vm2458_vm8, %v5953_v29 }
 0x443   :  { %2776 = vmatmul.mubr.f32.gmra.mrb[132].mxu1 %v5952_v40 }
 0x444   :  { %5971 = vmatprep.mubr.msk.f32.mxu1 %vm2458_vm8, %v5955_v19 }
 0x447   :  { %2781 = vmatmul.mubr.f32.gmra.mrb[134].mxu1 %v5954_v56 }
 0x448   :  { %5972 = vmatprep.mubr.msk.f32.mxu1 %vm2458_vm8, %v5957_v10 }
 0x44b   :  { %2786 = vmatmul.mubr.f32.gmra.mrb[136].mxu1 %v5956_v26 }
 0x44c   :  { %5973 = vmatprep.mubr.msk.f32.mxu1 %vm2458_vm8, %v5959_v43 }
 0x44f   :  { %2791 = vmatmul.mubr.f32.gmra.mrb[138].mxu1 %v5958_v57 }
 0x450   :  { %5974 = vmatprep.mubr.msk.f32.mxu1 %vm2458_vm8, %v5961_v36 }
 0x453   :  { %2796 = vmatmul.mubr.f32.gmra.mrb[140].mxu1 %v5960_v0 }
 0x454   :  { %5975 = vmatprep.mubr.msk.f32.mxu1 %vm2458_vm8, %v5963_v27 }
 0x457   :  { %2801 = vmatmul.mubr.f32.gmra.mrb[142].mxu1 %v5962_v6 }
 0x458   :  { %6521 = vmatprep.mubr.msk.f32.mxu1 %vm2838_vm9, %v2830_v55 }
 0x4ce   :  { %v2561_v33 = vpop.f32.mrb[96].mxu1 }
 0x4cf   :  { %v2563_v52 = vpop.f32.mrb[97].mxu1 }
 0x4d2   :  { %v2566_v42 = vpop.f32.mrb[98].mxu1 }
 0x4d3   :  { %v2568_v2 = vpop.f32.mrb[99].mxu1 }
 0x4d6   :  { %v2571_v35 = vpop.f32.mrb[100].mxu1 }
 0x4d7   :  { %v2573_v39 = vpop.f32.mrb[101].mxu1 }
 0x4da   :  { %v2576_v48 = vpop.f32.mrb[102].mxu1 }
 0x4db   :  { %v2578_v14 = vpop.f32.mrb[103].mxu1 }
 0x4de   :  { %v2581_v1 = vpop.f32.mrb[104].mxu1 }
 0x4df   :  { %v2583_v63 = vpop.f32.mrb[105].mxu1 }
 0x4e2   :  { %v2586_v8 = vpop.f32.mrb[106].mxu1 }
 0x4e3   :  { %v2588_v31 = vpop.f32.mrb[107].mxu1 }
 0x4e6   :  { %v2591_v22 = vpop.f32.mrb[108].mxu1 }
 0x4e7   :  { %v2593_v47 = vpop.f32.mrb[109].mxu1 }
 0x4ea   :  { %v2596_v9 = vpop.f32.mrb[110].mxu1 }
 0x4eb   :  { %v2598_v45 = vpop.f32.mrb[111].mxu1 }
 0x4ee   :  { %v9464_v46 = vpop.f32.mrb[112].mxu1 }
 0x4ef   :  { %v2603_v11 = vpop.f32.mrb[113].mxu1 }
 0x4f2   :  { %v9466_v5 = vpop.f32.mrb[114].mxu1 }
 0x4f3   :  { %v2608_v4 = vpop.f32.mrb[115].mxu1 }
 0x4f4   :  { %v2831_v4 = vld [vmem:[%s10789_s5 + $0x8] sm:$0xff] }
 0x4f6   :  { %v9468_v59 = vpop.f32.mrb[116].mxu1 }
 0x4f7   :  { %v2613_v32 = vpop.f32.mrb[117].mxu1 }
 0x4f8   :  { %v2832_v32 = vld [vmem:[%s10789_s5 + $0x10] sm:$0xff] }
 0x4fa   :  { %v9470_v62 = vpop.f32.mrb[118].mxu1 }
 0x4fb   :  { %v2618_v54 = vpop.f32.mrb[119].mxu1 }
 0x4fc   :  { %v2834_v54 = vld [vmem:[%s10789_s5 + $0x20] sm:$0xff] }
 0x4fe   :  { %v2747_v44 = vpop.f32.mrb[120].mxu1 }
 0x4ff   :  { %v2806_v7 = vmax.f32 %v2561_v33, %v2747_v44  ;;  %v2749_v60 = vpop.f32.mrb[121].mxu1  ;;  %v2835_v44 = vld [vmem:[%s10789_s5 + $0x28] sm:$0xff] }
 0x500   :  { %v2837_v60 = vld [vmem:[%s10789_s5 + $0x38] sm:$0xff] }
 0x501   :  { %v2818_v50 = vmax.f32 %v2806_v7, 0.0  ;;  %v2836_v7 = vld [vmem:[%s10789_s5 + $0x30] sm:$0xff] }
 0x502   :  { %v2752_v20 = vpop.f32.mrb[122].mxu1 }
 0x503   :  { %v2807_v23 = vmax.f32 %v2566_v42, %v2752_v20  ;;  %v2754_v41 = vpop.f32.mrb[123].mxu1  ;;  %v5984_v20 = vld [vmem:[%s10789_s5 + $0x40] sm:$0xff] }
 0x504   :  { %v6003_v41 = vld [vmem:[%s10790_s6 + $0x108] sm:$0xff] }
 0x505   :  { %v2819_v34 = vmax.f32 %v2807_v23, 0.0  ;;  %v6001_v23 = vld [vmem:[%s10790_s6 + $0xf8] sm:$0xff] }
 0x506   :  { %v2757_v37 = vpop.f32.mrb[124].mxu1 }
 0x507   :  { %v9472_v51 = vpack.c.bf16 %v2819_v34, %v2818_v50  ;;  %v2808_v58 = vmax.f32 %v2571_v35, %v2757_v37  ;;  %v2759_v61 = vpop.f32.mrb[125].mxu1  ;;  %v7134_v50 = vpack.c.bf16 %v6003_v41, %v6001_v23  ;;  %v6000_v34 = vld [vmem:[%s10790_s6 + $0xf0] sm:$0xff]  ;;  %v6002_v37 = vld [vmem:[%s10790_s6 + $0x100] sm:$0xff] }
 0x508   :  { %v6007_v61 = vld [vmem:[%s10790_s6 + $0x128] sm:$0xff]  ;;  %v6102_v41 = vld [vmem:[%s10789_s5 + $0xd0] sm:$0xff] }
 0x509   :  { %7087 = vmatprep.subr.bf16.mxu1 %v9472_v51  ;;  %7243 = vmatprep.subr.bf16.mxu0 %v9472_v51  ;;  %v2820_v24 = vmax.f32 %v2808_v58, 0.0  ;;  %v6005_v58 = vld [vmem:[%s10790_s6 + $0x118] sm:$0xff] }
 0x50a   :  { %v2762_v49 = vpop.f32.mrb[126].mxu1  ;;  %7089 = vmatpush3.bf16.msra.mxu1 %v9472_v51  ;;  %7245 = vmatpush3.bf16.msra.mxu0 %v9472_v51 }
 0x50b   :  { %v2809_v17 = vmax.f32 %v2576_v48, %v2762_v49  ;;  %v2764_v13 = vpop.f32.mrb[127].mxu1  ;;  %v5985_v49 = vld [vmem:[%s10789_s5 + $0x48] sm:$0xff] }
 0x50c   :  { %v5986_v13 = vld [vmem:[%s10789_s5 + $0x50] sm:$0xff] }
 0x50d   :  { %v2821_v25 = vmax.f32 %v2809_v17, 0.0  ;;  %v7136_v17 = vpack.c.bf16 %v6002_v37, %v6000_v34  ;;  %v6104_v34 = vld [vmem:[%s10789_s5 + $0xe0] sm:$0xff]  ;;  %v6105_v37 = vld [vmem:[%s10789_s5 + $0xe8] sm:$0xff] }
 0x50e   :  { %v2767_v38 = vpop.f32.mrb[128].mxu1 }
 0x50f   :  { %v9478_v18 = vpack.c.bf16 %v2821_v25, %v2820_v24  ;;  %v2810_v30 = vmax.f32 %v2581_v1, %v2767_v38  ;;  %v2769_v53 = vpop.f32.mrb[129].mxu1  ;;  %v7138_v24 = vpack.c.bf16 %v6007_v61, %v6005_v58  ;;  %v5987_v25 = vld [vmem:[%s10789_s5 + $0x58] sm:$0xff]  ;;  %v5988_v38 = vld [vmem:[%s10789_s5 + $0x60] sm:$0xff]  ;;  %v6106_v58 = vld [vmem:[%s10789_s5 + $0xf0] sm:$0xff] }
 0x510   :  { %v5990_v53 = vld [vmem:[%s10789_s5 + $0x70] sm:$0xff]  ;;  %v6107_v61 = vld [vmem:[%s10789_s5 + $0xf8] sm:$0xff] }
 0x511   :  { %7091 = vmatprep.subr.bf16.mxu1 %v9478_v18  ;;  %7247 = vmatprep.subr.bf16.mxu0 %v9478_v18  ;;  %v2822_v56 = vmax.f32 %v2810_v30, 0.0  ;;  %v5989_v30 = vld [vmem:[%s10789_s5 + $0x68] sm:$0xff] }
 0x512   :  { %v2772_v29 = vpop.f32.mrb[130].mxu1  ;;  %7093 = vmatpush3.bf16.msra.mxu1 %v9478_v18  ;;  %7249 = vmatpush3.bf16.msra.mxu0 %v9478_v18 }
 0x513   :  { %v2811_v40 = vmax.f32 %v2586_v8, %v2772_v29  ;;  %v2774_v19 = vpop.f32.mrb[131].mxu1  ;;  %v5991_v29 = vld [vmem:[%s10789_s5 + $0x78] sm:$0xff] }
 0x514   :  { %v6006_v19 = vld [vmem:[%s10790_s6 + $0x120] sm:$0xff] }
 0x515   :  { %v2823_v10 = vmax.f32 %v2811_v40, 0.0  ;;  %v6004_v40 = vld [vmem:[%s10790_s6 + $0x110] sm:$0xff] }
 0x516   :  { %v2777_v26 = vpop.f32.mrb[132].mxu1 }
 0x517   :  { %v9484_v43 = vpack.c.bf16 %v2823_v10, %v2822_v56  ;;  %v2812_v57 = vmax.f32 %v2591_v22, %v2777_v26  ;;  %v2779_v36 = vpop.f32.mrb[133].mxu1  ;;  %v7140_v56 = vpack.c.bf16 %v6006_v19, %v6004_v40  ;;  %v6009_v10 = vld [vmem:[%s10790_s6 + $0x138] sm:$0xff]  ;;  %v6011_v26 = vld [vmem:[%s10790_s6 + $0x148] sm:$0xff] }
 0x518   :  { %v6008_v36 = vld [vmem:[%s10790_s6 + $0x130] sm:$0xff] }
 0x519   :  { %7095 = vmatprep.subr.bf16.mxu1 %v9484_v43  ;;  %7251 = vmatprep.subr.bf16.mxu0 %v9484_v43  ;;  %v2824_v55 = vmax.f32 %v2812_v57, 0.0  ;;  %v7142_v57 = vpack.c.bf16 %v6011_v26, %v6009_v10 }
 0x51a   :  { %v2782_v0 = vpop.f32.mrb[134].mxu1  ;;  %7097 = vmatpush3.bf16.msra.mxu1 %v9484_v43  ;;  %7253 = vmatpush3.bf16.msra.mxu0 %v9484_v43 }
 0x51b   :  { %v2813_v27 = vmax.f32 %v2596_v9, %v2782_v0  ;;  %v2784_v6 = vpop.f32.mrb[135].mxu1  ;;  %v6010_v0 = vld [vmem:[%s10790_s6 + $0x140] sm:$0xff] }
 0x51c   :  { %v7144_v6 = vpack.c.bf16 %v6010_v0, %v6008_v36  ;;  %v2968_v0 = vld [vmem:[%s10790_s6] sm:$0xff] }
 0x51d   :  { %v2825_v21 = vmax.f32 %v2813_v27, 0.0  ;;  %v6013_v27 = vld [vmem:[%s10790_s6 + $0x158] sm:$0xff] }
 0x51e   :  { %v2787_v33 = vpop.f32.mrb[136].mxu1 }
 0x51f   :  { %v9490_v52 = vpack.c.bf16 %v2825_v21, %v2824_v55  ;;  %v2814_v42 = vmax.f32 %v9464_v46, %v2787_v33  ;;  %v2789_v2 = vpop.f32.mrb[137].mxu1  ;;  %v6015_v55 = vld [vmem:[%s10790_s6 + $0x168] sm:$0xff]  ;;  %v6012_v21 = vld [vmem:[%s10790_s6 + $0x150] sm:$0xff]  ;;  %v6014_v33 = vld [vmem:[%s10790_s6 + $0x160] sm:$0xff] }
 0x520   :  { %v7148_v2 = vpack.c.bf16 %v6014_v33, %v6012_v21 }
 0x521   :  { %7099 = vmatprep.subr.bf16.mxu1 %v9490_v52  ;;  %7255 = vmatprep.subr.bf16.mxu0 %v9490_v52  ;;  %v2826_v14 = vmax.f32 %v2814_v42, 0.0  ;;  %v7146_v42 = vpack.c.bf16 %v6015_v55, %v6013_v27  ;;  %v2970_v27 = vld [vmem:[%s10790_s6 + $0x10] sm:$0xff]  ;;  %v2975_v55 = vld [vmem:[%s10790_s6 + $0x38] sm:$0xff] }
 0x522   :  { %v2792_v35 = vpop.f32.mrb[138].mxu1  ;;  %7101 = vmatpush3.bf16.msra.mxu1 %v9490_v52  ;;  %7257 = vmatpush3.bf16.msra.mxu0 %v9490_v52  ;;  %v7164_v21 = vpack.c.bf16 %v2970_v27, %v2968_v0  ;;  %v2994_v0 = vld [vmem:[%s10790_s6 + $0xd0] sm:$0xff] }
 0x523   :  { %v2815_v39 = vmax.f32 %v9466_v5, %v2792_v35  ;;  %v2794_v48 = vpop.f32.mrb[139].mxu1  ;;  %v6017_v35 = vld [vmem:[%s10790_s6 + $0x178] sm:$0xff] }
 0x525   :  { %v2827_v1 = vmax.f32 %v2815_v39, 0.0  ;;  %v6019_v39 = vld [vmem:[%s10790_s6 + $0x188] sm:$0xff] }
 0x526   :  { %v2797_v63 = vpop.f32.mrb[140].mxu1  ;;  %v7150_v48 = vpack.c.bf16 %v6019_v39, %v6017_v35  ;;  %v2974_v35 = vld [vmem:[%s10790_s6 + $0x30] sm:$0xff] }
 0x527   :  { %v9498_v8 = vpack.c.bf16 %v2827_v1, %v2826_v14  ;;  %v2816_v31 = vmax.f32 %v9468_v59, %v2797_v63  ;;  %v2799_v22 = vpop.f32.mrb[141].mxu1  ;;  %v6101_v59 = vld [vmem:[%s10789_s5 + $0xc8] sm:$0xff]  ;;  %v6016_v14 = vld [vmem:[%s10790_s6 + $0x170] sm:$0xff]  ;;  %v6018_v1 = vld [vmem:[%s10790_s6 + $0x180] sm:$0xff] }
 0x528   :  { %v7152_v63 = vpack.c.bf16 %v6018_v1, %v6016_v14  ;;  %v6023_v22 = vld [vmem:[%s10790_s6 + $0x1a8] sm:$0xff]  ;;  %v2979_v14 = vld [vmem:[%s10790_s6 + $0x58] sm:$0xff] }
 0x529   :  { %7103 = vmatprep.subr.bf16.mxu1 %v9498_v8  ;;  %7259 = vmatprep.subr.bf16.mxu0 %v9498_v8  ;;  %v2828_v46 = vmax.f32 %v2816_v31, 0.0  ;;  %v6021_v31 = vld [vmem:[%s10790_s6 + $0x198] sm:$0xff] }
 0x52a   :  { %v2802_v47 = vpop.f32.mrb[142].mxu1  ;;  %7105 = vmatpush3.bf16.msra.mxu1 %v9498_v8  ;;  %7261 = vmatpush3.bf16.msra.mxu0 %v9498_v8 }
 0x52b   :  { %v2817_v9 = vmax.f32 %v9470_v62, %v2802_v47  ;;  %v2804_v45 = vpop.f32.mrb[143].mxu1  ;;  %v2833_v62 = vld [vmem:[%s10789_s5 + $0x18] sm:$0xff]  ;;  %v7154_v47 = vpack.c.bf16 %v6023_v22, %v6021_v31  ;;  %v2976_v22 = vld [vmem:[%s10790_s6 + $0x40] sm:$0xff] }
 0x52c   :  { %v6022_v45 = vld [vmem:[%s10790_s6 + $0x1a0] sm:$0xff] }
 0x52d   :  { %v2829_v11 = vmax.f32 %v2817_v9, 0.0  ;;  %v6020_v9 = vld [vmem:[%s10790_s6 + $0x190] sm:$0xff] }
 0x52f   :  { %v9506_v5 = vpack.c.bf16 %v2829_v11, %v2828_v46  ;;  %v7156_v46 = vpack.c.bf16 %v6022_v45, %v6020_v9  ;;  %v6025_v11 = vld [vmem:[%s10790_s6 + $0x1b8] sm:$0xff]  ;;  %v2981_v45 = vld [vmem:[%s10790_s6 + $0x68] sm:$0xff] }
 0x531   :  { %7107 = vmatprep.subr.bf16.mxu1 %v9506_v5  ;;  %7263 = vmatprep.subr.bf16.mxu0 %v9506_v5 }
 0x532   :  { %7109 = vmatpush3.bf16.msra.mxu1 %v9506_v5  ;;  %7265 = vmatpush3.bf16.msra.mxu0 %v9506_v5 }
 0x533   :  { %7111 = vmatprep.subr.bf16.mxu1 %v9472_v51  ;;  %7295 = vmatprep.subr.bf16.mxu0 %v9472_v51 }
 0x535   :  { %6522 = vmatmul.mubr.msk.f32.vlgmr.msra.gmra.mrb[144].mxu1 %vm2838_vm9, %v2831_v4  ;;  %6630 = vmatmul.mubr.msk.f32.vlgmr.msra.gmra.mrb[48].mxu0 %vm2838_vm9, %v6101_v59  ;;  %v6027_v4 = vld [vmem:[%s10790_s6 + $0x1c8] sm:$0xff] }
 0x536   :  { %7113 = vmatpush3.bf16.msra.mxu1 %v9472_v51  ;;  %7297 = vmatpush3.bf16.msra.mxu0 %v9472_v51  ;;  %v7158_v59 = vpack.c.bf16 %v6027_v4, %v6025_v11 }
 0x537   :  { %7115 = vmatprep.subr.bf16.mxu1 %v9478_v18  ;;  %7299 = vmatprep.subr.bf16.mxu0 %v9478_v18 }
 0x538   :  { %6524 = vmatprep.mubr.msk.f32.mxu1 %vm2838_vm9, %v2832_v32  ;;  %v6024_v32 = vld [vmem:[%s10790_s6 + $0x1b0] sm:$0xff]  ;;  %6632 = vmatprep.mubr.msk.f32.mxu0 %vm2838_vm9, %v6102_v41 }
 0x539   :  { %6525 = vmatmul.mubr.msk.f32.gmra.mrb[146].mxu1 %vm2838_vm9, %v2833_v62  ;;  %v6026_v62 = vld [vmem:[%s10790_s6 + $0x1c0] sm:$0xff]  ;;  %v2986_v41 = vld [vmem:[%s10790_s6 + $0x90] sm:$0xff] }
 0x53a   :  { %7117 = vmatpush3.bf16.msra.mxu1 %v9478_v18  ;;  %7301 = vmatpush3.bf16.msra.mxu0 %v9478_v18 }
 0x53b   :  { %7119 = vmatprep.subr.bf16.mxu1 %v9484_v43  ;;  %7303 = vmatprep.subr.bf16.mxu0 %v9484_v43 }
 0x53c   :  { %6527 = vmatprep.mubr.msk.f32.mxu1 %vm2838_vm9, %v2834_v54  ;;  %v7160_v54 = vpack.c.bf16 %v6026_v62, %v6024_v32  ;;  %v2982_v32 = vld [vmem:[%s10790_s6 + $0x70] sm:$0xff] }
 0x53d   :  { %6528 = vmatmul.mubr.msk.f32.gmra.mrb[148].mxu1 %vm2838_vm9, %v2835_v44  ;;  %v6029_v44 = vld [vmem:[%s10790_s6 + $0x1d8] sm:$0xff] }
 0x53e   :  { %7121 = vmatpush3.bf16.msra.mxu1 %v9484_v43  ;;  %7305 = vmatpush3.bf16.msra.mxu0 %v9484_v43 }
 0x53f   :  { %7123 = vmatprep.subr.bf16.mxu1 %v9490_v52  ;;  %7307 = vmatprep.subr.bf16.mxu0 %v9490_v52 }
 0x540   :  { %6530 = vmatprep.mubr.msk.f32.mxu1 %vm2838_vm9, %v2836_v7  ;;  %v2969_v7 = vld [vmem:[%s10790_s6 + $0x8] sm:$0xff] }
 0x541   :  { %6531 = vmatmul.mubr.msk.f32.gmra.mrb[150].mxu1 %vm2838_vm9, %v2837_v60  ;;  %v2971_v60 = vld [vmem:[%s10790_s6 + $0x18] sm:$0xff] }
 0x542   :  { %7125 = vmatpush3.bf16.msra.mxu1 %v9490_v52  ;;  %7309 = vmatpush3.bf16.msra.mxu0 %v9490_v52  ;;  %v7162_v23 = vpack.c.bf16 %v2971_v60, %v2969_v7  ;;  %v2987_v7 = vld [vmem:[%s10790_s6 + $0x98] sm:$0xff] }
 0x543   :  { %7127 = vmatprep.subr.bf16.mxu1 %v9498_v8  ;;  %7311 = vmatprep.subr.bf16.mxu0 %v9498_v8 }
 0x544   :  { %6557 = vmatprep.mubr.msk.f32.mxu1 %vm2838_vm9, %v5984_v20  ;;  %v6028_v20 = vld [vmem:[%s10790_s6 + $0x1d0] sm:$0xff] }
 0x546   :  { %7129 = vmatpush3.bf16.msra.mxu1 %v9498_v8  ;;  %7313 = vmatpush3.bf16.msra.mxu0 %v9498_v8 }
 0x547   :  { %7131 = vmatprep.subr.bf16.mxu1 %v9506_v5  ;;  %7315 = vmatprep.subr.bf16.mxu0 %v9506_v5 }
 0x54a   :  { %7133 = vmatpush3.bf16.msra.mxu1 %v9506_v5  ;;  %7317 = vmatpush3.bf16.msra.mxu0 %v9506_v5 }
 0x54b   :  { %7135 = vmatprep.subr.bf16.mxu1 %v7134_v50  ;;  %7346 = vmatprep.subr.bf16.mxu0 %v7797_v28  ;;  %v6103_v50 = vld [vmem:[%s10789_s5 + $0xd8] sm:$0xff] }
 0x54c   :  { %6633 = vmatmul.mubr.msk.f32.gmra.mrb[50].mxu0 %vm2838_vm9, %v6103_v50 }
 0x54d   :  { %6558 = vmatmul.mubr.msk.f32.vlgmr.msra.gmra.mrb[152].mxu1 %vm2838_vm9, %v5985_v49  ;;  %6635 = vmatprep.mubr.msk.f32.mxu0 %vm2838_vm9, %v6104_v34  ;;  %v6154_v49 = vld [vmem:[%s10789_s5 + $0x100] sm:$0xff]  ;;  %v2989_v34 = vld [vmem:[%s10790_s6 + $0xa8] sm:$0xff] }
 0x54e   :  { %6560 = vmatprep.mubr.msk.f32.mxu1 %vm2838_vm9, %v5986_v13  ;;  %7137 = vmatpush1.bf16.msra.mxu1 %v7136_v17  ;;  %v6155_v17 = vld [vmem:[%s10789_s5 + $0x108] sm:$0xff]  ;;  %v6156_v13 = vld [vmem:[%s10789_s5 + $0x110] sm:$0xff] }
 0x54f   :  { %7139 = vmatprep.subr.bf16.mxu1 %v7138_v24  ;;  %v6157_v24 = vld [vmem:[%s10789_s5 + $0x118] sm:$0xff] }
 0x550   :  { %6636 = vmatmul.mubr.msk.f32.gmra.mrb[52].mxu0 %vm2838_vm9, %v6105_v37  ;;  %v2991_v37 = vld [vmem:[%s10790_s6 + $0xb8] sm:$0xff] }
 0x551   :  { %6561 = vmatmul.mubr.msk.f32.gmra.mrb[154].mxu1 %vm2838_vm9, %v5987_v25  ;;  %6638 = vmatprep.mubr.msk.f32.mxu0 %vm2838_vm9, %v6106_v58  ;;  %v6158_v25 = vld [vmem:[%s10789_s5 + $0x120] sm:$0xff] }
 0x552   :  { %6563 = vmatprep.mubr.msk.f32.mxu1 %vm2838_vm9, %v5988_v38  ;;  %7141 = vmatpush1.bf16.msra.mxu1 %v7140_v56  ;;  %v6159_v38 = vld [vmem:[%s10789_s5 + $0x128] sm:$0xff] }
 0x553   :  { %7143 = vmatprep.subr.bf16.mxu1 %v7142_v57 }
 0x554   :  { %6639 = vmatmul.mubr.msk.f32.gmra.mrb[54].mxu0 %vm2838_vm9, %v6107_v61 }
 0x555   :  { %6564 = vmatmul.mubr.msk.f32.gmra.mrb[156].mxu1 %vm2838_vm9, %v5989_v30  ;;  %6665 = vmatprep.mubr.msk.f32.mxu0 %vm2838_vm9, %v6154_v49  ;;  %v6160_v30 = vld [vmem:[%s10789_s5 + $0x130] sm:$0xff]  ;;  %v7182_v49 = vpack.c.bf16 %v2991_v37, %v2989_v34  ;;  %v6087_v34 = vld [vmem:[%s10790_s6 + $0x2a8] sm:$0xff]  ;;  %v6089_v37 = vld [vmem:[%s10790_s6 + $0x2b8] sm:$0xff] }
 0x556   :  { %6566 = vmatprep.mubr.msk.f32.mxu1 %vm2838_vm9, %v5990_v53  ;;  %7145 = vmatpush1.bf16.msra.mxu1 %v7144_v6  ;;  %v6161_v53 = vld [vmem:[%s10789_s5 + $0x138] sm:$0xff]  ;;  %v2973_v6 = vld [vmem:[%s10790_s6 + $0x28] sm:$0xff] }
 0x557   :  { %7147 = vmatprep.subr.bf16.mxu1 %v7146_v42  ;;  %v7166_v42 = vpack.c.bf16 %v2975_v55, %v2973_v6  ;;  %v2997_v6 = vld [vmem:[%s10790_s6 + $0xe8] sm:$0xff]  ;;  %v2996_v55 = vld [vmem:[%s10790_s6 + $0xe0] sm:$0xff] }
 0x558   :  { %6666 = vmatmul.mubr.msk.f32.vlgmr.msra.gmra.mrb[56].mxu0 %vm2838_vm9, %v6155_v17  ;;  %v2988_v17 = vld [vmem:[%s10790_s6 + $0xa0] sm:$0xff] }
 0x559   :  { %6567 = vmatmul.mubr.msk.f32.gmra.mrb[158].mxu1 %vm2838_vm9, %v5991_v29  ;;  %6668 = vmatprep.mubr.msk.f32.mxu0 %vm2838_vm9, %v6156_v13  ;;  %v2990_v13 = vld [vmem:[%s10790_s6 + $0xb0] sm:$0xff] }
 0x55a   :  { %3256 = vmatprep.mubr.f32.mxu1 %v7795_v3  ;;  %7149 = vmatpush1.bf16.msra.mxu1 %v7148_v2  ;;  %v2972_v2 = vld [vmem:[%s10790_s6 + $0x20] sm:$0xff] }
 0x55b   :  { %7151 = vmatprep.subr.bf16.mxu1 %v7150_v48  ;;  %v2977_v48 = vld [vmem:[%s10790_s6 + $0x48] sm:$0xff]  ;;  %v7168_v1 = vpack.c.bf16 %v2974_v35, %v2972_v2  ;;  %v6050_v35 = vld [vmem:[%s10789_s5 + $0xa0] sm:$0xff] }
 0x55c   :  { %6669 = vmatmul.mubr.msk.f32.gmra.mrb[58].mxu0 %vm2838_vm9, %v6157_v24  ;;  %v7170_v31 = vpack.c.bf16 %v2979_v14, %v2977_v48  ;;  %v2993_v24 = vld [vmem:[%s10790_s6 + $0xc8] sm:$0xff]  ;;  %v6070_v48 = vld [vmem:[%s10790_s6 + $0x220] sm:$0xff]  ;;  %v6072_v14 = vld [vmem:[%s10790_s6 + $0x230] sm:$0xff] }
 0x55d   :  { %6671 = vmatprep.mubr.msk.f32.mxu0 %vm2838_vm9, %v6158_v25  ;;  %v2995_v25 = vld [vmem:[%s10790_s6 + $0xd8] sm:$0xff] }
 0x55e   :  { %7153 = vmatpush1.bf16.msra.mxu1 %v7152_v63 }
 0x55f   :  { %7155 = vmatprep.subr.bf16.mxu1 %v7154_v47  ;;  %v2978_v47 = vld [vmem:[%s10790_s6 + $0x50] sm:$0xff] }
 0x560   :  { %6672 = vmatmul.mubr.msk.f32.gmra.mrb[60].mxu0 %vm2838_vm9, %v6159_v38  ;;  %v7172_v11 = vpack.c.bf16 %v2978_v47, %v2976_v22  ;;  %v7184_v38 = vpack.c.bf16 %v2990_v13, %v2988_v17  ;;  %v7224_v22 = vpack.c.bf16 %v6072_v14, %v6070_v48  ;;  %v6052_v47 = vld [vmem:[%s10789_s5 + $0xb0] sm:$0xff] }
 0x561   :  { %6674 = vmatprep.mubr.msk.f32.mxu0 %vm2838_vm9, %v6160_v30  ;;  %v7186_v30 = vpack.c.bf16 %v2995_v25, %v2993_v24  ;;  %v6088_v17 = vld [vmem:[%s10790_s6 + $0x2b0] sm:$0xff]  ;;  %v6091_v24 = vld [vmem:[%s10790_s6 + $0x2c8] sm:$0xff]  ;;  %v6090_v25 = vld [vmem:[%s10790_s6 + $0x2c0] sm:$0xff] }
 0x562   :  { %7157 = vmatpush1.bf16.msra.mxu1 %v7156_v46  ;;  %v2983_v46 = vld [vmem:[%s10790_s6 + $0x78] sm:$0xff]  ;;  %v4442_v14 = vld [vmem:[%s10791_s8 + $0x30] sm:$0xff] }
 0x563   :  { %7159 = vmatprep.subr.bf16.mxu1 %v7158_v59  ;;  %v7174_v4 = vpack.c.bf16 %v2983_v46, %v2981_v45  ;;  %v2980_v59 = vld [vmem:[%s10790_s6 + $0x60] sm:$0xff]  ;;  %v6076_v46 = vld [vmem:[%s10790_s6 + $0x250] sm:$0xff] }
 0x564   :  { %6675 = vmatmul.mubr.msk.f32.gmra.mrb[62].mxu0 %vm2838_vm9, %v6161_v53  ;;  %v7176_v60 = vpack.c.bf16 %v2982_v32, %v2980_v59  ;;  %v2992_v53 = vld [vmem:[%s10790_s6 + $0xc0] sm:$0xff]  ;;  %v6053_v59 = vld [vmem:[%s10789_s5 + $0xb8] sm:$0xff] }
 0x565   :  { %v7188_v27 = vpack.c.bf16 %v2994_v0, %v2992_v53  ;;  %v6074_v45 = vld [vmem:[%s10790_s6 + $0x240] sm:$0xff] }
 0x566   :  { %7161 = vmatpush1.bf16.msra.mxu1 %v7160_v54  ;;  %v7228_v32 = vpack.c.bf16 %v6076_v46, %v6074_v45  ;;  %v4447_v45 = vld [vmem:[%s10791_s8 + $0x58] sm:$0xff] }
 0x567   :  { %3220 = vmatprep.subr.mxu1 %v6029_v44  ;;  %v2985_v44 = vld [vmem:[%s10790_s6 + $0x88] sm:$0xff] }
 0x56a   :  { %3221 = vmatpush1.msra.mxu1 %v6028_v20  ;;  %v7178_v20 = vpack.c.bf16 %v2987_v7, %v2985_v44  ;;  %v6080_v44 = vld [vmem:[%s10790_s6 + $0x270] sm:$0xff]  ;;  %v6083_v7 = vld [vmem:[%s10790_s6 + $0x288] sm:$0xff] }
 0x56b   :  { %7163 = vmatprep.subr.bf16.mxu1 %v7162_v23  ;;  %v2984_v23 = vld [vmem:[%s10790_s6 + $0x80] sm:$0xff] }
 0x56c   :  { %v7180_v61 = vpack.c.bf16 %v2986_v41, %v2984_v23  ;;  %v6082_v41 = vld [vmem:[%s10790_s6 + $0x280] sm:$0xff] }
 0x608   :  { %v9753_v29 = vpop.f32.mrb[144].mxu1  ;;  %v10034_v0 = vpop.f32.mrb[48].mxu0 }
 0x609   :  { %v9756_v40 = vpop.f32.mrb[145].mxu1 }
 0x60c   :  { %v9758_v19 = vpop.f32.mrb[146].mxu1 }
 0x60d   :  { %v9760_v56 = vpop.f32.mrb[147].mxu1 }
 0x610   :  { %v9762_v10 = vpop.f32.mrb[148].mxu1 }
 0x611   :  { %v9764_v26 = vpop.f32.mrb[149].mxu1 }
 0x614   :  { %v9766_v57 = vpop.f32.mrb[150].mxu1 }
 0x615   :  { %v9768_v36 = vpop.f32.mrb[151].mxu1 }
 0x620   :  { %v6559_v33 = vpop.f32.mrb[152].mxu1 }
 0x621   :  { %v3097_v39 = vpop.f32.mrb[153].mxu1 }
 0x622   :  { %6030 = vmatmul.mubr.msk.f32.vlgmr.msra.gmra.mrb[160].mxu1 %vm3167_vm10, %v3097_v39 }
 0x623   :  { %7165 = vmatpush1.bf16.msra.mxu1 %v7164_v21  ;;  %3262 = vmatprep.mubr.f32.mxu1 %v7795_v3  ;;  %v6071_v21 = vld [vmem:[%s10790_s6 + $0x228] sm:$0xff] }
 0x624   :  { %7167 = vmatprep.subr.bf16.mxu1 %v7166_v42  ;;  %v6562_v63 = vpop.f32.mrb[154].mxu1  ;;  %v6049_v42 = vld [vmem:[%s10789_s5 + $0x98] sm:$0xff] }
 0x625   :  { %v3107_v9 = vpop.f32.mrb[155].mxu1 }
 0x626   :  { %6031 = vmatmul.mubr.msk.f32.gmra.mrb[162].mxu1 %vm3167_vm10, %v6559_v33  ;;  %v6073_v33 = vld [vmem:[%s10790_s6 + $0x238] sm:$0xff] }
 0x627   :  { %7169 = vmatpush1.bf16.msra.mxu1 %v7168_v1  ;;  %3268 = vmatprep.mubr.f32.mxu1 %v7795_v3  ;;  %v7222_v39 = vpack.c.bf16 %v6073_v33, %v6071_v21  ;;  %v6075_v1 = vld [vmem:[%s10790_s6 + $0x248] sm:$0xff]  ;;  %v4438_v21 = vld [vmem:[%s10791_s8 + $0x10] sm:$0xff] }
 0x628   :  { %7171 = vmatprep.subr.bf16.mxu1 %v7170_v31  ;;  %v6565_v62 = vpop.f32.mrb[156].mxu1  ;;  %v6051_v31 = vld [vmem:[%s10789_s5 + $0xa8] sm:$0xff] }
 0x629   :  { %v3117_v54 = vpop.f32.mrb[157].mxu1 }
 0x62a   :  { %6032 = vmatmul.mubr.msk.f32.gmra.mrb[164].mxu1 %vm3167_vm10, %v3107_v9 }
 0x62b   :  { %7173 = vmatpush1.bf16.msra.mxu1 %v7172_v11  ;;  %3274 = vmatprep.mubr.f32.mxu1 %v7795_v3  ;;  %v6079_v11 = vld [vmem:[%s10790_s6 + $0x268] sm:$0xff] }
 0x62c   :  { %7175 = vmatprep.subr.bf16.mxu1 %v7174_v4  ;;  %v6568_v50 = vpop.f32.mrb[158].mxu1  ;;  %v6081_v4 = vld [vmem:[%s10790_s6 + $0x278] sm:$0xff] }
 0x62d   :  { %v3127_v58 = vpop.f32.mrb[159].mxu1 }
 0x62e   :  { %6033 = vmatmul.mubr.msk.f32.gmra.mrb[166].mxu1 %vm3167_vm10, %v6562_v63  ;;  %v6077_v63 = vld [vmem:[%s10790_s6 + $0x258] sm:$0xff] }
 0x62f   :  { %7177 = vmatpush1.bf16.msra.mxu1 %v7176_v60  ;;  %3280 = vmatprep.mubr.f32.mxu1 %v7795_v3  ;;  %v7226_v9 = vpack.c.bf16 %v6077_v63, %v6075_v1  ;;  %v6085_v60 = vld [vmem:[%s10790_s6 + $0x298] sm:$0xff] }
 0x630   :  { %7179 = vmatprep.subr.bf16.mxu1 %v7178_v20  ;;  %v7234_v23 = vpack.c.bf16 %v6085_v60, %v6083_v7  ;;  %v4443_v1 = vld [vmem:[%s10791_s8 + $0x38] sm:$0xff]  ;;  %v4453_v7 = vld [vmem:[%s10791_s8 + $0x88] sm:$0xff]  ;;  %v6116_v60 = vld [vmem:[%s10790_s6 + $0x2d0] sm:$0xff] }
 0x631   :  { %v7356_v63 = vpack.c.bf16 %v4443_v1, %v4442_v14  ;;  %v6133_v1 = vld [vmem:[%s10790_s6 + $0x358] sm:$0xff] }
 0x632   :  { %6034 = vmatmul.mubr.msk.f32.gmra.mrb[168].mxu1 %vm3167_vm10, %v3117_v54  ;;  %v6078_v54 = vld [vmem:[%s10790_s6 + $0x260] sm:$0xff] }
 0x633   :  { %7181 = vmatpush1.bf16.msra.mxu1 %v7180_v61  ;;  %3286 = vmatprep.mubr.f32.mxu1 %v7795_v3  ;;  %v7232_v20 = vpack.c.bf16 %v6080_v44, %v6078_v54  ;;  %v7238_v61 = vpack.c.bf16 %v6089_v37, %v6087_v34  ;;  %v4452_v44 = vld [vmem:[%s10791_s8 + $0x80] sm:$0xff] }
 0x634   :  { %7183 = vmatprep.subr.bf16.mxu1 %v7182_v49  ;;  %v6086_v49 = vld [vmem:[%s10790_s6 + $0x2a0] sm:$0xff] }
 0x635   :  { %v7240_v13 = vpack.c.bf16 %v6088_v17, %v6086_v49  ;;  %v6122_v49 = vld [vmem:[%s10790_s6 + $0x300] sm:$0xff] }
 0x636   :  { %6035 = vmatmul.mubr.msk.f32.gmra.mrb[170].mxu1 %vm3167_vm10, %v6565_v62  ;;  %v7230_v62 = vpack.c.bf16 %v6081_v4, %v6079_v11  ;;  %v4448_v11 = vld [vmem:[%s10791_s8 + $0x60] sm:$0xff]  ;;  %v4449_v4 = vld [vmem:[%s10791_s8 + $0x68] sm:$0xff] }
 0x637   :  { %7185 = vmatpush1.bf16.msra.mxu1 %v7184_v38  ;;  %3292 = vmatprep.mubr.f32.mxu1 %v7795_v3  ;;  %v6117_v38 = vld [vmem:[%s10790_s6 + $0x2d8] sm:$0xff] }
 0x638   :  { %7187 = vmatprep.subr.bf16.mxu1 %v7186_v30  ;;  %v6119_v30 = vld [vmem:[%s10790_s6 + $0x2e8] sm:$0xff] }
 0x639   :  { %v7266_v53 = vpack.c.bf16 %v6119_v30, %v6117_v38 }
 0x63a   :  { %6036 = vmatmul.mubr.msk.f32.gmra.mrb[172].mxu1 %vm3167_vm10, %v3127_v58 }
 0x63b   :  { %7189 = vmatpush1.bf16.msra.mxu1 %v7188_v27  ;;  %3298 = vmatprep.mubr.f32.mxu1 %v7795_v3  ;;  %v10036_v27 = vpop.f32.mrb[49].mxu0 }
 0x63c   :  { %3357 = vmatprep.subr.mxu1 %v2997_v6  ;;  %v10038_v6 = vpop.f32.mrb[50].mxu0 }
 0x63e   :  { %6037 = vmatmul.mubr.msk.f32.gmra.mrb[174].mxu1 %vm3167_vm10, %v6568_v50  ;;  %v6084_v50 = vld [vmem:[%s10790_s6 + $0x290] sm:$0xff] }
 0x63f   :  { %3358 = vmatpush1.msra.mxu1 %v2996_v55  ;;  %3393 = vmatprep.mubr.f32.mxu1 %v7795_v3  ;;  %v7236_v58 = vpack.c.bf16 %v6084_v50, %v6082_v41  ;;  %v10040_v55 = vpop.f32.mrb[51].mxu0  ;;  %v6123_v41 = vld [vmem:[%s10790_s6 + $0x308] sm:$0xff]  ;;  %v7371_v50 = vpack.c.bf16 %v4453_v7, %v4452_v44  ;;  %v6141_v44 = vld [vmem:[%s10790_s6 + $0x398] sm:$0xff] }
 0x640   :  { %7191 = vmatprep.subr.bf16.mxu1 %v9472_v51  ;;  %v6143_v7 = vld [vmem:[%s10790_s6 + $0x3a8] sm:$0xff] }
 0x642   :  { %6038 = vmatmul.mubr.msk.f32.vlgmr.msra.gmra.mrb[160].mxu1 %vm3167_vm10, %v9756_v40  ;;  %v6069_v40 = vld [vmem:[%s10790_s6 + $0x218] sm:$0xff] }
 0x643   :  { %7193 = vmatpush3.bf16.msra.mxu1 %v9472_v51  ;;  %3399 = vmatprep.mubr.f32.mxu1 %v7795_v3  ;;  %v6063_v51 = vld [vmem:[%s10790_s6 + $0x1e8] sm:$0xff] }
 0x644   :  { %7195 = vmatprep.subr.bf16.mxu1 %v9478_v18 }
 0x646   :  { %6039 = vmatmul.mubr.msk.f32.gmra.mrb[162].mxu1 %vm3167_vm10, %v9753_v29  ;;  %v6067_v29 = vld [vmem:[%s10790_s6 + $0x208] sm:$0xff] }
 0x647   :  { %7197 = vmatpush3.bf16.msra.mxu1 %v9478_v18  ;;  %3405 = vmatprep.mubr.f32.mxu1 %v7795_v3  ;;  %v6065_v18 = vld [vmem:[%s10790_s6 + $0x1f8] sm:$0xff] }
 0x648   :  { %7199 = vmatprep.subr.bf16.mxu1 %v9484_v43 }
 0x64a   :  { %6040 = vmatmul.mubr.msk.f32.gmra.mrb[164].mxu1 %vm3167_vm10, %v9760_v56 }
 0x64b   :  { %7201 = vmatpush3.bf16.msra.mxu1 %v9484_v43  ;;  %3411 = vmatprep.mubr.f32.mxu1 %v7795_v3  ;;  %v7214_v43 = vpack.c.bf16 %v6065_v18, %v6063_v51  ;;  %v10042_v51 = vpop.f32.mrb[52].mxu0 }
 0x64c   :  { %7203 = vmatprep.subr.bf16.mxu1 %v9490_v52  ;;  %v10044_v18 = vpop.f32.mrb[53].mxu0 }
 0x64e   :  { %6041 = vmatmul.mubr.msk.f32.gmra.mrb[166].mxu1 %vm3167_vm10, %v9758_v19  ;;  %v6047_v19 = vld [vmem:[%s10789_s5 + $0x88] sm:$0xff] }
 0x64f   :  { %7205 = vmatpush3.bf16.msra.mxu1 %v9490_v52  ;;  %3417 = vmatprep.mubr.f32.mxu1 %v7795_v3  ;;  %v6046_v52 = vld [vmem:[%s10789_s5 + $0x80] sm:$0xff] }
 0x650   :  { %7207 = vmatprep.subr.bf16.mxu1 %v9498_v8 }
 0x652   :  { %6042 = vmatmul.mubr.msk.f32.gmra.mrb[168].mxu1 %vm3167_vm10, %v9764_v26  ;;  %v7218_v26 = vpack.c.bf16 %v6069_v40, %v6067_v29 }
 0x653   :  { %7209 = vmatpush3.bf16.msra.mxu1 %v9498_v8  ;;  %3423 = vmatprep.mubr.f32.mxu1 %v7795_v3  ;;  %v6062_v8 = vld [vmem:[%s10790_s6 + $0x1e0] sm:$0xff] }
 0x654   :  { %7211 = vmatprep.subr.bf16.mxu1 %v9506_v5 }
 0x656   :  { %6043 = vmatmul.mubr.msk.f32.gmra.mrb[170].mxu1 %vm3167_vm10, %v9762_v10  ;;  %v6048_v10 = vld [vmem:[%s10789_s5 + $0x90] sm:$0xff] }
 0x657   :  { %7213 = vmatpush3.bf16.msra.mxu1 %v9506_v5  ;;  %3429 = vmatprep.mubr.f32.mxu1 %v7795_v3  ;;  %v6064_v5 = vld [vmem:[%s10790_s6 + $0x1f0] sm:$0xff] }
 0x658   :  { %7215 = vmatprep.subr.bf16.mxu1 %v7214_v43  ;;  %v7216_v56 = vpack.c.bf16 %v6064_v5, %v6062_v8  ;;  %v10046_v43 = vpop.f32.mrb[54].mxu0 }
 0x65a   :  { %6044 = vmatmul.mubr.msk.f32.gmra.mrb[172].mxu1 %vm3167_vm10, %v9768_v36  ;;  %v6066_v36 = vld [vmem:[%s10790_s6 + $0x200] sm:$0xff] }
 0x65b   :  { %3435 = vmatprep.mubr.f32.mxu1 %v7795_v3 }
 0x65e   :  { %6045 = vmatmul.mubr.msk.f32.gmra.mrb[174].mxu1 %vm3167_vm10, %v9766_v57  ;;  %v6068_v57 = vld [vmem:[%s10790_s6 + $0x210] sm:$0xff] }
 0x65f   :  { %6593 = vmatprep.mubr.msk.f32.mxu1 %vm2838_vm9, %v6046_v52  ;;  %v7220_v2 = vpack.c.bf16 %v6068_v57, %v6066_v36  ;;  %v10048_v52 = vpop.f32.mrb[55].mxu0  ;;  %v4436_v36 = vld [vmem:[%s10791_s8] sm:$0xff]  ;;  %v4437_v57 = vld [vmem:[%s10791_s8 + $0x8] sm:$0xff] }
 0x660   :  { %v10050_v8 = vpop.f32.mrb[56].mxu0  ;;  %v7347_v33 = vpack.c.bf16 %v4437_v57, %v4436_v36  ;;  %v6126_v36 = vld [vmem:[%s10790_s6 + $0x320] sm:$0xff] }
 0x661   :  { %v10052_v5 = vpop.f32.mrb[57].mxu0 }
 0x662   :  { %6594 = vmatmul.mubr.msk.f32.vlgmr.msra.gmra.mrb[176].mxu1 %vm2838_vm9, %v6047_v19  ;;  %v10054_v29 = vpop.f32.mrb[58].mxu0  ;;  %7348 = vmatpush1.bf16.msra.mxu0 %v7347_v33  ;;  %v6131_v33 = vld [vmem:[%s10790_s6 + $0x348] sm:$0xff] }
 0x663   :  { %6596 = vmatprep.mubr.msk.f32.mxu1 %vm2838_vm9, %v6048_v10  ;;  %7217 = vmatpush1.bf16.msra.mxu1 %v7216_v56  ;;  %v10056_v40 = vpop.f32.mrb[59].mxu0 }
 0x664   :  { %7219 = vmatprep.subr.bf16.mxu1 %v7218_v26  ;;  %v10058_v19 = vpop.f32.mrb[60].mxu0  ;;  %7349 = vmatprep.subr.bf16.mxu0 %v7797_v28 }
 0x665   :  { %v10060_v56 = vpop.f32.mrb[61].mxu0 }
 0x666   :  { %6597 = vmatmul.mubr.msk.f32.gmra.mrb[178].mxu1 %vm2838_vm9, %v6049_v42  ;;  %v10062_v10 = vpop.f32.mrb[62].mxu0  ;;  %v4439_v42 = vld [vmem:[%s10791_s8 + $0x18] sm:$0xff] }
 0x667   :  { %6599 = vmatprep.mubr.msk.f32.mxu1 %vm2838_vm9, %v6050_v35  ;;  %7221 = vmatpush1.bf16.msra.mxu1 %v7220_v2  ;;  %v10064_v26 = vpop.f32.mrb[63].mxu0  ;;  %v7350_v2 = vpack.c.bf16 %v4439_v42, %v4438_v21  ;;  %v4440_v35 = vld [vmem:[%s10791_s8 + $0x20] sm:$0xff]  ;;  %v6129_v21 = vld [vmem:[%s10790_s6 + $0x338] sm:$0xff] }
 0x668   :  { %7223 = vmatprep.subr.bf16.mxu1 %v7222_v39  ;;  %v4441_v39 = vld [vmem:[%s10791_s8 + $0x28] sm:$0xff] }
 0x669   :  { %7351 = vmatpush1.bf16.msra.mxu0 %v7350_v2  ;;  %v7353_v48 = vpack.c.bf16 %v4441_v39, %v4440_v35  ;;  %v7278_v35 = vpack.c.bf16 %v6131_v33, %v6129_v21  ;;  %v6128_v39 = vld [vmem:[%s10790_s6 + $0x330] sm:$0xff]  ;;  %v6181_v21 = vld [vmem:[%s10790_s6 + $0x418] sm:$0xff] }
 0x66a   :  { %6600 = vmatmul.mubr.msk.f32.gmra.mrb[180].mxu1 %vm2838_vm9, %v6051_v31  ;;  %7352 = vmatprep.subr.bf16.mxu0 %v7797_v28  ;;  %v4444_v31 = vld [vmem:[%s10791_s8 + $0x40] sm:$0xff] }
 0x66b   :  { %6602 = vmatprep.mubr.msk.f32.mxu1 %vm2838_vm9, %v6052_v47  ;;  %7225 = vmatpush1.bf16.msra.mxu1 %v7224_v22  ;;  %v4445_v22 = vld [vmem:[%s10791_s8 + $0x48] sm:$0xff] }
 0x66c   :  { %7227 = vmatprep.subr.bf16.mxu1 %v7226_v9  ;;  %v7359_v47 = vpack.c.bf16 %v4445_v22, %v4444_v31  ;;  %v4446_v9 = vld [vmem:[%s10791_s8 + $0x50] sm:$0xff] }
 0x66d   :  { %7354 = vmatpush1.bf16.msra.mxu0 %v7353_v48  ;;  %v7362_v46 = vpack.c.bf16 %v4447_v45, %v4446_v9  ;;  %v6130_v48 = vld [vmem:[%s10790_s6 + $0x340] sm:$0xff] }
 0x66e   :  { %6603 = vmatmul.mubr.msk.f32.gmra.mrb[182].mxu1 %vm2838_vm9, %v6053_v59  ;;  %7355 = vmatprep.subr.bf16.mxu0 %v7797_v28  ;;  %v7365_v59 = vpack.c.bf16 %v4449_v4, %v4448_v11  ;;  %v7280_v31 = vpack.c.bf16 %v6130_v48, %v6128_v39  ;;  %v6134_v9 = vld [vmem:[%s10790_s6 + $0x360] sm:$0xff]  ;;  %v6137_v11 = vld [vmem:[%s10790_s6 + $0x378] sm:$0xff]  ;;  %v6139_v4 = vld [vmem:[%s10790_s6 + $0x388] sm:$0xff] }
 0x66f   :  { %7229 = vmatpush1.bf16.msra.mxu1 %v7228_v32  ;;  %3699 = vmatprep.mubr.f32.mxu1 %v7795_v3  ;;  %v4450_v32 = vld [vmem:[%s10791_s8 + $0x70] sm:$0xff]  ;;  %v6183_v39 = vld [vmem:[%s10790_s6 + $0x428] sm:$0xff] }
 0x670   :  { %7231 = vmatprep.subr.bf16.mxu1 %v7230_v62  ;;  %v4451_v62 = vld [vmem:[%s10791_s8 + $0x78] sm:$0xff] }
 0x671   :  { %7357 = vmatpush1.bf16.msra.mxu0 %v7356_v63  ;;  %v7368_v54 = vpack.c.bf16 %v4451_v62, %v4450_v32  ;;  %v6135_v63 = vld [vmem:[%s10790_s6 + $0x368] sm:$0xff]  ;;  %v7286_v32 = vpack.c.bf16 %v6139_v4, %v6137_v11  ;;  %v6136_v62 = vld [vmem:[%s10790_s6 + $0x370] sm:$0xff] }
 0x672   :  { %7358 = vmatprep.subr.bf16.mxu0 %v7797_v28  ;;  %v7282_v22 = vpack.c.bf16 %v6135_v63, %v6133_v1  ;;  %v6182_v1 = vld [vmem:[%s10790_s6 + $0x420] sm:$0xff]  ;;  %v6184_v63 = vld [vmem:[%s10790_s6 + $0x430] sm:$0xff] }
 0x673   :  { %7233 = vmatpush1.bf16.msra.mxu1 %v7232_v20  ;;  %v6118_v20 = vld [vmem:[%s10790_s6 + $0x2e0] sm:$0xff] }
 0x674   :  { %7235 = vmatprep.subr.bf16.mxu1 %v7234_v23  ;;  %v6121_v23 = vld [vmem:[%s10790_s6 + $0x2f8] sm:$0xff]  ;;  %v7268_v34 = vpack.c.bf16 %v6118_v20, %v6116_v60  ;;  %v7290_v20 = vpack.c.bf16 %v6143_v7, %v6141_v44  ;;  %v6194_v7 = vld [vmem:[%s10790_s6 + $0x480] sm:$0xff] }
 0x675   :  { %7360 = vmatpush1.bf16.msra.mxu0 %v7359_v47  ;;  %v6132_v47 = vld [vmem:[%s10790_s6 + $0x350] sm:$0xff] }
 0x676   :  { %7361 = vmatprep.subr.bf16.mxu0 %v7797_v28 }
 0x677   :  { %7237 = vmatpush1.bf16.msra.mxu1 %v7236_v58  ;;  %v7270_v58 = vpack.c.bf16 %v6123_v41, %v6121_v23  ;;  %v6140_v23 = vld [vmem:[%s10790_s6 + $0x390] sm:$0xff]  ;;  %v6142_v41 = vld [vmem:[%s10790_s6 + $0x3a0] sm:$0xff] }
 0x678   :  { %7239 = vmatprep.subr.bf16.mxu1 %v7238_v61  ;;  %v6120_v61 = vld [vmem:[%s10790_s6 + $0x2f0] sm:$0xff] }
 0x679   :  { %7363 = vmatpush1.bf16.msra.mxu0 %v7362_v46 }
 0x67a   :  { %7364 = vmatprep.subr.bf16.mxu0 %v7797_v28 }
 0x67b   :  { %7241 = vmatpush1.bf16.msra.mxu1 %v7240_v13  ;;  %v6125_v13 = vld [vmem:[%s10790_s6 + $0x318] sm:$0xff] }
 0x67c   :  { %3663 = vmatprep.subr.mxu1 %v6091_v24  ;;  %v6127_v24 = vld [vmem:[%s10790_s6 + $0x328] sm:$0xff] }
 0x67d   :  { %7366 = vmatpush1.bf16.msra.mxu0 %v7365_v59  ;;  %v7274_v30 = vpack.c.bf16 %v6127_v24, %v6125_v13  ;;  %v7284_v59 = vpack.c.bf16 %v6134_v9, %v6132_v47  ;;  %v6172_v13 = vld [vmem:[%s10790_s6 + $0x3d0] sm:$0xff]  ;;  %v6175_v24 = vld [vmem:[%s10790_s6 + $0x3e8] sm:$0xff]  ;;  %v6186_v9 = vld [vmem:[%s10790_s6 + $0x440] sm:$0xff] }
 0x67e   :  { %7367 = vmatprep.subr.bf16.mxu0 %v7797_v28 }
 0x67f   :  { %3664 = vmatpush1.msra.mxu1 %v6090_v25  ;;  %v7272_v25 = vpack.c.bf16 %v6122_v49, %v6120_v61  ;;  %v6144_v61 = vld [vmem:[%s10790_s6 + $0x3b0] sm:$0xff] }
 0x680   :  { %7267 = vmatprep.subr.bf16.mxu1 %v7266_v53  ;;  %v6124_v53 = vld [vmem:[%s10790_s6 + $0x310] sm:$0xff] }
 0x681   :  { %7369 = vmatpush1.bf16.msra.mxu0 %v7368_v54  ;;  %v7276_v42 = vpack.c.bf16 %v6126_v36, %v6124_v53  ;;  %v6138_v54 = vld [vmem:[%s10790_s6 + $0x380] sm:$0xff]  ;;  %v6176_v36 = vld [vmem:[%s10790_s6 + $0x3f0] sm:$0xff] }
 0x682   :  { %7370 = vmatprep.subr.bf16.mxu0 %v7797_v28  ;;  %v7288_v60 = vpack.c.bf16 %v6138_v54, %v6136_v62  ;;  %v6174_v53 = vld [vmem:[%s10790_s6 + $0x3e0] sm:$0xff]  ;;  %v6195_v62 = vld [vmem:[%s10790_s6 + $0x488] sm:$0xff] }
 0x683   :  { %v7324_v33 = vpack.c.bf16 %v6176_v36, %v6174_v53  ;;  %v6222_v53 = vld [vmem:[%s10791_s8 + $0xd0] sm:$0xff]  ;;  %v6223_v36 = vld [vmem:[%s10791_s8 + $0xd8] sm:$0xff] }
 0x685   :  { %7372 = vmatpush1.bf16.msra.mxu0 %v7371_v50  ;;  %v7292_v50 = vpack.c.bf16 %v6142_v41, %v6140_v23 }
 0x686   :  { %7373 = vmatprep.subr.bf16.mxu0 %v7797_v28 }
 0x735   :  { %v6595_v37 = vpop.f32.mrb[176].mxu1 }
 0x736   :  { %v3541_v17 = vpop.f32.mrb[177].mxu1 }
 0x737   :  { %6092 = vmatmul.mubr.msk.f32.vlgmr.msra.gmra.mrb[160].mxu1 %vm3167_vm10, %v3541_v17  ;;  %v6170_v17 = vld [vmem:[%s10790_s6 + $0x3c0] sm:$0xff] }
 0x738   :  { %3705 = vmatprep.mubr.f32.mxu1 %v7795_v3  ;;  %7269 = vmatpush1.bf16.msra.mxu1 %v7268_v34  ;;  %v6145_v34 = vld [vmem:[%s10790_s6 + $0x3b8] sm:$0xff] }
 0x739   :  { %v6598_v38 = vpop.f32.mrb[178].mxu1  ;;  %7271 = vmatprep.subr.bf16.mxu1 %v7270_v58  ;;  %v6173_v58 = vld [vmem:[%s10790_s6 + $0x3d8] sm:$0xff] }
 0x73a   :  { %v3551_v57 = vpop.f32.mrb[179].mxu1 }
 0x73b   :  { %6093 = vmatmul.mubr.msk.f32.gmra.mrb[162].mxu1 %vm3167_vm10, %v6595_v37  ;;  %v6171_v37 = vld [vmem:[%s10790_s6 + $0x3c8] sm:$0xff] }
 0x73c   :  { %3711 = vmatprep.mubr.f32.mxu1 %v7795_v3  ;;  %7273 = vmatpush1.bf16.msra.mxu1 %v7272_v25  ;;  %v7318_v49 = vpack.c.bf16 %v6173_v58, %v6171_v37  ;;  %v6177_v25 = vld [vmem:[%s10790_s6 + $0x3f8] sm:$0xff] }
 0x73d   :  { %7275 = vmatprep.subr.bf16.mxu1 %v7274_v30  ;;  %v6601_v2 = vpop.f32.mrb[180].mxu1  ;;  %v7322_v30 = vpack.c.bf16 %v6177_v25, %v6175_v24 }
 0x73e   :  { %v3561_v14 = vpop.f32.mrb[181].mxu1 }
 0x73f   :  { %6094 = vmatmul.mubr.msk.f32.gmra.mrb[164].mxu1 %vm3167_vm10, %v3551_v57  ;;  %v6179_v57 = vld [vmem:[%s10790_s6 + $0x408] sm:$0xff] }
 0x740   :  { %3717 = vmatprep.mubr.f32.mxu1 %v7795_v3  ;;  %7277 = vmatpush1.bf16.msra.mxu1 %v7276_v42  ;;  %v7326_v42 = vpack.c.bf16 %v6181_v21, %v6179_v57 }
 0x741   :  { %7279 = vmatprep.subr.bf16.mxu1 %v7278_v35  ;;  %v6604_v45 = vpop.f32.mrb[182].mxu1  ;;  %v6180_v35 = vld [vmem:[%s10790_s6 + $0x410] sm:$0xff] }
 0x742   :  { %v3571_v46 = vpop.f32.mrb[183].mxu1 }
 0x743   :  { %6095 = vmatmul.mubr.msk.f32.gmra.mrb[166].mxu1 %vm3167_vm10, %v6598_v38  ;;  %v7320_v38 = vpack.c.bf16 %v6172_v13, %v6170_v17  ;;  %v6221_v17 = vld [vmem:[%s10791_s8 + $0xc8] sm:$0xff] }
 0x744   :  { %3723 = vmatprep.mubr.f32.mxu1 %v7795_v3  ;;  %7281 = vmatpush1.bf16.msra.mxu1 %v7280_v31  ;;  %v6187_v31 = vld [vmem:[%s10790_s6 + $0x448] sm:$0xff] }
 0x745   :  { %7283 = vmatprep.subr.bf16.mxu1 %v7282_v22  ;;  %v7332_v22 = vpack.c.bf16 %v6184_v63, %v6182_v1 }
 0x747   :  { %6096 = vmatmul.mubr.msk.f32.gmra.mrb[168].mxu1 %vm3167_vm10, %v3561_v14 }
 0x748   :  { %3729 = vmatprep.mubr.f32.mxu1 %v7795_v3  ;;  %7285 = vmatpush1.bf16.msra.mxu1 %v7284_v59  ;;  %v6190_v59 = vld [vmem:[%s10790_s6 + $0x460] sm:$0xff] }
 0x749   :  { %7287 = vmatprep.subr.bf16.mxu1 %v7286_v32  ;;  %v6192_v32 = vld [vmem:[%s10790_s6 + $0x470] sm:$0xff] }
 0x74a   :  { %v7340_v54 = vpack.c.bf16 %v6192_v32, %v6190_v59 }
 0x74b   :  { %6097 = vmatmul.mubr.msk.f32.gmra.mrb[170].mxu1 %vm3167_vm10, %v6601_v2  ;;  %v6178_v2 = vld [vmem:[%s10790_s6 + $0x400] sm:$0xff] }
 0x74c   :  { %3735 = vmatprep.mubr.f32.mxu1 %v7795_v3  ;;  %7289 = vmatpush1.bf16.msra.mxu1 %v7288_v60  ;;  %v7328_v48 = vpack.c.bf16 %v6180_v35, %v6178_v2  ;;  %v6196_v60 = vld [vmem:[%s10790_s6 + $0x490] sm:$0xff]  ;;  %v6224_v35 = vld [vmem:[%s10791_s8 + $0xe0] sm:$0xff] }
 0x74d   :  { %7291 = vmatprep.subr.bf16.mxu1 %v7290_v20  ;;  %v6199_v20 = vld [vmem:[%s10790_s6 + $0x4a8] sm:$0xff] }
 0x74f   :  { %6098 = vmatmul.mubr.msk.f32.gmra.mrb[172].mxu1 %vm3167_vm10, %v3571_v46  ;;  %v6191_v46 = vld [vmem:[%s10790_s6 + $0x468] sm:$0xff] }
 0x750   :  { %3741 = vmatprep.mubr.f32.mxu1 %v7795_v3  ;;  %7293 = vmatpush1.bf16.msra.mxu1 %v7292_v50 }
 0x751   :  { %3985 = vmatprep.subr.mxu1 %v6145_v34 }
 0x753   :  { %6099 = vmatmul.mubr.msk.f32.gmra.mrb[174].mxu1 %vm3167_vm10, %v6604_v45  ;;  %v6188_v45 = vld [vmem:[%s10790_s6 + $0x450] sm:$0xff] }
 0x754   :  { %3986 = vmatpush1.msra.mxu1 %v6144_v61  ;;  %4021 = vmatprep.mubr.f32.mxu1 %v7795_v3  ;;  %v7336_v11 = vpack.c.bf16 %v6188_v45, %v6186_v9 }
 0x755   :  { %7319 = vmatprep.subr.bf16.mxu1 %v7318_v49  ;;  %v6220_v49 = vld [vmem:[%s10791_s8 + $0xc0] sm:$0xff] }
 0x757   :  { %6146 = vmatmul.mubr.msk.f32.vlgmr.msra.gmra.mrb[160].mxu1 %vm3167_vm10, %v10036_v27  ;;  %v6185_v27 = vld [vmem:[%s10790_s6 + $0x438] sm:$0xff] }
 0x758   :  { %4027 = vmatprep.mubr.f32.mxu1 %v7795_v3  ;;  %7321 = vmatpush1.bf16.msra.mxu1 %v7320_v38  ;;  %v7330_v14 = vpack.c.bf16 %v6185_v27, %v6183_v39  ;;  %v7383_v38 = vpack.c.bf16 %v6221_v17, %v6220_v49  ;;  %v6225_v39 = vld [vmem:[%s10791_s8 + $0xe8] sm:$0xff] }
 0x759   :  { %7323 = vmatprep.subr.bf16.mxu1 %v7322_v30  ;;  %v7389_v1 = vpack.c.bf16 %v6225_v39, %v6224_v35 }
 0x75b   :  { %6147 = vmatmul.mubr.msk.f32.gmra.mrb[162].mxu1 %vm3167_vm10, %v10034_v0  ;;  %v6189_v0 = vld [vmem:[%s10790_s6 + $0x458] sm:$0xff] }
 0x75c   :  { %4033 = vmatprep.mubr.f32.mxu1 %v7795_v3  ;;  %7325 = vmatpush1.bf16.msra.mxu1 %v7324_v33  ;;  %v7334_v47 = vpack.c.bf16 %v6189_v0, %v6187_v31  ;;  %v6226_v31 = vld [vmem:[%s10791_s8 + $0xf0] sm:$0xff]  ;;  %v6227_v0 = vld [vmem:[%s10791_s8 + $0xf8] sm:$0xff] }
 0x75d   :  { %7327 = vmatprep.subr.bf16.mxu1 %v7326_v42  ;;  %v7386_v42 = vpack.c.bf16 %v6223_v36, %v6222_v53  ;;  %v7392_v45 = vpack.c.bf16 %v6227_v0, %v6226_v31 }
 0x75f   :  { %6148 = vmatmul.mubr.msk.f32.gmra.mrb[164].mxu1 %vm3167_vm10, %v10040_v55  ;;  %v6193_v55 = vld [vmem:[%s10790_s6 + $0x478] sm:$0xff] }
 0x760   :  { %4039 = vmatprep.mubr.f32.mxu1 %v7795_v3  ;;  %7329 = vmatpush1.bf16.msra.mxu1 %v7328_v48  ;;  %v7338_v4 = vpack.c.bf16 %v6193_v55, %v6191_v46  ;;  %v6228_v55 = vld [vmem:[%s10791_s8 + $0x100] sm:$0xff] }
 0x761   :  { %7331 = vmatprep.subr.bf16.mxu1 %v7330_v14 }
 0x763   :  { %6149 = vmatmul.mubr.msk.f32.gmra.mrb[166].mxu1 %vm3167_vm10, %v10038_v6  ;;  %v6197_v6 = vld [vmem:[%s10790_s6 + $0x498] sm:$0xff] }
 0x764   :  { %4045 = vmatprep.mubr.f32.mxu1 %v7795_v3  ;;  %7333 = vmatpush1.bf16.msra.mxu1 %v7332_v22  ;;  %v7342_v44 = vpack.c.bf16 %v6197_v6, %v6195_v62 }
 0x765   :  { %7335 = vmatprep.subr.bf16.mxu1 %v7334_v47 }
 0x767   :  { %6150 = vmatmul.mubr.msk.f32.gmra.mrb[168].mxu1 %vm3167_vm10, %v10044_v18  ;;  %v7344_v18 = vpack.c.bf16 %v6196_v60, %v6194_v7 }
 0x768   :  { %4051 = vmatprep.mubr.f32.mxu1 %v7795_v3  ;;  %7337 = vmatpush1.bf16.msra.mxu1 %v7336_v11  ;;  %v6229_v11 = vld [vmem:[%s10791_s8 + $0x108] sm:$0xff] }
 0x769   :  { %7339 = vmatprep.subr.bf16.mxu1 %v7338_v4  ;;  %v7395_v62 = vpack.c.bf16 %v6229_v11, %v6228_v55 }
 0x76b   :  { %6151 = vmatmul.mubr.msk.f32.gmra.mrb[170].mxu1 %vm3167_vm10, %v10042_v51  ;;  %v6198_v51 = vld [vmem:[%s10790_s6 + $0x4a0] sm:$0xff] }
 0x76c   :  { %4057 = vmatprep.mubr.f32.mxu1 %v7795_v3  ;;  %7341 = vmatpush1.bf16.msra.mxu1 %v7340_v54  ;;  %v6230_v54 = vld [vmem:[%s10791_s8 + $0x110] sm:$0xff] }
 0x76d   :  { %7343 = vmatprep.subr.bf16.mxu1 %v7342_v44  ;;  %v6231_v44 = vld [vmem:[%s10791_s8 + $0x118] sm:$0xff] }
 0x76f   :  { %6152 = vmatmul.mubr.msk.f32.gmra.mrb[172].mxu1 %vm3167_vm10, %v10048_v52  ;;  %v4455_v52 = vld [vmem:[%s10791_s8 + $0x98] sm:$0xff] }
 0x770   :  { %4063 = vmatprep.mubr.f32.mxu1 %v7795_v3  ;;  %7345 = vmatpush1.bf16.msra.mxu1 %v7344_v18 }
 0x771   :  { %4307 = vmatprep.subr.mxu1 %v6199_v20  ;;  %v7398_v20 = vpack.c.bf16 %v6231_v44, %v6230_v54  ;;  %v6249_v54 = vld [vmem:[%s10793_s9 + $0x28] sm:$0xff]  ;;  %v6250_v44 = vld [vmem:[%s10793_s9 + $0x30] sm:$0xff] }
 0x773   :  { %6153 = vmatmul.mubr.msk.f32.gmra.mrb[174].mxu1 %vm3167_vm10, %v10046_v43  ;;  %v4454_v43 = vld [vmem:[%s10791_s8 + $0x90] sm:$0xff] }
 0x774   :  { %4308 = vmatpush1.msra.mxu1 %v6198_v51  ;;  %4343 = vmatprep.mubr.f32.mxu1 %v7795_v3 }
 0x777   :  { %6200 = vmatmul.mubr.msk.f32.vlgmr.msra.gmra.mrb[160].mxu1 %vm3167_vm10, %v10052_v5  ;;  %v4408_v5 = vld [vmem:[%s10792_s7] sm:$0x3] }
 0x778   :  { %4349 = vmatprep.mubr.f32.mxu1 %v7795_v3 }
 0x77b   :  { %6201 = vmatmul.mubr.msk.f32.gmra.mrb[162].mxu1 %vm3167_vm10, %v10050_v8  ;;  %v7374_v8 = vpack.c.bf16 %v4455_v52, %v4454_v43  ;;  %v6232_v43 = vld [vmem:[%s10791_s8 + $0x120] sm:$0xff]  ;;  %v6233_v52 = vld [vmem:[%s10791_s8 + $0x128] sm:$0xff] }
 0x77c   :  { %4355 = vmatprep.mubr.f32.mxu1 %v7795_v3 }
 0x77d   :  { %7375 = vmatpush1.bf16.msra.mxu0 %v7374_v8  ;;  %v7401_v8 = vpack.c.bf16 %v6233_v52, %v6232_v43 }
 0x77e   :  { %7376 = vmatprep.subr.bf16.mxu0 %v7797_v28 }
 0x77f   :  { %6202 = vmatmul.mubr.msk.f32.gmra.mrb[164].mxu1 %vm3167_vm10, %v10056_v40  ;;  %v10382_v40 = vrot.slane %v4408_v5, %v1850_v16  ;;  %v6219_v16 = vld [vmem:[%s10791_s8 + $0xb8] sm:$0xff] }
 0x780   :  { %4361 = vmatprep.mubr.f32.mxu1 %v7795_v3  ;;  %v7380_v58 = vpack.c.bf16 %v6219_v16, %v6218_v12 }
 0x783   :  { %6203 = vmatmul.mubr.msk.f32.gmra.mrb[166].mxu1 %vm3167_vm10, %v10054_v29  ;;  %v10378_v29 = vrot.slane %v4408_v5, %v1854_v15  ;;  %v6234_v5 = vld [vmem:[%s10791_s8 + $0x130] sm:$0xff] }
 0x784   :  { %4367 = vmatprep.mubr.f32.mxu1 %v7795_v3 }
 0x787   :  { %6204 = vmatmul.mubr.msk.f32.gmra.mrb[168].mxu1 %vm3167_vm10, %v10060_v56  ;;  %v6217_v56 = vld [vmem:[%s10791_s8 + $0xa8] sm:$0xff] }
 0x788   :  { %4373 = vmatprep.mubr.f32.mxu1 %v7795_v3 }
 0x78b   :  { %6205 = vmatmul.mubr.msk.f32.gmra.mrb[170].mxu1 %vm3167_vm10, %v10058_v19  ;;  %v6216_v19 = vld [vmem:[%s10791_s8 + $0xa0] sm:$0xff] }
 0x78c   :  { %4379 = vmatprep.mubr.f32.mxu1 %v7795_v3  ;;  %v7377_v15 = vpack.c.bf16 %v6217_v56, %v6216_v19  ;;  %v4720_v19 = vld [vmem:[%s10793_s9] sm:$0xff] }
 0x78f   :  { %6206 = vmatmul.mubr.msk.f32.gmra.mrb[172].mxu1 %vm3167_vm10, %v10064_v26 }
 0x790   :  { %4385 = vmatprep.mubr.f32.mxu1 %v7795_v3 }
 0x793   :  { %6207 = vmatmul.mubr.msk.f32.gmra.mrb[174].mxu1 %vm3167_vm10, %v10062_v10 }
 0x794   :  { %6693 = vmatprep.mubr.msk.f32.mxu1 %vm2458_vm8, %v4720_v19 }
 0x84a   :  { %v4345_v10 = vpop.f32.mrb[160].mxu1 }
 0x84b   :  { %v4347_v26 = vpop.f32.mrb[161].mxu1  ;;  %v10394_v41 = vadd.f32 %v10382_v40, %v4345_v10 }
 0x84c   :  { %v10391_v23 = vadd.f32 %v10378_v29, %v4347_v26 }
 0x84e   :  { %v4351_v50 = vpop.f32.mrb[162].mxu1  ;;  %6208 = vmatprep.mubr.msk.f32.mxu0 %vm4456_vm11, %v10391_v23 }
 0x84f   :  { %v4353_v34 = vpop.f32.mrb[163].mxu1  ;;  %4546 = vmatmul.mubr.f32.vlgmr.msra.gmra.mrb[64].mxu0 %v10394_v41  ;;  %v10409_v61 = vadd.f32 %v10382_v40, %v4351_v50 }
 0x850   :  { %v10406_v37 = vadd.f32 %v10378_v29, %v4353_v34  ;;  %7378 = vmatpush1.bf16.msra.mxu0 %v7377_v15 }
 0x851   :  { %7379 = vmatprep.subr.bf16.mxu0 %v7797_v28 }
 0x852   :  { %v4357_v13 = vpop.f32.mrb[164].mxu1  ;;  %6209 = vmatprep.mubr.msk.f32.mxu0 %vm4456_vm11, %v10406_v37 }
 0x853   :  { %v4359_v24 = vpop.f32.mrb[165].mxu1  ;;  %4551 = vmatmul.mubr.f32.gmra.mrb[66].mxu0 %v10409_v61  ;;  %v10425_v30 = vadd.f32 %v10382_v40, %v4357_v13 }
 0x854   :  { %v10422_v25 = vadd.f32 %v10378_v29, %v4359_v24  ;;  %7381 = vmatpush1.bf16.msra.mxu0 %v7380_v58 }
 0x855   :  { %7382 = vmatprep.subr.bf16.mxu0 %v7797_v28 }
 0x856   :  { %v4363_v57 = vpop.f32.mrb[166].mxu1  ;;  %6210 = vmatprep.mubr.msk.f32.mxu0 %vm4456_vm11, %v10422_v25 }
 0x857   :  { %v4365_v21 = vpop.f32.mrb[167].mxu1  ;;  %4556 = vmatmul.mubr.f32.gmra.mrb[68].mxu0 %v10425_v30  ;;  %v10441_v2 = vadd.f32 %v10382_v40, %v4363_v57 }
 0x858   :  { %v10438_v33 = vadd.f32 %v10378_v29, %v4365_v21  ;;  %7384 = vmatpush1.bf16.msra.mxu0 %v7383_v38 }
 0x859   :  { %7385 = vmatprep.subr.bf16.mxu0 %v7797_v28 }
 0x85a   :  { %v4369_v27 = vpop.f32.mrb[168].mxu1  ;;  %6211 = vmatprep.mubr.msk.f32.mxu0 %vm4456_vm11, %v10438_v33 }
 0x85b   :  { %v4371_v48 = vpop.f32.mrb[169].mxu1  ;;  %4561 = vmatmul.mubr.f32.gmra.mrb[70].mxu0 %v10441_v2  ;;  %v4428_v63 = vadd.f32 %v10382_v40, %v4369_v27 }
 0x85c   :  { %v4429_v14 = vadd.f32 %v10378_v29, %v4371_v48  ;;  %7387 = vmatpush1.bf16.msra.mxu0 %v7386_v42 }
 0x85d   :  { %7388 = vmatprep.subr.bf16.mxu0 %v7797_v28 }
 0x85e   :  { %v4375_v22 = vpop.f32.mrb[170].mxu1  ;;  %6212 = vmatprep.mubr.msk.f32.mxu0 %vm4456_vm11, %v4429_v14 }
 0x85f   :  { %v4377_v47 = vpop.f32.mrb[171].mxu1  ;;  %4566 = vmatmul.mubr.f32.gmra.mrb[72].mxu0 %v4428_v63  ;;  %v4430_v46 = vadd.f32 %v10382_v40, %v4375_v22 }
 0x860   :  { %v4431_v9 = vadd.f32 %v10378_v29, %v4377_v47  ;;  %7390 = vmatpush1.bf16.msra.mxu0 %v7389_v1 }
 0x861   :  { %7391 = vmatprep.subr.bf16.mxu0 %v7797_v28 }
 0x862   :  { %v4381_v4 = vpop.f32.mrb[172].mxu1  ;;  %6213 = vmatprep.mubr.msk.f32.mxu0 %vm4456_vm11, %v4431_v9 }
 0x863   :  { %v4383_v59 = vpop.f32.mrb[173].mxu1  ;;  %4571 = vmatmul.mubr.f32.gmra.mrb[74].mxu0 %v4430_v46  ;;  %v4432_v6 = vadd.f32 %v10382_v40, %v4381_v4 }
 0x864   :  { %v4433_v32 = vadd.f32 %v10378_v29, %v4383_v59  ;;  %7393 = vmatpush1.bf16.msra.mxu0 %v7392_v45  ;;  %v4721_v59 = vld [vmem:[%s10793_s9 + $0x8] sm:$0xff] }
 0x865   :  { %7394 = vmatprep.subr.bf16.mxu0 %v7797_v28 }
 0x866   :  { %v4387_v7 = vpop.f32.mrb[174].mxu1  ;;  %6214 = vmatprep.mubr.msk.f32.mxu0 %vm4456_vm11, %v4433_v32 }
 0x867   :  { %v4389_v60 = vpop.f32.mrb[175].mxu1  ;;  %4576 = vmatmul.mubr.f32.gmra.mrb[76].mxu0 %v4432_v6  ;;  %v4434_v51 = vadd.f32 %v10382_v40, %v4387_v7  ;;  %v6251_v7 = vld [vmem:[%s10793_s9 + $0x38] sm:$0xff] }
 0x868   :  { %v4435_v18 = vadd.f32 %v10378_v29, %v4389_v60  ;;  %7396 = vmatpush1.bf16.msra.mxu0 %v7395_v62  ;;  %v6235_v29 = vld [vmem:[%s10791_s8 + $0x138] sm:$0xff] }
 0x869   :  { %7397 = vmatprep.subr.bf16.mxu0 %v7797_v28  ;;  %v7404_v40 = vpack.c.bf16 %v6235_v29, %v6234_v5  ;;  %v4723_v62 = vld [vmem:[%s10793_s9 + $0x18] sm:$0xff] }
 0x86a   :  { %6215 = vmatprep.mubr.msk.f32.mxu0 %vm4456_vm11, %v4435_v18 }
 0x86b   :  { %4581 = vmatmul.mubr.f32.gmra.mrb[78].mxu0 %v4434_v51 }
 0x86c   :  { %7399 = vmatpush1.bf16.msra.mxu0 %v7398_v20  ;;  %6236 = vmatprep.mubr.msk.f32.mxu0 %vm4456_vm11, %v10391_v23 }
 0x86d   :  { %7400 = vmatprep.subr.bf16.mxu0 %v7797_v28 }
 0x870   :  { %7402 = vmatpush1.bf16.msra.mxu0 %v7401_v8 }
 0x871   :  { %7403 = vmatprep.subr.bf16.mxu0 %v7797_v28 }
 0x874   :  { %7405 = vmatpush1.bf16.msra.mxu0 %v7404_v40 }
 0x875   :  { %7444 = vmatprep.subr.bf16.mxu0 %v7797_v28 }
 0x877   :  { %4672 = vmatmul.mubr.f32.vlgmr.msra.gmra.mrb[80].mxu0 %v10394_v41 }
 0x878   :  { %6237 = vmatprep.mubr.msk.f32.mxu0 %vm4456_vm11, %v10406_v37 }
 0x87b   :  { %4677 = vmatmul.mubr.f32.gmra.mrb[82].mxu0 %v10409_v61 }
 0x87c   :  { %6238 = vmatprep.mubr.msk.f32.mxu0 %vm4456_vm11, %v10422_v25 }
 0x87f   :  { %4682 = vmatmul.mubr.f32.gmra.mrb[84].mxu0 %v10425_v30 }
 0x880   :  { %6239 = vmatprep.mubr.msk.f32.mxu0 %vm4456_vm11, %v10438_v33 }
 0x883   :  { %4687 = vmatmul.mubr.f32.gmra.mrb[86].mxu0 %v10441_v2 }
 0x884   :  { %6240 = vmatprep.mubr.msk.f32.mxu0 %vm4456_vm11, %v4429_v14 }
 0x887   :  { %4692 = vmatmul.mubr.f32.gmra.mrb[88].mxu0 %v4428_v63 }
 0x888   :  { %6241 = vmatprep.mubr.msk.f32.mxu0 %vm4456_vm11, %v4431_v9 }
 0x88b   :  { %4697 = vmatmul.mubr.f32.gmra.mrb[90].mxu0 %v4430_v46 }
 0x88c   :  { %6242 = vmatprep.mubr.msk.f32.mxu0 %vm4456_vm11, %v4433_v32  ;;  %v4722_v32 = vld [vmem:[%s10793_s9 + $0x10] sm:$0xff] }
 0x88f   :  { %4702 = vmatmul.mubr.f32.gmra.mrb[92].mxu0 %v4432_v6  ;;  %v6248_v6 = vld [vmem:[%s10793_s9 + $0x20] sm:$0xff] }
 0x890   :  { %6243 = vmatprep.mubr.msk.f32.mxu0 %vm4456_vm11, %v4435_v18 }
 0x893   :  { %4707 = vmatmul.mubr.f32.gmra.mrb[94].mxu0 %v4434_v51 }
 0x894   :  { %6740 = vmatprep.mubr.msk.f32.mxu0 %vm7798_vm12, %v7795_v3 }
 0x922   :  { %v4547_v56 = vpop.f32.mrb[64].mxu0 }
 0x923   :  { %v4549_v10 = vpop.f32.mrb[65].mxu0 }
 0x926   :  { %v4552_v26 = vpop.f32.mrb[66].mxu0 }
 0x927   :  { %v4554_v23 = vpop.f32.mrb[67].mxu0 }
 0x92a   :  { %v4557_v15 = vpop.f32.mrb[68].mxu0 }
 0x92b   :  { %v4559_v41 = vpop.f32.mrb[69].mxu0 }
 0x92e   :  { %v4562_v12 = vpop.f32.mrb[70].mxu0 }
 0x92f   :  { %v4564_v16 = vpop.f32.mrb[71].mxu0 }
 0x930   :  { %v6260_v16 = vld [vmem:[%s10794_s11 + $0x58] sm:$0xff] }
 0x932   :  { %v4567_v50 = vpop.f32.mrb[72].mxu0 }
 0x933   :  { %v4569_v34 = vpop.f32.mrb[73].mxu0 }
 0x934   :  { %v6257_v34 = vld [vmem:[%s10795_s10 + $0x8] sm:$0xff] }
 0x936   :  { %v4572_v37 = vpop.f32.mrb[74].mxu0 }
 0x937   :  { %v4574_v58 = vpop.f32.mrb[75].mxu0 }
 0x93a   :  { %v4577_v61 = vpop.f32.mrb[76].mxu0 }
 0x93b   :  { %v4579_v49 = vpop.f32.mrb[77].mxu0 }
 0x93c   :  { %v6262_v49 = vld [vmem:[%s10794_s11 + $0x68] sm:$0xff] }
 0x93e   :  { %v4582_v17 = vpop.f32.mrb[78].mxu0 }
 0x93f   :  { %v4584_v13 = vpop.f32.mrb[79].mxu0 }
 0x940   :  { %v6263_v13 = vld [vmem:[%s10794_s11 + $0x70] sm:$0xff] }
 0x94a   :  { %v4673_v24 = vpop.f32.mrb[80].mxu0 }
 0x94b   :  { %v4712_v25 = vmax.f32 %v4547_v56, %v4673_v24  ;;  %v4675_v38 = vpop.f32.mrb[81].mxu0  ;;  %v6264_v24 = vld [vmem:[%s10794_s11 + $0x78] sm:$0xff] }
 0x94c   :  { %v6265_v38 = vld [vmem:[%s10794_s11 + $0x80] sm:$0xff] }
 0x94e   :  { %v4678_v30 = vpop.f32.mrb[82].mxu0 }
 0x94f   :  { %v4713_v53 = vmax.f32 %v4552_v26, %v4678_v30  ;;  %v4680_v36 = vpop.f32.mrb[83].mxu0  ;;  %v6266_v30 = vld [vmem:[%s10794_s11 + $0x88] sm:$0xff] }
 0x950   :  { %v6267_v36 = vld [vmem:[%s10794_s11 + $0x90] sm:$0xff] }
 0x951   :  { %v7406_v57 = vpack.c.bf16 %v4713_v53, %v4712_v25  ;;  %v7457_v25 = vpack.c.bf16 %v6264_v24, %v6263_v13  ;;  %v7460_v53 = vpack.c.bf16 %v6266_v30, %v6265_v38 }
 0x952   :  { %v4683_v21 = vpop.f32.mrb[84].mxu0 }
 0x953   :  { %v4714_v33 = vmax.f32 %v4557_v15, %v4683_v21  ;;  %v4685_v42 = vpop.f32.mrb[85].mxu0  ;;  %7407 = vmatprep.subr.bf16.mxu1 %v7406_v57 }
 0x954   :  { %7409 = vmatpush3.bf16.msra.mxu1 %v7406_v57  ;;  %v5006_v42 = vld [vmem:[%s10794_s11 + $0x8] sm:$0xff] }
 0x956   :  { %v4688_v2 = vpop.f32.mrb[86].mxu0 }
 0x957   :  { %v4715_v35 = vmax.f32 %v4562_v12, %v4688_v2  ;;  %v4690_v39 = vpop.f32.mrb[87].mxu0  ;;  %v6259_v12 = vld [vmem:[%s10794_s11 + $0x50] sm:$0xff] }
 0x958   :  { %v7451_v58 = vpack.c.bf16 %v6260_v16, %v6259_v12  ;;  %v5008_v39 = vld [vmem:[%s10794_s11 + $0x18] sm:$0xff]  ;;  %v6292_v16 = vld [vmem:[%s10794_s11 + $0x120] sm:$0xff] }
 0x959   :  { %v7410_v27 = vpack.c.bf16 %v4715_v35, %v4714_v33  ;;  %v5005_v33 = vld [vmem:[%s10794_s11] sm:$0xff]  ;;  %v5007_v35 = vld [vmem:[%s10794_s11 + $0x10] sm:$0xff] }
 0x95a   :  { %v4693_v48 = vpop.f32.mrb[88].mxu0  ;;  %v7466_v2 = vpack.c.bf16 %v5006_v42, %v5005_v33  ;;  %v5579_v42 = vld [vmem:[%s10796_s13 + $0x10] sm:$0xff] }
 0x95b   :  { %v4716_v14 = vmax.f32 %v4567_v50, %v4693_v48  ;;  %v4695_v1 = vpop.f32.mrb[89].mxu0  ;;  %7411 = vmatprep.subr.bf16.mxu1 %v7410_v27  ;;  %v5009_v48 = vld [vmem:[%s10794_s11 + $0x20] sm:$0xff] }
 0x95c   :  { %7413 = vmatpush3.bf16.msra.mxu1 %v7410_v27 }
 0x95e   :  { %v4698_v63 = vpop.f32.mrb[90].mxu0 }
 0x95f   :  { %v4717_v31 = vmax.f32 %v4572_v37, %v4698_v63  ;;  %v4700_v0 = vpop.f32.mrb[91].mxu0  ;;  %v4931_v37 = vld [vmem:[%s10795_s10] sm:$0xff]  ;;  %v5011_v63 = vld [vmem:[%s10794_s11 + $0x30] sm:$0xff] }
 0x961   :  { %v7414_v22 = vpack.c.bf16 %v4717_v31, %v4716_v14  ;;  %v5010_v14 = vld [vmem:[%s10794_s11 + $0x28] sm:$0xff]  ;;  %v5012_v31 = vld [vmem:[%s10794_s11 + $0x38] sm:$0xff] }
 0x962   :  { %v4703_v47 = vpop.f32.mrb[92].mxu0  ;;  %v7472_v1 = vpack.c.bf16 %v5010_v14, %v5009_v48  ;;  %v7475_v0 = vpack.c.bf16 %v5012_v31, %v5011_v63  ;;  %v5583_v14 = vld [vmem:[%s10796_s13 + $0x30] sm:$0x3] }
 0x963   :  { %v4718_v9 = vmax.f32 %v4577_v61, %v4703_v47  ;;  %v4705_v45 = vpop.f32.mrb[93].mxu0  ;;  %7415 = vmatprep.subr.bf16.mxu1 %v7414_v22  ;;  %v6261_v61 = vld [vmem:[%s10794_s11 + $0x60] sm:$0xff]  ;;  %v5014_v47 = vld [vmem:[%s10794_s11 + $0x48] sm:$0xff] }
 0x964   :  { %7417 = vmatpush3.bf16.msra.mxu1 %v7414_v22  ;;  %v6273_v45 = vld [vmem:[%s10794_s11 + $0xa0] sm:$0xff] }
 0x966   :  { %v4708_v46 = vpop.f32.mrb[94].mxu0 }
 0x967   :  { %v4719_v55 = vmax.f32 %v4582_v17, %v4708_v46  ;;  %v4710_v11 = vpop.f32.mrb[95].mxu0  ;;  %v7454_v17 = vpack.c.bf16 %v6262_v49, %v6261_v61  ;;  %v6274_v46 = vld [vmem:[%s10794_s11 + $0xa8] sm:$0xff] }
 0x969   :  { %v7418_v4 = vpack.c.bf16 %v4719_v55, %v4718_v9  ;;  %v7487_v55 = vpack.c.bf16 %v6274_v46, %v6273_v45 }
 0x96b   :  { %7419 = vmatprep.subr.bf16.mxu1 %v7418_v4 }
 0x96c   :  { %7421 = vmatpush3.bf16.msra.mxu1 %v7418_v4 }
 0x96d   :  { %7423 = vmatprep.subr.bf16.mxu1 %v7406_v57 }
 0x96f   :  { %6694 = vmatmul.mubr.msk.f32.vlgmr.msra.gmra.mrb[184].mxu1 %vm2458_vm8, %v4721_v59  ;;  %v6275_v59 = vld [vmem:[%s10794_s11 + $0xb0] sm:$0xff] }
 0x970   :  { %7425 = vmatpush3.bf16.msra.mxu1 %v7406_v57  ;;  %6696 = vmatprep.mubr.msk.f32.mxu1 %vm2458_vm8, %v4722_v32  ;;  %v6268_v57 = vld [vmem:[%s10794_s11 + $0x98] sm:$0xff] }
 0x971   :  { %7427 = vmatprep.subr.bf16.mxu1 %v7410_v27  ;;  %v7463_v21 = vpack.c.bf16 %v6268_v57, %v6267_v36  ;;  %v6276_v32 = vld [vmem:[%s10794_s11 + $0xb8] sm:$0xff]  ;;  %v5577_v57 = vld [vmem:[%s10796_s13] sm:$0xff] }
 0x973   :  { %6697 = vmatmul.mubr.msk.f32.gmra.mrb[186].mxu1 %vm2458_vm8, %v4723_v62 }
 0x974   :  { %7429 = vmatpush3.bf16.msra.mxu1 %v7410_v27  ;;  %6715 = vmatprep.mubr.msk.f32.mxu1 %vm2458_vm8, %v6248_v6  ;;  %v7469_v27 = vpack.c.bf16 %v5008_v39, %v5007_v35  ;;  %v5581_v39 = vld [vmem:[%s10796_s13 + $0x20] sm:$0xff] }
 0x975   :  { %7431 = vmatprep.subr.bf16.mxu1 %v7414_v22 }
 0x978   :  { %7433 = vmatpush3.bf16.msra.mxu1 %v7414_v22  ;;  %v5013_v22 = vld [vmem:[%s10794_s11 + $0x40] sm:$0xff] }
 0x979   :  { %7435 = vmatprep.subr.bf16.mxu1 %v7418_v4  ;;  %v7478_v9 = vpack.c.bf16 %v5014_v47, %v5013_v22 }
 0x97c   :  { %7437 = vmatpush3.bf16.msra.mxu1 %v7418_v4 }
 0x97d   :  { %7438 = vmatprep.subr.bf16.mxu1 %v7797_v28 }
 0x97f   :  { %6716 = vmatmul.mubr.msk.f32.vlgmr.msra.gmra.mrb[188].mxu1 %vm2458_vm8, %v6249_v54  ;;  %v7490_v54 = vpack.c.bf16 %v6276_v32, %v6275_v59 }
 0x980   :  { %6718 = vmatprep.mubr.msk.f32.mxu1 %vm2458_vm8, %v6250_v44  ;;  %v6277_v44 = vld [vmem:[%s10794_s11 + $0xc0] sm:$0xff] }
 0x983   :  { %6719 = vmatmul.mubr.msk.f32.gmra.mrb[190].mxu1 %vm2458_vm8, %v6251_v7  ;;  %v6278_v7 = vld [vmem:[%s10794_s11 + $0xc8] sm:$0xff] }
 0x984   :  { %6729 = vmatprep.mubr.msk.f32.mxu1 %vm7798_vm12, %v7795_v3 }
 0xa42   :  { %v6695_v60 = vpop.f32.mrb[184].mxu1 }
 0xa43   :  { %v4802_v18 = vpop.f32.mrb[185].mxu1 }
 0xa46   :  { %v6698_v20 = vpop.f32.mrb[186].mxu1 }
 0xa47   :  { %v4812_v51 = vpop.f32.mrb[187].mxu1 }
 0xa52   :  { %v6717_v43 = vpop.f32.mrb[188].mxu1 }
 0xa53   :  { %v4924_v52 = vmax.f32 %v6695_v60, %v6717_v43  ;;  %v4904_v8 = vpop.f32.mrb[189].mxu1  ;;  %v6271_v60 = vld [vmem:[%s10795_s10 + $0x10] sm:$0xff] }
 0xa54   :  { %v4923_v5 = vmax.f32 %v4802_v18, %v4904_v8  ;;  %v7493_v18 = vpack.c.bf16 %v6278_v7, %v6277_v44  ;;  %v6286_v43 = vld [vmem:[%s10794_s11 + $0xf0] sm:$0xff] }
 0xa55   :  { %v4928_v29 = vmax.f32 %v4924_v52, 0.0  ;;  %v6287_v52 = vld [vmem:[%s10794_s11 + $0xf8] sm:$0xff] }
 0xa56   :  { %v4927_v40 = vmax.f32 %v4923_v5, 0.0  ;;  %v6720_v19 = vpop.f32.mrb[190].mxu1  ;;  %v6284_v5 = vld [vmem:[%s10795_s10 + $0x18] sm:$0xff] }
 0xa57   :  { %v4926_v56 = vmax.f32 %v6698_v20, %v6720_v19  ;;  %v4914_v10 = vpop.f32.mrb[191].mxu1  ;;  %v6279_v20 = vld [vmem:[%s10794_s11 + $0xd0] sm:$0xff]  ;;  %v6289_v19 = vld [vmem:[%s10794_s11 + $0x108] sm:$0xff] }
 0xa58   :  { %v10555_v26 = vpack.c.bf16 %v4928_v29, %v4927_v40  ;;  %v4925_v23 = vmax.f32 %v4812_v51, %v4914_v10  ;;  %v6280_v51 = vld [vmem:[%s10794_s11 + $0xd8] sm:$0xff]  ;;  %v7508_v29 = vpack.c.bf16 %v6287_v52, %v6286_v43  ;;  %v6288_v40 = vld [vmem:[%s10794_s11 + $0x100] sm:$0xff] }
 0xa59   :  { %v4930_v15 = vmax.f32 %v4926_v56, 0.0  ;;  %v7496_v8 = vpack.c.bf16 %v6280_v51, %v6279_v20  ;;  %v7511_v56 = vpack.c.bf16 %v6289_v19, %v6288_v40  ;;  %v6281_v10 = vld [vmem:[%s10794_s11 + $0xe0] sm:$0xff] }
 0xa5a   :  { %v4929_v41 = vmax.f32 %v4925_v23, 0.0  ;;  %7440 = vmatpush3.bf16.msra.mxu1 %v10555_v26  ;;  %7446 = vmatpush3.bf16.msra.mxu0 %v10555_v26  ;;  %v6290_v23 = vld [vmem:[%s10794_s11 + $0x110] sm:$0xff] }
 0xa5b   :  { %7441 = vmatprep.subr.bf16.mxu1 %v7797_v28  ;;  %7447 = vmatprep.subr.bf16.mxu0 %v7797_v28 }
 0xa5c   :  { %v10567_v50 = vpack.c.bf16 %v4930_v15, %v4929_v41  ;;  %v6291_v41 = vld [vmem:[%s10794_s11 + $0x118] sm:$0xff] }
 0xa5d   :  { %v7514_v12 = vpack.c.bf16 %v6291_v41, %v6290_v23 }
 0xa5e   :  { %7443 = vmatpush3.bf16.msra.mxu1 %v10567_v50  ;;  %7449 = vmatpush3.bf16.msra.mxu0 %v10567_v50 }
 0xa5f   :  { %7450 = vmatprep.subr.bf16.mxu1 %v7797_v28  ;;  %7465 = vmatprep.subr.bf16.mxu0 %v7797_v28 }
 0xa61   :  { %6741 = vmatmul.mubr.msk.f32.vlgmr.msra.gmra.mrb[96].mxu0 %vm4456_vm11, %v6257_v34  ;;  %6730 = vmatmul.mubr.msk.f32.vlgmr.msra.gmra.mrb[192].mxu1 %vm4456_vm11, %v4931_v37  ;;  %v6294_v37 = vld [vmem:[%s10794_s11 + $0x130] sm:$0xff] }
 0xa62   :  { %7452 = vmatpush3.bf16.msra.mxu1 %v7451_v58  ;;  %6763 = vmatprep.mubr.msk.f32.mxu1 %vm7798_vm12, %v7795_v3  ;;  %v6295_v58 = vld [vmem:[%s10794_s11 + $0x138] sm:$0xff] }
 0xa63   :  { %7453 = vmatprep.subr.bf16.mxu1 %v7797_v28  ;;  %6786 = vmatprep.mubr.msk.f32.mxu0 %vm7798_vm12, %v7795_v3  ;;  %v7520_v61 = vpack.c.bf16 %v6295_v58, %v6294_v37 }
 0xa64   :  { %7467 = vmatpush3.bf16.msra.mxu0 %v7466_v2  ;;  %v5580_v2 = vld [vmem:[%s10796_s13 + $0x18] sm:$0xff] }
 0xa65   :  { %7468 = vmatprep.subr.bf16.mxu0 %v7797_v28  ;;  %v7526_v35 = vpack.c.bf16 %v5580_v2, %v5579_v42 }
 0xa66   :  { %7455 = vmatpush3.bf16.msra.mxu1 %v7454_v17 }
 0xa67   :  { %7456 = vmatprep.subr.bf16.mxu1 %v7797_v28 }
 0xa68   :  { %7470 = vmatpush3.bf16.msra.mxu0 %v7469_v27  ;;  %v5582_v27 = vld [vmem:[%s10796_s13 + $0x28] sm:$0xff] }
 0xa69   :  { %7471 = vmatprep.subr.bf16.mxu0 %v7797_v28  ;;  %v7529_v48 = vpack.c.bf16 %v5582_v27, %v5581_v39 }
 0xa6a   :  { %7458 = vmatpush3.bf16.msra.mxu1 %v7457_v25 }
 0xa6b   :  { %7459 = vmatprep.subr.bf16.mxu1 %v7797_v28 }
 0xa6c   :  { %7473 = vmatpush3.bf16.msra.mxu0 %v7472_v1 }
 0xa6d   :  { %7474 = vmatprep.subr.bf16.mxu0 %v7797_v28 }
 0xa6e   :  { %7461 = vmatpush3.bf16.msra.mxu1 %v7460_v53 }
 0xa6f   :  { %7462 = vmatprep.subr.bf16.mxu1 %v7797_v28 }
 0xa70   :  { %7476 = vmatpush3.bf16.msra.mxu0 %v7475_v0  ;;  %v6297_v0 = vld [vmem:[%s10797_s12] ss:$0 sm:$0xff] }
 0xa71   :  { %7477 = vmatprep.subr.bf16.mxu0 %v7797_v28 }
 0xa72   :  { %7464 = vmatpush3.bf16.msra.mxu1 %v7463_v21  ;;  %v5578_v21 = vld [vmem:[%s10796_s13 + $0x8] sm:$0xff] }
 0xa73   :  { %7480 = vmatprep.subr.bf16.mxu1 %v7797_v28  ;;  %v7523_v33 = vpack.c.bf16 %v5578_v21, %v5577_v57 }
 0xa74   :  { %7479 = vmatpush3.bf16.msra.mxu0 %v7478_v9 }
 0xa75   :  { %7486 = vmatprep.subr.bf16.mxu0 %v7797_v28 }
 0xb34   :  { %v5086_v11 = vpop.f32.mrb[96].mxu0  ;;  %v5001_v4 = vpop.f32.mrb[192].mxu1 }
 0xb35   :  { %6764 = vmatmul.mubr.msk.f32.vlgmr.msra.gmra.mrb[194].mxu1 %vm5101_vm13, %v5086_v11  ;;  %v6742_v62 = vpop.f32.mrb[97].mxu0  ;;  %6787 = vmatmul.mubr.msk.f32.vlgmr.msra.gmra.mrb[98].mxu0 %vm5101_vm13, %v5001_v4  ;;  %v6731_v6 = vpop.f32.mrb[193].mxu1 }
 0xb36   :  { %7482 = vmatpush3.bf16.msra.mxu1 %v10555_v26  ;;  %6797 = vmatprep.mubr.msk.f32.mxu1 %vm7798_vm12, %v7795_v3 }
 0xb37   :  { %7483 = vmatprep.subr.bf16.mxu1 %v7797_v28  ;;  %7488 = vmatpush3.bf16.msra.mxu0 %v7487_v55 }
 0xb38   :  { %7489 = vmatprep.subr.bf16.mxu0 %v7797_v28  ;;  %6820 = vmatprep.mubr.msk.f32.mxu0 %vm7798_vm12, %v7795_v3 }
 0xb3a   :  { %7485 = vmatpush3.bf16.msra.mxu1 %v10567_v50 }
 0xb3b   :  { %7501 = vmatprep.subr.bf16.mxu1 %v7797_v28  ;;  %7491 = vmatpush3.bf16.msra.mxu0 %v7490_v54 }
 0xb3c   :  { %7492 = vmatprep.subr.bf16.mxu0 %v7797_v28 }
 0xb3d   :  { %6798 = vmatmul.mubr.msk.f32.vlgmr.msra.gmra.mrb[196].mxu1 %vm4456_vm11, %v6271_v60 }
 0xb3e   :  { %7503 = vmatpush3.bf16.msra.mxu1 %v10555_v26  ;;  %6831 = vmatprep.mubr.msk.f32.mxu1 %vm7798_vm12, %v7795_v3  ;;  %v6282_v26 = vld [vmem:[%s10794_s11 + $0xe8] sm:$0xff] }
 0xb3f   :  { %7504 = vmatprep.subr.bf16.mxu1 %v7797_v28  ;;  %7494 = vmatpush3.bf16.msra.mxu0 %v7493_v18  ;;  %v7499_v15 = vpack.c.bf16 %v6282_v26, %v6281_v10 }
 0xb40   :  { %7495 = vmatprep.subr.bf16.mxu0 %v7797_v28 }
 0xb42   :  { %7506 = vmatpush3.bf16.msra.mxu1 %v10567_v50  ;;  %v6293_v50 = vld [vmem:[%s10794_s11 + $0x128] sm:$0xff] }
 0xb43   :  { %7507 = vmatprep.subr.bf16.mxu1 %v7797_v28  ;;  %7497 = vmatpush3.bf16.msra.mxu0 %v7496_v8  ;;  %v7517_v34 = vpack.c.bf16 %v6293_v50, %v6292_v16 }
 0xb44   :  { %7498 = vmatprep.subr.bf16.mxu0 %v7797_v28 }
 0xb45   :  { %6832 = vmatmul.mubr.msk.f32.vlgmr.msra.gmra.mrb[198].mxu1 %vm4456_vm11, %v6284_v5 }
 0xb46   :  { %7509 = vmatpush3.bf16.msra.mxu1 %v7508_v29  ;;  %6854 = vmatprep.mubr.msk.f32.mxu1 %vm7798_vm12, %v7795_v3 }
 0xb47   :  { %7510 = vmatprep.subr.bf16.mxu1 %v7797_v28  ;;  %7500 = vmatpush3.bf16.msra.mxu0 %v7499_v15 }
 0xb48   :  { %7522 = vmatprep.subr.bf16.mxu0 %v7797_v28 }
 0xb4a   :  { %7512 = vmatpush3.bf16.msra.mxu1 %v7511_v56 }
 0xb4b   :  { %7513 = vmatprep.subr.bf16.mxu1 %v7797_v28 }
 0xb4e   :  { %7515 = vmatpush3.bf16.msra.mxu1 %v7514_v12 }
 0xb4f   :  { %7516 = vmatprep.subr.bf16.mxu1 %v7797_v28 }
 0xb52   :  { %7518 = vmatpush3.bf16.msra.mxu1 %v7517_v34 }
 0xb53   :  { %7519 = vmatprep.subr.bf16.mxu1 %v7797_v28 }
 0xb56   :  { %7521 = vmatpush3.bf16.msra.mxu1 %v7520_v61 }
 0xc08   :  { %v5171_v49 = vpop.f32.mrb[194].mxu1  ;;  %v5244_v17 = vpop.f32.mrb[98].mxu0 }
 0xc09   :  { %v6765_v13 = vpop.f32.mrb[195].mxu1  ;;  %v5245_v24 = vadd.f32 %v5244_v17, %v5171_v49  ;;  %v6788_v25 = vpop.f32.mrb[99].mxu0 }
 0xc10   :  { %v5319_v38 = vpop.f32.mrb[196].mxu1 }
 0xc11   :  { %6821 = vmatmul.mubr.msk.f32.vlgmr.msra.gmra.mrb[100].mxu0 %vm5101_vm13, %v5319_v38  ;;  %v6799_v30 = vpop.f32.mrb[197].mxu1 }
 0xc12   :  { %6871 = vmatprep.mubr.msk.f32.mxu0 %vm7798_vm12, %v7795_v3  ;;  %7524 = vmatpush3.bf16.msra.mxu0 %v7523_v33 }
 0xc13   :  { %7525 = vmatprep.subr.bf16.mxu0 %v7797_v28 }
 0xc16   :  { %7527 = vmatpush3.bf16.msra.mxu0 %v7526_v35 }
 0xc17   :  { %7528 = vmatprep.subr.bf16.mxu0 %v7797_v28 }
 0xc18   :  { %v5479_v53 = vpop.f32.mrb[198].mxu1 }
 0xc19   :  { %6855 = vmatmul.mubr.msk.f32.vlgmr.msra.gmra.mrb[200].mxu1 %vm5101_vm13, %v5479_v53  ;;  %v6833_v36 = vpop.f32.mrb[199].mxu1 }
 0xc1a   :  { %7530 = vmatpush3.bf16.msra.mxu0 %v7529_v48 }
 0xc1b   :  { %6869 = vmatprep.subr.mxu0 %v7795_v3  ;;  %v6298_v3 = vld [vmem:[%s10798_s14] ss:$0 sm:$0xff] }
 0xc1e   :  { %6870 = vmatpush3.msk.msra.mxu0 %vm5595_vm14, %v5583_v14 }
 0xce4   :  { %v5403_v1 = vpop.f32.mrb[100].mxu0 }
 0xce5   :  { %v5407_v28 = vadd.f32 %v5403_v1, %v5245_v24  ;;  %v6822_v63 = vpop.f32.mrb[101].mxu0 }
 0xcec   :  { %v5563_v31 = vpop.f32.mrb[200].mxu1 }
 0xced   :  { %v5567_v22 = vadd.f32 %v5563_v31, %v5407_v28  ;;  %v6856_v47 = vpop.f32.mrb[201].mxu1 }
 0xcef   :  { %v5575_v9 = vadd.f32 %v6297_v0, %v5567_v22 }
 0xcf1   :  { %v5576_v45 = vmax.f32 %v5575_v9, 0.0 }
 0xcf3   :  { %6872 = vmatmul.mubr.msk.f32.vlgmr.msra.gmra.mrb[102].mxu0 %vm5591_vm15, %v5576_v45 }
 0xdc6   :  { %v5665_v46 = vpop.f32.mrb[102].mxu0 }
 0xdc7   :  { %v5666_v55 = vadd.f32 %v6298_v3, %v5665_v46  ;;  %v6873_v11 = vpop.f32.mrb[103].mxu0 }
 0xdc9   :  { %v5670_v4 = vsel %vm5669_vm0, %v5666_v55, -inf }
 0xdca   :  { %5671 = vmax.xlane.f32.xlu0 %v5670_v4 }
 0xe57   :  { %v5672_v59 = vpop.xlane.xlu0 %5671 }
 0xe58   :  { %v5673_v32 = vsub.f32 %v5666_v55, %v5672_v59 }
 0xe5a   :  { %v5674_v62 = vmul.f32 1.442695, %v5673_v32 }
 0xe5c   :  { %7791 = vpow2.f32 %v5674_v62 }
 0xe66   :  { %v7792_v6 = vpop.eup %7791 }
 0xe67   :  { %v5676_v54 = vsel %vm5669_vm0, %v7792_v6, 0.0 }
 0xe68   :  { %5677 = vadd.xlane.f32.xlu0 %v5676_v54 }
 0xef5   :  { %v5678_v44 = vpop.xlane.xlu0 %5677 }
 0xef6   :  { %7793 = vlog2.f32 %v5678_v44 }
 0xf00   :  { %v7794_v7 = vpop.eup %7793 }
 0xf01   :  { %v5680_v60 = vmul.f32 0.6931472, %v7794_v7 }
 0xf03   :  { %v5681_v18 = vadd.f32 %v5680_v60, %v5672_v59 }
 0xf05   :  { %v5682_v20 = vsub.f32 %v5666_v55, %v5681_v18 }
 0xf07   :  { %5683 = vst.msk [vmem:[%s10799_s15] sm:$0xff] %vm5669_vm0, %v5682_v20 }

</bundles_post_ra>
